<compile_context>
chip_gen: v6e
topology: v6e:2x2x1
jax: 0.10.0
libtpu: 0.0.40
codegen_flags: <defaults>
</compile_context>

<pallas_src>
import functools

import jax
import jax.numpy as jnp
import numpy as np
from jax import lax
from jax.experimental import pallas as pl
from jax.experimental.pallas import tpu as pltpu


def _silu(x, approx=True):
    # x * sigmoid(x); sigmoid = EUP exp + reciprocal (approx=True -> EUP vrcp).
    return x * pl.reciprocal(1.0 + jnp.exp(-x), approx=approx)


def spp_kernel(x_ref, w1_ref, b1_ref, w2_ref, b2_ref, o_ref, *,
               img_w, m_valid, radius, n_pool):
    m_pad, _c1 = x_ref.shape
    c_mid = w1_ref.shape[1]
    nb, _, c2 = w2_ref.shape
    assert nb == n_pool + 1

    # cv1: 1x1 conv (+ folded BN bias) + SiLU on the flat (H*W, C1) view.
    # x_ref is already bf16 (cast in the wrapper), w1 is bf16, accumulate f32.
    y1 = jnp.dot(x_ref[...], w1_ref[...], preferred_element_type=jnp.float32)
    y1 = _silu(y1 + b1_ref[...])                            # (m_pad, c_mid) f32

    # ---- edge masks for the separable (2r+1)^2 SAME max pool ----------------
    # A shift by d along the flat axis is a circular pltpu.roll; taps falling
    # outside the image are invalidated with an additive 0/-inf mask (matching
    # PyTorch's -inf max-pool padding).  Index math runs at lane width 1; each
    # tap's mask is broadcast to full width once and reused by all cascade
    # stages.
    neg = jnp.float32(-jnp.inf)
    pos = lax.broadcasted_iota(jnp.int32, (m_pad, 1), 0)       # flat index
    wpos = pos % img_w                                         # column index

    def full_mask(valid_narrow):
        m = jnp.where(valid_narrow, jnp.float32(0.0), neg)    # (m_pad, 1)
        return jnp.broadcast_to(m, (m_pad, c_mid))

    row_taps = []   # shifts within a row      (offsets +-1 .. +-radius)
    col_taps = []   # shifts by whole rows     (offsets +-W .. +-radius*W)
    for s in range(1, radius + 1):
        row_taps.append((s, full_mask(wpos < img_w - s)))
        row_taps.append((-s, full_mask(wpos >= s)))
        col_taps.append((s * img_w, full_mask(pos < m_valid - s * img_w)))
        col_taps.append((-s * img_w, full_mask(pos >= s * img_w)))

    def shifted_max(r, taps):
        out = r
        for d, mask in taps:
            rolled = pltpu.roll(r, shift=(-d) % m_pad, axis=0)
            out = jnp.maximum(out, rolled + mask)
        return out

    def maxpool(r):
        return shifted_max(shifted_max(r, row_taps), col_taps)

    # ---- SPPF cascade with cv2 fused per branch -----------------------------
    # mp5, mp5∘mp5 (== mp9), mp5∘mp5∘mp5 (== mp13).  Each stage's K=c_mid dot
    # is accumulated into y2 right away so the MXU overlaps the next stage's
    # pooling and only one pooled map stays live.
    cur = y1
    y2 = jnp.dot(cur.astype(jnp.bfloat16), w2_ref[0],
                 preferred_element_type=jnp.float32)
    for i in range(n_pool):
        cur = maxpool(cur)
        y2 = y2 + jnp.dot(cur.astype(jnp.bfloat16), w2_ref[i + 1],
                          preferred_element_type=jnp.float32)

    # cv2 bias + SiLU (exact reciprocal here; one-shot, off the hot path).
    o_ref[...] = _silu(y2 + b2_ref[...], approx=False).astype(o_ref.dtype)


def spp_forward(x_nhwc, w1, b1, w2_stacked, b2, ks=(5, 9, 13)):
    N, H, W, C1 = x_nhwc.shape
    C_ = w1.shape[1]
    nb, _, C2 = w2_stacked.shape
    assert nb == len(ks) + 1
    k0 = ks[0]
    radius = k0 // 2
    assert k0 % 2 == 1 and all(k == 2 * (i + 1) * radius + 1
                               for i, k in enumerate(ks)), \
        "SPPF cascade rewrite needs k = (k0, 2*k0-1, 3*k0-2, ...), e.g. (5,9,13)"

    # Flatten spatial dims; pad the sublane dim (H*W) to a multiple of 8 so the
    # flat view / rolls are layout-clean even for odd maps (e.g. 13x13).
    # Activations are cast to bf16 here -> half the per-step input DMA bytes.
    M = H * W
    Mp = ((M + 7) // 8) * 8
    xf = x_nhwc.astype(jnp.bfloat16).reshape(N, M, C1)
    if Mp != M:
        xf = jnp.pad(xf, ((0, 0), (0, Mp - M), (0, 0)))

    kernel = functools.partial(spp_kernel, img_w=W, m_valid=M,
                               radius=radius, n_pool=len(ks))
    out_flat = pl.pallas_call(
        kernel,
        out_shape=jax.ShapeDtypeStruct((N, Mp, C2), x_nhwc.dtype),
        grid_spec=pltpu.PrefetchScalarGridSpec(
            num_scalar_prefetch=0,
            grid=(N,),
            in_specs=[
                pl.BlockSpec((pl.Squeezed(), Mp, C1), lambda n: (n, 0, 0)),
                pl.BlockSpec((C1, C_), lambda n: (0, 0)),
                pl.BlockSpec((1, C_), lambda n: (0, 0)),
                pl.BlockSpec((nb, C_, C2), lambda n: (0, 0, 0)),
                pl.BlockSpec((1, C2), lambda n: (0, 0)),
            ],
            out_specs=pl.BlockSpec((pl.Squeezed(), Mp, C2),
                                   lambda n: (n, 0, 0)),
        ),
        compiler_params=pltpu.CompilerParams(
            dimension_semantics=("parallel",)),
    )(xf, w1.astype(jnp.bfloat16), b1, w2_stacked.astype(jnp.bfloat16), b2)

    return out_flat[:, :M].reshape(N, H, W, C2)


def spp_reference(x_nhwc, w1, b1, w2_stacked, b2, ks=(5, 9, 13)):
    """Pure-JAX reference (PyTorch SPP with BN folded, direct k=5/9/13 pools,
    same bf16-operand / f32-accumulate matmul policy as the kernel)."""
    def silu(v):
        return v * jax.nn.sigmoid(v)

    y1 = jnp.einsum("nhwc,cd->nhwd", x_nhwc.astype(jnp.bfloat16),
                    w1.astype(jnp.bfloat16),
                    preferred_element_type=jnp.float32) + b1
    y1 = silu(y1)
    feats = [y1]
    for k in ks:
        p = k // 2
        xp = jnp.pad(y1, ((0, 0), (p, p), (p, p), (0, 0)),
                     constant_values=-jnp.inf)
        feats.append(lax.reduce_window(xp, -jnp.inf, lax.max,
                                       (1, k, k, 1), (1, 1, 1, 1), "VALID"))
    y2 = 0.0
    for i, f in enumerate(feats):
        y2 = y2 + jnp.einsum("nhwc,cd->nhwd", f.astype(jnp.bfloat16),
                             w2_stacked[i].astype(jnp.bfloat16),
                             preferred_element_type=jnp.float32)
    return silu(y2 + b2)


def _fused_conv_params(key, cin, cout, eps=1e-3):
    """Deterministic Conv2d(1x1, bias=False) + BatchNorm2d folded into (w, b)."""
    kw, kg, kb, km, kv = jax.random.split(key, 5)
    w = jax.random.normal(kw, (cout, cin), jnp.float32) * 0.1
    gamma = jax.random.uniform(kg, (cout,), jnp.float32, 0.5, 1.5)
    beta = jax.random.normal(kb, (cout,), jnp.float32) * 0.1
    mean = jax.random.normal(km, (cout,), jnp.float32) * 0.1
    var = jax.random.uniform(kv, (cout,), jnp.float32, 0.5, 1.5)
    scale = gamma / jnp.sqrt(var + eps)
    w_eff = (w * scale[:, None]).T                              # (cin, cout)
    b_eff = (beta - mean * scale)[None, :]                      # (1, cout)
    return w_eff, b_eff


if __name__ == "__main__":
    key = jax.random.PRNGKey(0)
    N, C1, H, W = 2, 4, 16, 16      # PyTorch NCHW input shape: (2, 4, 16, 16)
    C2 = 8
    ks = (5, 9, 13)
    C_ = C1 // 2
    nb = len(ks) + 1

    kx, k1, k2 = jax.random.split(key, 3)
    x_nchw = jax.random.normal(kx, (N, C1, H, W), jnp.float32)

    w1, b1 = _fused_conv_params(k1, C1, C_)
    w2_full, b2 = _fused_conv_params(k2, C_ * nb, C2)
    # cv2 weight stacked per SPP branch: (nb, C_, C2).
    w2_stacked = w2_full.reshape(nb, C_, C2)

    # NCHW -> NHWC for the kernel.
    x_nhwc = jnp.transpose(x_nchw, (0, 2, 3, 1))

    out = spp_forward(x_nhwc, w1, b1, w2_stacked, b2, ks)
    out = jax.block_until_ready(out)
    assert out.shape == (N, H, W, C2)

    ref = spp_reference(x_nhwc, w1, b1, w2_stacked, b2, ks)
    # Tolerance covers bf16 matmul operands + the approx-reciprocal sigmoid in
    # the kernel's cv1 SiLU (reference uses exact sigmoid); structural errors
    # (pooling windows, BN folding, branch sums) would show up at O(0.1)+.
    np.testing.assert_allclose(np.asarray(out), np.asarray(ref),
                               rtol=2e-2, atol=2e-2)
    print("KERNEL_OK")
</pallas_src>

<mosaic_0001>
module attributes {stable_mosaic.version = 11 : i64} {
  func.func @spp_kernel(%arg0: i32, %arg1: memref<1x256x4xbf16, #tpu.memory_space<vmem>>, %arg2: memref<4x2xbf16, #tpu.memory_space<vmem>>, %arg3: memref<1x2xf32, #tpu.memory_space<vmem>>, %arg4: memref<4x2x8xbf16, #tpu.memory_space<vmem>>, %arg5: memref<1x8xf32, #tpu.memory_space<vmem>>, %arg6: memref<1x256x8xf32, #tpu.memory_space<vmem>>) attributes {dimension_semantics = [#tpu.dimension_semantics<parallel>], iteration_bounds = array<i64: 2>, scalar_prefetch = 0 : i64, scratch_operands = 0 : i64, tpu.core_type = #tpu.core_type<tc>, window_params = [{transform_indices = @transform_0, window_bounds = array<i64: 1, 256, 4>}, {pipeline_mode = #tpu.pipeline_mode<synchronous>, transform_indices = @transform_1, window_bounds = array<i64: 4, 2>}, {pipeline_mode = #tpu.pipeline_mode<synchronous>, transform_indices = @transform_2, window_bounds = array<i64: 1, 2>}, {pipeline_mode = #tpu.pipeline_mode<synchronous>, transform_indices = @transform_3, window_bounds = array<i64: 4, 2, 8>}, {pipeline_mode = #tpu.pipeline_mode<synchronous>, transform_indices = @transform_4, window_bounds = array<i64: 1, 8>}, {transform_indices = @transform_5, window_bounds = array<i64: 1, 256, 8>}]} {
    %c0 = arith.constant 0 : index
    %c0_0 = arith.constant 0 : index
    %c0_1 = arith.constant 0 : index
    %0 = vector.load %arg1[%c0, %c0_0, %c0_1] : memref<1x256x4xbf16, #tpu.memory_space<vmem>>, vector<1x256x4xbf16>
    %1 = vector.shape_cast %0 : vector<1x256x4xbf16> to vector<256x4xbf16>
    %c0_2 = arith.constant 0 : index
    %c0_3 = arith.constant 0 : index
    %2 = vector.load %arg2[%c0_2, %c0_3] : memref<4x2xbf16, #tpu.memory_space<vmem>>, vector<4x2xbf16>
    %cst = arith.constant dense<0.000000e+00> : vector<256x2xf32>
    %3 = tpu.matmul %1, %2, %cst {dimension_numbers = #tpu.dot_dimension_numbers<[1], [0], [0], [1], [0, 0, 1, 1], [], []>} : vector<256x4xbf16>, vector<4x2xbf16>, vector<256x2xf32> -> vector<256x2xf32>
    %c0_4 = arith.constant 0 : index
    %c0_5 = arith.constant 0 : index
    %4 = vector.load %arg3[%c0_4, %c0_5] : memref<1x2xf32, #tpu.memory_space<vmem>>, vector<1x2xf32>
    %5 = vector.broadcast %4 : vector<1x2xf32> to vector<256x2xf32>
    %6 = arith.addf %3, %5 : vector<256x2xf32>
    %cst_6 = arith.constant 0.000000e+00 : f32
    %7 = vector.broadcast %cst_6 : f32 to vector<256x2xf32>
    %8 = arith.subf %7, %6 : vector<256x2xf32>
    %9 = math.exp %8 : vector<256x2xf32>
    %cst_7 = arith.constant 1.000000e+00 : f32
    %10 = vector.broadcast %cst_7 : f32 to vector<256x2xf32>
    %11 = arith.addf %10, %9 : vector<256x2xf32>
    %12 = tpu.reciprocal %11 {approx = true} : vector<256x2xf32> -> vector<256x2xf32>
    %13 = arith.mulf %6, %12 : vector<256x2xf32>
    %14 = tpu.iota {dimensions = array<i32: 0>} : vector<256x1xi32>
    %c16_i32 = arith.constant 16 : i32
    %c0_i32 = arith.constant 0 : i32
    %15 = arith.cmpi eq, %c16_i32, %c0_i32 : i32
    %c1_i32 = arith.constant 1 : i32
    %16 = arith.select %15, %c1_i32, %c16_i32 : i32
    %17 = vector.broadcast %16 : i32 to vector<256x1xi32>
    %18 = arith.remsi %14, %17 : vector<256x1xi32>
    %c0_i32_8 = arith.constant 0 : i32
    %19 = vector.broadcast %c0_i32_8 : i32 to vector<256x1xi32>
    %20 = arith.cmpi ne, %18, %19 : vector<256x1xi32>
    %c0_i32_9 = arith.constant 0 : i32
    %21 = vector.broadcast %c0_i32_9 : i32 to vector<256x1xi32>
    %22 = arith.cmpi slt, %18, %21 : vector<256x1xi32>
    %c0_i32_10 = arith.constant 0 : i32
    %23 = arith.cmpi slt, %16, %c0_i32_10 : i32
    %24 = vector.broadcast %23 : i1 to vector<256x1xi1>
    %25 = vector.broadcast %24 : vector<256x1xi1> to vector<256x1xi1>
    %26 = arith.xori %22, %25 : vector<256x1xi1>
    %27 = arith.andi %26, %20 : vector<256x1xi1>
    %28 = vector.broadcast %16 : i32 to vector<256x1xi32>
    %29 = arith.addi %18, %28 : vector<256x1xi32>
    %30 = arith.select %27, %29, %18 : vector<256x1xi1>, vector<256x1xi32>
    %c15_i32 = arith.constant 15 : i32
    %31 = vector.broadcast %c15_i32 : i32 to vector<256x1xi32>
    %32 = arith.cmpi slt, %30, %31 : vector<256x1xi32>
    %cst_11 = arith.constant 0.000000e+00 : f32
    %cst_12 = arith.constant 0xFF800000 : f32
    %33 = vector.broadcast %cst_11 : f32 to vector<256x1xf32>
    %34 = vector.broadcast %cst_12 : f32 to vector<256x1xf32>
    %35 = arith.select %32, %33, %34 : vector<256x1xi1>, vector<256x1xf32>
    %36 = vector.shape_cast %35 : vector<256x1xf32> to vector<256x1xf32>
    %37 = vector.broadcast %36 : vector<256x1xf32> to vector<256x2xf32>
    %c1_i32_13 = arith.constant 1 : i32
    %38 = vector.broadcast %c1_i32_13 : i32 to vector<256x1xi32>
    %39 = arith.cmpi sge, %30, %38 : vector<256x1xi32>
    %cst_14 = arith.constant 0.000000e+00 : f32
    %cst_15 = arith.constant 0xFF800000 : f32
    %40 = vector.broadcast %cst_14 : f32 to vector<256x1xf32>
    %41 = vector.broadcast %cst_15 : f32 to vector<256x1xf32>
    %42 = arith.select %39, %40, %41 : vector<256x1xi1>, vector<256x1xf32>
    %43 = vector.shape_cast %42 : vector<256x1xf32> to vector<256x1xf32>
    %44 = vector.broadcast %43 : vector<256x1xf32> to vector<256x2xf32>
    %c240_i32 = arith.constant 240 : i32
    %45 = vector.broadcast %c240_i32 : i32 to vector<256x1xi32>
    %46 = arith.cmpi slt, %14, %45 : vector<256x1xi32>
    %cst_16 = arith.constant 0.000000e+00 : f32
    %cst_17 = arith.constant 0xFF800000 : f32
    %47 = vector.broadcast %cst_16 : f32 to vector<256x1xf32>
    %48 = vector.broadcast %cst_17 : f32 to vector<256x1xf32>
    %49 = arith.select %46, %47, %48 : vector<256x1xi1>, vector<256x1xf32>
    %50 = vector.shape_cast %49 : vector<256x1xf32> to vector<256x1xf32>
    %51 = vector.broadcast %50 : vector<256x1xf32> to vector<256x2xf32>
    %c16_i32_18 = arith.constant 16 : i32
    %52 = vector.broadcast %c16_i32_18 : i32 to vector<256x1xi32>
    %53 = arith.cmpi sge, %14, %52 : vector<256x1xi32>
    %cst_19 = arith.constant 0.000000e+00 : f32
    %cst_20 = arith.constant 0xFF800000 : f32
    %54 = vector.broadcast %cst_19 : f32 to vector<256x1xf32>
    %55 = vector.broadcast %cst_20 : f32 to vector<256x1xf32>
    %56 = arith.select %53, %54, %55 : vector<256x1xi1>, vector<256x1xf32>
    %57 = vector.shape_cast %56 : vector<256x1xf32> to vector<256x1xf32>
    %58 = vector.broadcast %57 : vector<256x1xf32> to vector<256x2xf32>
    %c14_i32 = arith.constant 14 : i32
    %59 = vector.broadcast %c14_i32 : i32 to vector<256x1xi32>
    %60 = arith.cmpi slt, %30, %59 : vector<256x1xi32>
    %cst_21 = arith.constant 0.000000e+00 : f32
    %cst_22 = arith.constant 0xFF800000 : f32
    %61 = vector.broadcast %cst_21 : f32 to vector<256x1xf32>
    %62 = vector.broadcast %cst_22 : f32 to vector<256x1xf32>
    %63 = arith.select %60, %61, %62 : vector<256x1xi1>, vector<256x1xf32>
    %64 = vector.shape_cast %63 : vector<256x1xf32> to vector<256x1xf32>
    %65 = vector.broadcast %64 : vector<256x1xf32> to vector<256x2xf32>
    %c2_i32 = arith.constant 2 : i32
    %66 = vector.broadcast %c2_i32 : i32 to vector<256x1xi32>
    %67 = arith.cmpi sge, %30, %66 : vector<256x1xi32>
    %cst_23 = arith.constant 0.000000e+00 : f32
    %cst_24 = arith.constant 0xFF800000 : f32
    %68 = vector.broadcast %cst_23 : f32 to vector<256x1xf32>
    %69 = vector.broadcast %cst_24 : f32 to vector<256x1xf32>
    %70 = arith.select %67, %68, %69 : vector<256x1xi1>, vector<256x1xf32>
    %71 = vector.shape_cast %70 : vector<256x1xf32> to vector<256x1xf32>
    %72 = vector.broadcast %71 : vector<256x1xf32> to vector<256x2xf32>
    %c224_i32 = arith.constant 224 : i32
    %73 = vector.broadcast %c224_i32 : i32 to vector<256x1xi32>
    %74 = arith.cmpi slt, %14, %73 : vector<256x1xi32>
    %cst_25 = arith.constant 0.000000e+00 : f32
    %cst_26 = arith.constant 0xFF800000 : f32
    %75 = vector.broadcast %cst_25 : f32 to vector<256x1xf32>
    %76 = vector.broadcast %cst_26 : f32 to vector<256x1xf32>
    %77 = arith.select %74, %75, %76 : vector<256x1xi1>, vector<256x1xf32>
    %78 = vector.shape_cast %77 : vector<256x1xf32> to vector<256x1xf32>
    %79 = vector.broadcast %78 : vector<256x1xf32> to vector<256x2xf32>
    %c32_i32 = arith.constant 32 : i32
    %80 = vector.broadcast %c32_i32 : i32 to vector<256x1xi32>
    %81 = arith.cmpi sge, %14, %80 : vector<256x1xi32>
    %cst_27 = arith.constant 0.000000e+00 : f32
    %cst_28 = arith.constant 0xFF800000 : f32
    %82 = vector.broadcast %cst_27 : f32 to vector<256x1xf32>
    %83 = vector.broadcast %cst_28 : f32 to vector<256x1xf32>
    %84 = arith.select %81, %82, %83 : vector<256x1xi1>, vector<256x1xf32>
    %85 = vector.shape_cast %84 : vector<256x1xf32> to vector<256x1xf32>
    %86 = vector.broadcast %85 : vector<256x1xf32> to vector<256x2xf32>
    %87 = arith.truncf %13 : vector<256x2xf32> to vector<256x2xbf16>
    %c0_29 = arith.constant 0 : index
    %c0_30 = arith.constant 0 : index
    %c0_31 = arith.constant 0 : index
    %88 = vector.load %arg4[%c0_29, %c0_30, %c0_31] : memref<4x2x8xbf16, #tpu.memory_space<vmem>>, vector<1x2x8xbf16>
    %89 = vector.shape_cast %88 : vector<1x2x8xbf16> to vector<2x8xbf16>
    %cst_32 = arith.constant dense<0.000000e+00> : vector<256x8xf32>
    %90 = tpu.matmul %87, %89, %cst_32 {dimension_numbers = #tpu.dot_dimension_numbers<[1], [0], [0], [1], [0, 0, 1, 1], [], []>} : vector<256x2xbf16>, vector<2x8xbf16>, vector<256x8xf32> -> vector<256x8xf32>
    %c255_i32 = arith.constant 255 : i32
    %91 = tpu.dynamic_rotate %13 by %c255_i32 dim 0 : vector<256x2xf32>, i32 -> vector<256x2xf32>
    %92 = arith.addf %91, %37 : vector<256x2xf32>
    %93 = arith.maximumf %13, %92 : vector<256x2xf32>
    %c1_i32_33 = arith.constant 1 : i32
    %94 = tpu.dynamic_rotate %13 by %c1_i32_33 dim 0 : vector<256x2xf32>, i32 -> vector<256x2xf32>
    %95 = arith.addf %94, %44 : vector<256x2xf32>
    %96 = arith.maximumf %93, %95 : vector<256x2xf32>
    %c254_i32 = arith.constant 254 : i32
    %97 = tpu.dynamic_rotate %13 by %c254_i32 dim 0 : vector<256x2xf32>, i32 -> vector<256x2xf32>
    %98 = arith.addf %97, %65 : vector<256x2xf32>
    %99 = arith.maximumf %96, %98 : vector<256x2xf32>
    %c2_i32_34 = arith.constant 2 : i32
    %100 = tpu.dynamic_rotate %13 by %c2_i32_34 dim 0 : vector<256x2xf32>, i32 -> vector<256x2xf32>
    %101 = arith.addf %100, %72 : vector<256x2xf32>
    %102 = arith.maximumf %99, %101 : vector<256x2xf32>
    %c240_i32_35 = arith.constant 240 : i32
    %103 = tpu.dynamic_rotate %102 by %c240_i32_35 dim 0 : vector<256x2xf32>, i32 -> vector<256x2xf32>
    %104 = arith.addf %103, %51 : vector<256x2xf32>
    %105 = arith.maximumf %102, %104 : vector<256x2xf32>
    %c16_i32_36 = arith.constant 16 : i32
    %106 = tpu.dynamic_rotate %102 by %c16_i32_36 dim 0 : vector<256x2xf32>, i32 -> vector<256x2xf32>
    %107 = arith.addf %106, %58 : vector<256x2xf32>
    %108 = arith.maximumf %105, %107 : vector<256x2xf32>
    %c224_i32_37 = arith.constant 224 : i32
    %109 = tpu.dynamic_rotate %102 by %c224_i32_37 dim 0 : vector<256x2xf32>, i32 -> vector<256x2xf32>
    %110 = arith.addf %109, %79 : vector<256x2xf32>
    %111 = arith.maximumf %108, %110 : vector<256x2xf32>
    %c32_i32_38 = arith.constant 32 : i32
    %112 = tpu.dynamic_rotate %102 by %c32_i32_38 dim 0 : vector<256x2xf32>, i32 -> vector<256x2xf32>
    %113 = arith.addf %112, %86 : vector<256x2xf32>
    %114 = arith.maximumf %111, %113 : vector<256x2xf32>
    %115 = arith.truncf %114 : vector<256x2xf32> to vector<256x2xbf16>
    %c1 = arith.constant 1 : index
    %c0_39 = arith.constant 0 : index
    %c0_40 = arith.constant 0 : index
    %116 = vector.load %arg4[%c1, %c0_39, %c0_40] : memref<4x2x8xbf16, #tpu.memory_space<vmem>>, vector<1x2x8xbf16>
    %117 = vector.shape_cast %116 : vector<1x2x8xbf16> to vector<2x8xbf16>
    %cst_41 = arith.constant dense<0.000000e+00> : vector<256x8xf32>
    %118 = tpu.matmul %115, %117, %cst_41 {dimension_numbers = #tpu.dot_dimension_numbers<[1], [0], [0], [1], [0, 0, 1, 1], [], []>} : vector<256x2xbf16>, vector<2x8xbf16>, vector<256x8xf32> -> vector<256x8xf32>
    %119 = arith.addf %90, %118 : vector<256x8xf32>
    %c255_i32_42 = arith.constant 255 : i32
    %120 = tpu.dynamic_rotate %114 by %c255_i32_42 dim 0 : vector<256x2xf32>, i32 -> vector<256x2xf32>
    %121 = arith.addf %120, %37 : vector<256x2xf32>
    %122 = arith.maximumf %114, %121 : vector<256x2xf32>
    %c1_i32_43 = arith.constant 1 : i32
    %123 = tpu.dynamic_rotate %114 by %c1_i32_43 dim 0 : vector<256x2xf32>, i32 -> vector<256x2xf32>
    %124 = arith.addf %123, %44 : vector<256x2xf32>
    %125 = arith.maximumf %122, %124 : vector<256x2xf32>
    %c254_i32_44 = arith.constant 254 : i32
    %126 = tpu.dynamic_rotate %114 by %c254_i32_44 dim 0 : vector<256x2xf32>, i32 -> vector<256x2xf32>
    %127 = arith.addf %126, %65 : vector<256x2xf32>
    %128 = arith.maximumf %125, %127 : vector<256x2xf32>
    %c2_i32_45 = arith.constant 2 : i32
    %129 = tpu.dynamic_rotate %114 by %c2_i32_45 dim 0 : vector<256x2xf32>, i32 -> vector<256x2xf32>
    %130 = arith.addf %129, %72 : vector<256x2xf32>
    %131 = arith.maximumf %128, %130 : vector<256x2xf32>
    %c240_i32_46 = arith.constant 240 : i32
    %132 = tpu.dynamic_rotate %131 by %c240_i32_46 dim 0 : vector<256x2xf32>, i32 -> vector<256x2xf32>
    %133 = arith.addf %132, %51 : vector<256x2xf32>
    %134 = arith.maximumf %131, %133 : vector<256x2xf32>
    %c16_i32_47 = arith.constant 16 : i32
    %135 = tpu.dynamic_rotate %131 by %c16_i32_47 dim 0 : vector<256x2xf32>, i32 -> vector<256x2xf32>
    %136 = arith.addf %135, %58 : vector<256x2xf32>
    %137 = arith.maximumf %134, %136 : vector<256x2xf32>
    %c224_i32_48 = arith.constant 224 : i32
    %138 = tpu.dynamic_rotate %131 by %c224_i32_48 dim 0 : vector<256x2xf32>, i32 -> vector<256x2xf32>
    %139 = arith.addf %138, %79 : vector<256x2xf32>
    %140 = arith.maximumf %137, %139 : vector<256x2xf32>
    %c32_i32_49 = arith.constant 32 : i32
    %141 = tpu.dynamic_rotate %131 by %c32_i32_49 dim 0 : vector<256x2xf32>, i32 -> vector<256x2xf32>
    %142 = arith.addf %141, %86 : vector<256x2xf32>
    %143 = arith.maximumf %140, %142 : vector<256x2xf32>
    %144 = arith.truncf %143 : vector<256x2xf32> to vector<256x2xbf16>
    %c2 = arith.constant 2 : index
    %c0_50 = arith.constant 0 : index
    %c0_51 = arith.constant 0 : index
    %145 = vector.load %arg4[%c2, %c0_50, %c0_51] : memref<4x2x8xbf16, #tpu.memory_space<vmem>>, vector<1x2x8xbf16>
    %146 = vector.shape_cast %145 : vector<1x2x8xbf16> to vector<2x8xbf16>
    %cst_52 = arith.constant dense<0.000000e+00> : vector<256x8xf32>
    %147 = tpu.matmul %144, %146, %cst_52 {dimension_numbers = #tpu.dot_dimension_numbers<[1], [0], [0], [1], [0, 0, 1, 1], [], []>} : vector<256x2xbf16>, vector<2x8xbf16>, vector<256x8xf32> -> vector<256x8xf32>
    %148 = arith.addf %119, %147 : vector<256x8xf32>
    %c255_i32_53 = arith.constant 255 : i32
    %149 = tpu.dynamic_rotate %143 by %c255_i32_53 dim 0 : vector<256x2xf32>, i32 -> vector<256x2xf32>
    %150 = arith.addf %149, %37 : vector<256x2xf32>
    %151 = arith.maximumf %143, %150 : vector<256x2xf32>
    %c1_i32_54 = arith.constant 1 : i32
    %152 = tpu.dynamic_rotate %143 by %c1_i32_54 dim 0 : vector<256x2xf32>, i32 -> vector<256x2xf32>
    %153 = arith.addf %152, %44 : vector<256x2xf32>
    %154 = arith.maximumf %151, %153 : vector<256x2xf32>
    %c254_i32_55 = arith.constant 254 : i32
    %155 = tpu.dynamic_rotate %143 by %c254_i32_55 dim 0 : vector<256x2xf32>, i32 -> vector<256x2xf32>
    %156 = arith.addf %155, %65 : vector<256x2xf32>
    %157 = arith.maximumf %154, %156 : vector<256x2xf32>
    %c2_i32_56 = arith.constant 2 : i32
    %158 = tpu.dynamic_rotate %143 by %c2_i32_56 dim 0 : vector<256x2xf32>, i32 -> vector<256x2xf32>
    %159 = arith.addf %158, %72 : vector<256x2xf32>
    %160 = arith.maximumf %157, %159 : vector<256x2xf32>
    %c240_i32_57 = arith.constant 240 : i32
    %161 = tpu.dynamic_rotate %160 by %c240_i32_57 dim 0 : vector<256x2xf32>, i32 -> vector<256x2xf32>
    %162 = arith.addf %161, %51 : vector<256x2xf32>
    %163 = arith.maximumf %160, %162 : vector<256x2xf32>
    %c16_i32_58 = arith.constant 16 : i32
    %164 = tpu.dynamic_rotate %160 by %c16_i32_58 dim 0 : vector<256x2xf32>, i32 -> vector<256x2xf32>
    %165 = arith.addf %164, %58 : vector<256x2xf32>
    %166 = arith.maximumf %163, %165 : vector<256x2xf32>
    %c224_i32_59 = arith.constant 224 : i32
    %167 = tpu.dynamic_rotate %160 by %c224_i32_59 dim 0 : vector<256x2xf32>, i32 -> vector<256x2xf32>
    %168 = arith.addf %167, %79 : vector<256x2xf32>
    %169 = arith.maximumf %166, %168 : vector<256x2xf32>
    %c32_i32_60 = arith.constant 32 : i32
    %170 = tpu.dynamic_rotate %160 by %c32_i32_60 dim 0 : vector<256x2xf32>, i32 -> vector<256x2xf32>
    %171 = arith.addf %170, %86 : vector<256x2xf32>
    %172 = arith.maximumf %169, %171 : vector<256x2xf32>
    %173 = arith.truncf %172 : vector<256x2xf32> to vector<256x2xbf16>
    %c3 = arith.constant 3 : index
    %c0_61 = arith.constant 0 : index
    %c0_62 = arith.constant 0 : index
    %174 = vector.load %arg4[%c3, %c0_61, %c0_62] : memref<4x2x8xbf16, #tpu.memory_space<vmem>>, vector<1x2x8xbf16>
    %175 = vector.shape_cast %174 : vector<1x2x8xbf16> to vector<2x8xbf16>
    %cst_63 = arith.constant dense<0.000000e+00> : vector<256x8xf32>
    %176 = tpu.matmul %173, %175, %cst_63 {dimension_numbers = #tpu.dot_dimension_numbers<[1], [0], [0], [1], [0, 0, 1, 1], [], []>} : vector<256x2xbf16>, vector<2x8xbf16>, vector<256x8xf32> -> vector<256x8xf32>
    %177 = arith.addf %148, %176 : vector<256x8xf32>
    %c0_64 = arith.constant 0 : index
    %c0_65 = arith.constant 0 : index
    %178 = vector.load %arg5[%c0_64, %c0_65] : memref<1x8xf32, #tpu.memory_space<vmem>>, vector<1x8xf32>
    %179 = vector.broadcast %178 : vector<1x8xf32> to vector<256x8xf32>
    %180 = arith.addf %177, %179 : vector<256x8xf32>
    %cst_66 = arith.constant 0.000000e+00 : f32
    %181 = vector.broadcast %cst_66 : f32 to vector<256x8xf32>
    %182 = arith.subf %181, %180 : vector<256x8xf32>
    %183 = math.exp %182 : vector<256x8xf32>
    %cst_67 = arith.constant 1.000000e+00 : f32
    %184 = vector.broadcast %cst_67 : f32 to vector<256x8xf32>
    %185 = arith.addf %184, %183 : vector<256x8xf32>
    %186 = tpu.reciprocal %185 : vector<256x8xf32> -> vector<256x8xf32>
    %187 = arith.mulf %180, %186 : vector<256x8xf32>
    %c0_68 = arith.constant 0 : index
    %c0_69 = arith.constant 0 : index
    %c0_70 = arith.constant 0 : index
    %188 = vector.load %arg6[%c0_68, %c0_69, %c0_70] : memref<1x256x8xf32, #tpu.memory_space<vmem>>, vector<1x256x8xf32>
    %189 = vector.shape_cast %188 : vector<1x256x8xf32> to vector<256x8xf32>
    %190 = vector.shape_cast %187 : vector<256x8xf32> to vector<1x256x8xf32>
    tpu.vector_store %arg6[%c0_68, %c0_69, %c0_70], %190 {strides = array<i32>} : memref<1x256x8xf32, #tpu.memory_space<vmem>>, vector<1x256x8xf32>,
    return
  }
  func.func @transform_0(%arg0: i32) -> (i32, i32, i32) {
    %c0_i32 = arith.constant 0 : i32
    %c0_i32_0 = arith.constant 0 : i32
    %c0_i32_1 = arith.constant 0 : i32
    return %arg0, %c0_i32, %c0_i32_0 : i32, i32, i32
  }
  func.func @transform_1(%arg0: i32) -> (i32, i32) {
    %c0_i32 = arith.constant 0 : i32
    %c0_i32_0 = arith.constant 0 : i32
    %c0_i32_1 = arith.constant 0 : i32
    return %c0_i32, %c0_i32_0 : i32, i32
  }
  func.func @transform_2(%arg0: i32) -> (i32, i32) {
    %c0_i32 = arith.constant 0 : i32
    %c0_i32_0 = arith.constant 0 : i32
    %c0_i32_1 = arith.constant 0 : i32
    return %c0_i32, %c0_i32_0 : i32, i32
  }
  func.func @transform_3(%arg0: i32) -> (i32, i32, i32) {
    %c0_i32 = arith.constant 0 : i32
    %c0_i32_0 = arith.constant 0 : i32
    %c0_i32_1 = arith.constant 0 : i32
    %c0_i32_2 = arith.constant 0 : i32
    return %c0_i32, %c0_i32_0, %c0_i32_1 : i32, i32, i32
  }
  func.func @transform_4(%arg0: i32) -> (i32, i32) {
    %c0_i32 = arith.constant 0 : i32
    %c0_i32_0 = arith.constant 0 : i32
    %c0_i32_1 = arith.constant 0 : i32
    return %c0_i32, %c0_i32_0 : i32, i32
  }
  func.func @transform_5(%arg0: i32) -> (i32, i32, i32) {
    %c0_i32 = arith.constant 0 : i32
    %c0_i32_0 = arith.constant 0 : i32
    %c0_i32_1 = arith.constant 0 : i32
    return %arg0, %c0_i32, %c0_i32_0 : i32, i32, i32
  }
}

</mosaic_0001>

<bundles_post_ra>
// kernel: tpu_custom_call.1
= control target key start
LH: loop header
LB: loop body
LE: loop exit
PB: predicated region body
PF: predicated region fallthrough
CT: control target
= control target key end

     0   :  { %s5991_s18 = smov 0   ;;  %s10282_s0 = inlined_call_operand.vmem [shape: bf16[2,256,4], index: 0, kind: input, shape index: {}]   ;;  %s10283_s1 = inlined_call_operand.vmem [shape: bf16[4,2], index: 1, kind: input, shape index: {}]   ;;  %s10284_s2 = inlined_call_operand.vmem [shape: f32[1,2], index: 2, kind: input, shape index: {}]   ;;  %s10285_s3 = inlined_call_operand.vmem [shape: bf16[4,2,8], index: 3, kind: input, shape index: {}]   ;;  %s10286_s4 = inlined_call_operand.vmem [shape: f32[1,8], index: 4, kind: input, shape index: {}]   ;;  %s10287_s5 = inlined_call_operand.vmem [shape: f32[2,256,8], index: 5, kind: output, shape index: {}]  }
   0x1 LB: > { %s5293_s19 = sadd.s32 4294967295, %s5958_s18   ;;  %p5297_p0 = scmp.ge.s32.totalorder %s5958_s18, 1  ;;  %s5958_s18 = sphi %s5991_s18, %s15_s18  }
   0x2   : > { %p187_p1 = scmp.lt.s32.totalorder %s5958_s18, 3 }
   0x4   : > { %p188_p2 = pnand %p5297_p0, %p187_p1 }
   0x6   : > { %191 = sbr.rel (%p188_p2) target bundleno = 1050 (0x41a), region = 40 }
   0xb   : > { %v258_v0 = vld [vmem:[%s10283_s1] sm:$0x3]  ;;  %vm395_vm0 = vcmask 1041408   ;;  %p215_p3 = scmp.lt.s32.totalorder %s5293_s19, 1  ;;  %vm346_vm1 = vcmask 31744   ;;  %v752_v18 = vlaneseq  ;;  %v10288_v34 = vmov -inf  }
   0xc   : > { %5664 = vmatprep.subr.msk.bf16.mxu0 %vm395_vm0, %v258_v0  ;;  %5665 = vmatprep.subr.msk.bf16.mxu1 %vm395_vm0, %v258_v0  ;;  %v397_v1 = vsel %vm395_vm0, %v258_v0, 0 }
   0xd   : > { %5493 = vmatpush3.bf16.msra.mxu0 %v397_v1  ;;  %5663 = vmatpush3.bf16.msra.mxu1 %v397_v1  ;;  %s11333_s19 = smov (!%p215_p3, %s5293_s19), 1  ;;  %v6042_v19 = vshrl.u32 %v752_v18, 7  ;;  %v6109_v1 = vld [vmem:[%s10284_s2] ss:$0 sm:$0xff] }
   0xe   : > { %s5405_s22 = sshll.u32 %s11333_s19, 7  ;;  %10600 = vst [vmem:[#allocation17_spill] sm:$0xff] %v6109_v1  ;;  %s5406_s15 = sshll.u32 %s11333_s19, 8 }
   0xf   : > { %s6008_s25 = scalar_lea.vmem %s10282_s0, %s5405_s22  ;;  %v754_v20 = vadd.s32 8, %v6042_v19  ;;  %v755_v21 = vadd.s32 16, %v6042_v19  ;;  %v770_v22 = vadd.s32 136, %v6042_v19  ;;  %v771_v23 = vadd.s32 144, %v6042_v19  ;;  %s9984_s20 = scalar_lea.vmem %s10287_s5, %s5406_s15 }
  0x10   : > { %v5679_v2 = vld [vmem:[%s6008_s25] sm:$0xff]   ;;  %v5681_v4 = vld [vmem:[%s6008_s25 + $0x8] sm:$0xff]   ;;  %v5683_v6 = vld [vmem:[%s6008_s25 + $0x10] sm:$0xff]   ;;  %v756_v26 = vadd.s32 24, %v6042_v19  ;;  %v757_v27 = vadd.s32 32, %v6042_v19  ;;  %v772_v30 = vadd.s32 152, %v6042_v19 }
  0x11   : > { %v5680_v3 = vld [vmem:[%s6008_s25 + $0x40] sm:$0xff]   ;;  %5494 = vmatprep.mubr.msk.bf16.mxu0 %vm346_vm1, %v5679_v2  ;;  %v5682_v5 = vld [vmem:[%s6008_s25 + $0x48] sm:$0xff]   ;;  %v5684_v7 = vld [vmem:[%s6008_s25 + $0x50] sm:$0xff]   ;;  %v796_v24 = vand.u32 15, %v754_v20  ;;  %v803_v25 = vand.u32 15, %v755_v21  ;;  %v908_v28 = vand.u32 15, %v770_v22 }
  0x12   : > { %5510 = vmatprep.mubr.msk.bf16.mxu1 %vm346_vm1, %v5680_v3  ;;  %5495 = vmatmul.mubr.msk.bf16.vlgmr.msra.gmra.mxu0 %vm346_vm1, %v5681_v4  ;;  %v5685_v8 = vld [vmem:[%s6008_s25 + $0x18] sm:$0xff]   ;;  %v5687_v10 = vld [vmem:[%s6008_s25 + $0x20] sm:$0xff]   ;;  %v5689_v12 = vld [vmem:[%s6008_s25 + $0x28] sm:$0xff]   ;;  %v915_v29 = vand.u32 15, %v771_v23  ;;  %v773_v31 = vadd.s32 160, %v6042_v19  ;;  %v810_v32 = vand.u32 15, %v756_v26 }
  0x13   : > { %5511 = vmatmul.mubr.msk.bf16.vlgmr.msra.gmra.mxu1 %vm346_vm1, %v5682_v5  ;;  %5498 = vmatprep.mubr.msk.bf16.mxu0 %vm346_vm1, %v5683_v6  ;;  %v5686_v9 = vld [vmem:[%s6008_s25 + $0x58] sm:$0xff]   ;;  %v5688_v11 = vld [vmem:[%s6008_s25 + $0x60] sm:$0xff]   ;;  %v5690_v13 = vld [vmem:[%s6008_s25 + $0x68] sm:$0xff]   ;;  %vm1170_vm2 = vcmp.lt.s32.totalorder %v796_v24, 15  ;;  %vm1235_vm3 = vcmp.ge.s32.totalorder %v803_v25, 1  ;;  %vm1426_vm4 = vcmp.lt.s32.totalorder %v796_v24, 14 }
  0x14   : > { %5514 = vmatprep.mubr.msk.bf16.mxu1 %vm346_vm1, %v5684_v7  ;;  %v5691_v14 = vld [vmem:[%s6008_s25 + $0x30] sm:$0xff]   ;;  %v5693_v16 = vld [vmem:[%s6008_s25 + $0x38] sm:$0xff]   ;;  %vm1491_vm5 = vcmp.ge.s32.totalorder %v803_v25, 2  ;;  %v817_v33 = vand.u32 15, %v757_v27  ;;  %v6053_v35 = vsel %vm1170_vm2, 0.0, %v10288_v34  ;;  %v6056_v36 = vsel %vm1235_vm3, 0.0, %v10288_v34 }
  0x15   : > { %v5692_v15 = vld [vmem:[%s6008_s25 + $0x70] sm:$0xff]   ;;  %v5694_v17 = vld [vmem:[%s6008_s25 + $0x78] sm:$0xff]   ;;  %10585 = vst [vmem:[#allocation2_spill] sm:$0xff] %v6053_v35  ;;  %10586 = vst [vmem:[#allocation3_spill] sm:$0xff] %v6056_v36  ;;  %vm1186_vm6 = vcmp.lt.s32.totalorder %v908_v28, 15  ;;  %vm1251_vm7 = vcmp.ge.s32.totalorder %v915_v29, 1 }
  0x16   : > { %vm1442_vm8 = vcmp.lt.s32.totalorder %v908_v28, 14  ;;  %vm1507_vm9 = vcmp.ge.s32.totalorder %v915_v29, 2  ;;  %v758_v37 = vadd.s32 40, %v6042_v19  ;;  %v759_v38 = vadd.s32 48, %v6042_v19 }
  0x17   : > { %v6061_v39 = vsel %vm1426_vm4, 0.0, %v10288_v34  ;;  %v6064_v40 = vsel %vm1491_vm5, 0.0, %v10288_v34  ;;  %v922_v41 = vand.u32 15, %v772_v30  ;;  %v929_v42 = vand.u32 15, %v773_v31 }
  0x18   : > { %10587 = vst [vmem:[#allocation4_spill] sm:$0xff] %v6061_v39  ;;  %10588 = vst [vmem:[#allocation5_spill] sm:$0xff] %v6064_v40  ;;  %vm1172_vm10 = vcmp.lt.s32.totalorder %v810_v32, 15  ;;  %vm1237_vm11 = vcmp.ge.s32.totalorder %v817_v33, 1  ;;  %v774_v43 = vadd.s32 168, %v6042_v19  ;;  %v775_v44 = vadd.s32 176, %v6042_v19 }
  0x19   : > { %v6069_v45 = vsel %vm1186_vm6, 0.0, %v10288_v34  ;;  %v6072_v46 = vsel %vm1251_vm7, 0.0, %v10288_v34  ;;  %v6075_v47 = vsel %vm1442_vm8, 0.0, %v10288_v34  ;;  %v6078_v48 = vsel %vm1507_vm9, 0.0, %v10288_v34 }
  0x1a   : > { %5499 = vmatmul.mubr.msk.bf16.gmra.mxu0 %vm346_vm1, %v5685_v8  ;;  %10589 = vst [vmem:[#allocation6_spill] sm:$0xff] %v6069_v45  ;;  %10590 = vst [vmem:[#allocation7_spill] sm:$0xff] %v6072_v46  ;;  %vm1428_vm12 = vcmp.lt.s32.totalorder %v810_v32, 14  ;;  %vm1493_vm13 = vcmp.ge.s32.totalorder %v817_v33, 2  ;;  %v824_v49 = vand.u32 15, %v758_v37  ;;  %v831_v50 = vand.u32 15, %v759_v38 }
  0x1b   : > { %5515 = vmatmul.mubr.msk.bf16.gmra.mxu1 %vm346_vm1, %v5686_v9  ;;  %5502 = vmatprep.mubr.msk.bf16.mxu0 %vm346_vm1, %v5687_v10  ;;  %10591 = vst [vmem:[#allocation8_spill] sm:$0xff] %v6075_v47  ;;  %10592 = vst [vmem:[#allocation9_spill] sm:$0xff] %v6078_v48  ;;  %v6081_v51 = vsel %vm1172_vm10, 0.0, %v10288_v34  ;;  %v6084_v52 = vsel %vm1237_vm11, 0.0, %v10288_v34  ;;  %vm1188_vm14 = vcmp.lt.s32.totalorder %v922_v41, 15  ;;  %vm1253_vm15 = vcmp.ge.s32.totalorder %v929_v42, 1 }
  0x1c   : > { %5518 = vmatprep.mubr.msk.bf16.mxu1 %vm346_vm1, %v5688_v11  ;;  %10593 = vst [vmem:[#allocation10_spill] sm:$0xff] %v6081_v51  ;;  %10594 = vst [vmem:[#allocation11_spill] sm:$0xff] %v6084_v52  ;;  %v936_v53 = vand.u32 15, %v774_v43  ;;  %v943_v54 = vand.u32 15, %v775_v44  ;;  %v760_v55 = vadd.s32 56, %v6042_v19  ;;  %v761_v56 = vadd.s32 64, %v6042_v19 }
  0x1d   : > { %v6089_v57 = vsel %vm1428_vm12, 0.0, %v10288_v34  ;;  %v6092_v58 = vsel %vm1493_vm13, 0.0, %v10288_v34  ;;  %vm1444_vm0 = vcmp.lt.s32.totalorder %v922_v41, 14  ;;  %vm1174_vm2 = vcmp.lt.s32.totalorder %v824_v49, 15 }
  0x1e   : > { %10595 = vst [vmem:[#allocation12_spill] sm:$0xff] %v6089_v57  ;;  %10596 = vst [vmem:[#allocation13_spill] sm:$0xff] %v6092_v58  ;;  %vm1239_vm3 = vcmp.ge.s32.totalorder %v831_v50, 1  ;;  %vm1430_vm4 = vcmp.lt.s32.totalorder %v824_v49, 14  ;;  %v838_v59 = vand.u32 15, %v760_v55  ;;  %v6095_v60 = vsel %vm1188_vm14, 0.0, %v10288_v34 }
  0x1f   : > { %10597 = vst [vmem:[#allocation14_spill] sm:$0xff] %v6095_v60  ;;  %v6098_v61 = vsel %vm1253_vm15, 0.0, %v10288_v34  ;;  %v845_v62 = vand.u32 15, %v761_v56  ;;  %v6101_v63 = vadd.s32 184, %v6042_v19  ;;  %v6104_v0 = vsel %vm1444_vm0, 0.0, %v10288_v34 }
  0x20   : > { %10598 = vst [vmem:[#allocation15_spill] sm:$0xff] %v6098_v61  ;;  %10599 = vst [vmem:[#allocation16_spill] sm:$0xff] %v6104_v0  ;;  %vm1495_vm5 = vcmp.ge.s32.totalorder %v831_v50, 2  ;;  %vm1190_vm6 = vcmp.lt.s32.totalorder %v936_v53, 15  ;;  %vm1255_vm7 = vcmp.ge.s32.totalorder %v943_v54, 1  ;;  %v6115_v3 = vsel %vm1174_vm2, 0.0, %v10288_v34 }
  0x21   : > { %10602 = vst [vmem:[#allocation19_spill] sm:$0xff] %v6115_v3  ;;  %v6118_v4 = vsel %vm1239_vm3, 0.0, %v10288_v34  ;;  %v6121_v5 = vsel %vm1430_vm4, 0.0, %v10288_v34  ;;  %vm6123_vm8 = vcmp.lt.s32.totalorder %v936_v53, 14  ;;  %vm6127_vm9 = vcmp.ge.s32.totalorder %v943_v54, 2 }
  0x22   : > { %5503 = vmatmul.mubr.msk.bf16.gmra.mxu0 %vm346_vm1, %v5689_v12  ;;  %10603 = vst [vmem:[#allocation20_spill] sm:$0xff] %v6118_v4  ;;  %10604 = vst [vmem:[#allocation21_spill] sm:$0xff] %v6121_v5  ;;  %vm6131_vm10 = vcmp.lt.s32.totalorder %v838_v59, 15  ;;  %v950_v9 = vand.u32 15, %v6101_v63  ;;  %v6137_v11 = vsel %vm1495_vm5, 0.0, %v10288_v34  ;;  %v6140_v12 = vsel %vm1190_vm6, 0.0, %v10288_v34 }
  0x23   : > { %5519 = vmatmul.mubr.msk.bf16.gmra.mxu1 %vm346_vm1, %v5690_v13  ;;  %5506 = vmatprep.mubr.msk.bf16.mxu0 %vm346_vm1, %v5691_v14  ;;  %10611 = vst [vmem:[#allocation22_spill] sm:$0xff] %v6137_v11  ;;  %10612 = vst [vmem:[#allocation23_spill] sm:$0xff] %v6140_v12  ;;  %v6143_v13 = vsel %vm1255_vm7, 0.0, %v10288_v34  ;;  %vm1241_vm11 = vcmp.ge.s32.totalorder %v845_v62, 1  ;;  %vm6148_vm12 = vcmp.lt.s32.totalorder %v838_v59, 14  ;;  %vm6152_vm13 = vcmp.ge.s32.totalorder %v845_v62, 2 }
  0x24   : > { %5522 = vmatprep.mubr.msk.bf16.mxu1 %vm346_vm1, %v5692_v15  ;;  %10613 = vst [vmem:[#allocation24_spill] sm:$0xff] %v6143_v13  ;;  %v777_v18 = vadd.s32 192, %v6042_v19  ;;  %v6163_v22 = vsel %vm6123_vm8, 0.0, %v10288_v34  ;;  %v6168_v23 = vsel %vm6127_vm9, 0.0, %v10288_v34  ;;  %v6173_v24 = vsel %vm6131_vm10, 0.0, %v10288_v34 }
  0x25   : > { %10618 = vst [vmem:[#allocation25_spill] sm:$0xff] %v6163_v22  ;;  %10619 = vst [vmem:[#allocation26_spill] sm:$0xff] %v6168_v23  ;;  %v6180_v28 = vsel %vm1241_vm11, 0.0, %v10288_v34  ;;  %vm1192_vm14 = vcmp.lt.s32.totalorder %v950_v9, 15  ;;  %v6189_v32 = vsel %vm6148_vm12, 0.0, %v10288_v34  ;;  %v6194_v33 = vsel %vm6152_vm13, 0.0, %v10288_v34 }
  0x26   : > { %10620 = vst [vmem:[#allocation27_spill] sm:$0xff] %v6173_v24  ;;  %10621 = vst [vmem:[#allocation28_spill] sm:$0xff] %v6180_v28  ;;  %v957_v43 = vand.u32 15, %v777_v18  ;;  %v6205_v54 = vsel %vm1192_vm14, 0.0, %v10288_v34  ;;  %vm6227_vm0 = vcmp.lt.s32.totalorder %v950_v9, 14  ;;  %vm1730_vm6 = vcmp.lt.s32.totalorder %v6042_v19, 7 }
  0x27   : > { %10622 = vst [vmem:[#allocation29_spill] sm:$0xff] %v6189_v32  ;;  %10623 = vst [vmem:[#allocation30_spill] sm:$0xff] %v6194_v33  ;;  %vm1859_vm7 = vcmp.lt.s32.totalorder %v6042_v19, 1  ;;  %vm1988_vm8 = vcmp.lt.s32.totalorder %v6042_v19, 6  ;;  %vm2117_vm9 = vcmp.lt.s32.totalorder %v6042_v19, 2 }
  0x28   : > { %10624 = vst [vmem:[#allocation31_spill] sm:$0xff] %v6205_v54  ;;  %vm6219_vm15 = vcmp.ge.s32.totalorder %v957_v43, 1 }
  0x2a   : > { %5507 = vmatmul.mubr.msk.bf16.gmra.mxu0 %vm346_vm1, %v5693_v16 }
  0x2b   : > { %5523 = vmatmul.mubr.msk.bf16.gmra.mxu1 %vm346_vm1, %v5694_v17  ;;  %vm1509_vm1 = vcmp.ge.s32.totalorder %v929_v42, 2 }
  0x2c   : > { %v6112_v2 = vsel %vm1509_vm1, 0.0, %v10288_v34  ;;  %vm6231_vm1 = vcmp.ge.s32.totalorder %v957_v43, 2 }
  0x2d   : > { %10601 = vst [vmem:[#allocation18_spill] sm:$0xff] %v6112_v2 }
  0xd2   : > { %v5496_v10 = vpop.f32.mrf.mxu0 }
  0xd3   : > { %v6146_v14 = vadd.f32 %v5496_v10, %v6109_v1  ;;  %v5512_v15 = vpop.f32.mrf.mxu1 }
  0xd4   : > { %v6158_v20 = vadd.f32 %v5512_v15, %v6109_v1  ;;  %v433_v21 = vpop.f32.mrf.mxu0 }
  0xd5   : > { %v562_v25 = vsub.f32 0.0, %v6146_v14  ;;  %v6177_v26 = vadd.f32 %v6109_v1, %v433_v21  ;;  %v497_v27 = vpop.f32.mrf.mxu1 }
  0xd6   : > { %v578_v29 = vsub.f32 0.0, %v6158_v20  ;;  %v6184_v30 = vadd.f32 %v6109_v1, %v497_v27  ;;  %v5497_v31 = vpop.f32.mrf.mxu0 }
  0xd7   : > { %v596_v37 = vmul.f32 1.442695, %v562_v25  ;;  %v560_v38 = vsub.f32 0.0, %v6177_v26  ;;  %v6198_v41 = vadd.f32 %v5497_v31, %v6109_v1  ;;  %v5513_v42 = vpop.f32.mrf.mxu1 }
  0xd8   : > { %v628_v44 = vmul.f32 1.442695, %v578_v29  ;;  %v576_v49 = vsub.f32 0.0, %v6184_v30  ;;  %v6202_v50 = vadd.f32 %v5513_v42, %v6109_v1  ;;  %v436_v53 = vpop.f32.mrf.mxu0 }
  0xd9   : > { %5695 = vpow2.f32 %v596_v37  ;;  %v592_v55 = vmul.f32 1.442695, %v560_v38  ;;  %v563_v56 = vsub.f32 0.0, %v6198_v41  ;;  %v6209_v59 = vadd.f32 %v6109_v1, %v436_v53  ;;  %v500_v62 = vpop.f32.mrf.mxu1 }
  0xda   : > { %5697 = vpow2.f32 %v628_v44  ;;  %v624_v63 = vmul.f32 1.442695, %v576_v49  ;;  %v579_v6 = vsub.f32 0.0, %v6202_v50  ;;  %v6213_v7 = vadd.f32 %v6109_v1, %v500_v62  ;;  %v5500_v8 = vpop.f32.mrf.mxu0 }
  0xdb   : > { %5699 = vpow2.f32 %v592_v55  ;;  %v598_v10 = vmul.f32 1.442695, %v563_v56  ;;  %v561_v15 = vsub.f32 0.0, %v6209_v59  ;;  %v6217_v16 = vadd.f32 %v5500_v8, %v6109_v1  ;;  %v5516_v17 = vpop.f32.mrf.mxu1 }
  0xdc   : > { %5701 = vpow2.f32 %v624_v63  ;;  %v630_v21 = vmul.f32 1.442695, %v579_v6  ;;  %v577_v25 = vsub.f32 0.0, %v6213_v7  ;;  %v6225_v27 = vadd.f32 %v5516_v17, %v6109_v1  ;;  %v449_v29 = vpop.f32.mrf.mxu0 }
  0xdd   : > { %5703 = vpow2.f32 %v598_v10  ;;  %v594_v38 = vmul.f32 1.442695, %v561_v15  ;;  %v566_v42 = vsub.f32 0.0, %v6217_v16  ;;  %v6237_v44 = vadd.f32 %v6109_v1, %v449_v29  ;;  %v513_v49 = vpop.f32.mrf.mxu1 }
  0xde   : > { %5705 = vpow2.f32 %v630_v21  ;;  %v626_v53 = vmul.f32 1.442695, %v577_v25  ;;  %v582_v55 = vsub.f32 0.0, %v6225_v27  ;;  %v6241_v9 = vadd.f32 %v6109_v1, %v513_v49  ;;  %v5501_v56 = vpop.f32.mrf.mxu0 }
  0xdf   : > { %5707 = vpow2.f32 %v594_v38  ;;  %v604_v43 = vmul.f32 1.442695, %v566_v42  ;;  %v564_v62 = vsub.f32 0.0, %v6237_v44  ;;  %v6245_v63 = vadd.f32 %v5501_v56, %v6109_v1  ;;  %v5517_v6 = vpop.f32.mrf.mxu1 }
  0xe0   : > { %5709 = vpow2.f32 %v626_v53  ;;  %v636_v8 = vmul.f32 1.442695, %v582_v55  ;;  %v580_v10 = vsub.f32 0.0, %v6241_v9  ;;  %v6249_v15 = vadd.f32 %v5517_v6, %v6109_v1  ;;  %v452_v17 = vpop.f32.mrf.mxu0 }
  0xe1   : > { %5711 = vpow2.f32 %v604_v43  ;;  %v600_v21 = vmul.f32 1.442695, %v564_v62  ;;  %v567_v25 = vsub.f32 0.0, %v6245_v63  ;;  %v6253_v29 = vadd.f32 %v6109_v1, %v452_v17  ;;  %v516_v38 = vpop.f32.mrf.mxu1 }
  0xe2   : > { %5713 = vpow2.f32 %v636_v8  ;;  %v632_v42 = vmul.f32 1.442695, %v580_v10  ;;  %v583_v49 = vsub.f32 0.0, %v6249_v15  ;;  %v6257_v53 = vadd.f32 %v6109_v1, %v516_v38  ;;  %v5504_v55 = vpop.f32.mrf.mxu0 }
  0xe3   : > { %5715 = vpow2.f32 %v600_v21  ;;  %v606_v56 = vmul.f32 1.442695, %v567_v25  ;;  %v565_v6 = vsub.f32 0.0, %v6253_v29  ;;  %v6261_v43 = vadd.f32 %v5504_v55, %v6109_v1  ;;  %v5520_v62 = vpop.f32.mrf.mxu1 }
  0xe4   : > { %5717 = vpow2.f32 %v632_v42  ;;  %v638_v17 = vmul.f32 1.442695, %v583_v49  ;;  %v581_v34 = vsub.f32 0.0, %v6257_v53  ;;  %v6265_v8 = vadd.f32 %v5520_v62, %v6109_v1  ;;  %v465_v10 = vpop.f32.mrf.mxu0 }
  0xe5   : > { %10631 = vst [vmem:[#allocation32_spill] sm:$0xff] %v6261_v43  ;;  %5719 = vpow2.f32 %v606_v56  ;;  %v602_v38 = vmul.f32 1.442695, %v565_v6  ;;  %v570_v54 = vsub.f32 0.0, %v6261_v43  ;;  %v6269_v21 = vadd.f32 %v6109_v1, %v465_v10  ;;  %v529_v25 = vpop.f32.mrf.mxu1 }
  0xe6   : > { %10632 = vst [vmem:[#allocation33_spill] sm:$0xff] %v6265_v8  ;;  %v5696_v33 = vpop.eup %5695  ;;  %5721 = vpow2.f32 %v638_v17  ;;  %v634_v55 = vmul.f32 1.442695, %v581_v34  ;;  %v6272_v42 = vadd.f32 %v6109_v1, %v529_v25  ;;  %v10635_v49 = vmov -inf   ;;  %v5505_v32 = vpop.f32.mrf.mxu0 }
  0xe7   : > { %10633 = vst [vmem:[#allocation34_spill] sm:$0xff] %v6269_v21  ;;  %v6277_v62 = vsel %vm6219_vm15, 0.0, %v10635_v49  ;;  %v5698_v56 = vpop.eup %5697  ;;  %v658_v6 = vadd.f32 1.0, %v5696_v33  ;;  %5723 = vpow2.f32 %v602_v38  ;;  %v6282_v10 = vsel %vm6227_vm0, 0.0, %v10635_v49  ;;  %v5521_v17 = vpop.f32.mrf.mxu1 }
  0xe8   : > { %10634 = vst [vmem:[#allocation35_spill] sm:$0xff] %v6272_v42  ;;  %10636 = vst [vmem:[#allocation36_spill] sm:$0xff] %v6277_v62  ;;  %v6287_v34 = vsel %vm6231_vm1, 0.0, %v10635_v49  ;;  %v5700_v25 = vpop.eup %5699  ;;  %v674_v28 = vadd.f32 1.0, %v5698_v56  ;;  %5725 = vpow2.f32 %v634_v55  ;;  %v6289_v18 = vmul.f32 1.442695, %v570_v54  ;;  %v468_v33 = vpop.f32.mrf.mxu0 }
  0xe9   : > { %10637 = vst [vmem:[#allocation37_spill] sm:$0xff] %v6282_v10  ;;  %10638 = vst [vmem:[#allocation38_spill] sm:$0xff] %v6287_v34  ;;  %v586_v62 = vsub.f32 0.0, %v6265_v8  ;;  %v5702_v38 = vpop.eup %5701  ;;  %5727 = vrcp.f32 %v658_v6  ;;  %v656_v24 = vadd.f32 1.0, %v5700_v25  ;;  %v568_v31 = vsub.f32 0.0, %v6269_v21 }
  0xea   : > { %v6294_v10 = vadd.f32 %v5505_v32, %v6109_v1  ;;  %v5704_v37 = vpop.eup %5703  ;;  %5729 = vrcp.f32 %v674_v28  ;;  %v672_v34 = vadd.f32 1.0, %v5702_v38  ;;  %v584_v43 = vsub.f32 0.0, %v6272_v42 }
  0xeb   : > { %v6298_v55 = vadd.f32 %v5521_v17, %v6109_v1  ;;  %v5706_v54 = vpop.eup %5705  ;;  %5731 = vrcp.f32 %v656_v24  ;;  %v659_v56 = vadd.f32 1.0, %v5704_v37  ;;  %v6302_v6 = vadd.f32 %v6109_v1, %v468_v33  ;;  %v532_v37 = vpop.f32.mrf.mxu1 }
  0xec   : > { %10639 = vst [vmem:[#allocation39_spill] sm:$0xff] %v6294_v10  ;;  %v571_v8 = vsub.f32 0.0, %v6294_v10  ;;  %v5708_v25 = vpop.eup %5707  ;;  %5733 = vrcp.f32 %v672_v34  ;;  %v675_v32 = vadd.f32 1.0, %v5706_v54  ;;  %v6304_v21 = vmul.f32 1.442695, %v586_v62 }
  0xed   : > { %10640 = vst [vmem:[#allocation40_spill] sm:$0xff] %v6298_v55  ;;  %10641 = vst [vmem:[#allocation41_spill] sm:$0xff] %v6302_v6  ;;  %v762_v28 = vadd.s32 72, %v6042_v19  ;;  %v5710_v38 = vpop.eup %5709  ;;  %5735 = vrcp.f32 %v659_v56  ;;  %v657_v42 = vadd.f32 1.0, %v5708_v25  ;;  %v6307_v17 = vmul.f32 1.442695, %v568_v31 }
  0xee   : > { %v587_v24 = vsub.f32 0.0, %v6298_v55  ;;  %v5712_v23 = vpop.eup %5711  ;;  %5737 = vrcp.f32 %v675_v32  ;;  %v673_v10 = vadd.f32 1.0, %v5710_v38  ;;  %v569_v33 = vsub.f32 0.0, %v6302_v6 }
  0xef   : > { %10642 = vst [vmem:[#allocation42_spill] sm:$0xff] %v6307_v17  ;;  %v763_v34 = vadd.s32 80, %v6042_v19  ;;  %v5714_v54 = vpop.eup %5713  ;;  %v662_v62 = vadd.f32 1.0, %v5712_v23  ;;  %v6312_v22 = vmul.f32 1.442695, %v584_v43  ;;  %v852_v56 = vand.u32 15, %v762_v28 }
  0xf0   : > { %v6314_v13 = vmul.f32 1.442695, %v571_v8  ;;  %v5716_v25 = vpop.eup %5715  ;;  %5739 = vrcp.f32 %v657_v42  ;;  %v678_v31 = vadd.f32 1.0, %v5714_v54  ;;  %v6317_v55 = vadd.f32 %v6109_v1, %v532_v37 }
  0xf1   : > { %10643 = vst [vmem:[#allocation43_spill] sm:$0xff] %v6312_v22  ;;  %v859_v17 = vand.u32 15, %v763_v34  ;;  %v5718_v32 = vpop.eup %5717  ;;  %5741 = vrcp.f32 %v673_v10  ;;  %v660_v38 = vadd.f32 1.0, %v5716_v25  ;;  %v6319_v6 = vmul.f32 1.442695, %v587_v24  ;;  %v5508_v25 = vpop.f32.mrf.mxu0 }
  0xf2   : > { %10644 = vst [vmem:[#allocation44_spill] sm:$0xff] %v6314_v13  ;;  %10645 = vst [vmem:[#allocation45_spill] sm:$0xff] %v6317_v55  ;;  %vm1178_vm2 = vcmp.lt.s32.totalorder %v852_v56, 15  ;;  %v5720_v12 = vpop.eup %5719  ;;  %5743 = vrcp.f32 %v662_v62  ;;  %v676_v23 = vadd.f32 1.0, %v5718_v32  ;;  %v6321_v43 = vmul.f32 1.442695, %v569_v33 }
  0xf3   : > { %10646 = vst [vmem:[#allocation46_spill] sm:$0xff] %v6319_v6  ;;  %vm1243_vm3 = vcmp.ge.s32.totalorder %v859_v17, 1  ;;  %v5722_v8 = vpop.eup %5721  ;;  %5745 = vrcp.f32 %v678_v31  ;;  %v663_v42 = vadd.f32 1.0, %v5720_v12  ;;  %v6324_v28 = vsel %vm1178_vm2, 0.0, %v10635_v49 }
  0xf4   : > { %10647 = vst [vmem:[#allocation47_spill] sm:$0xff] %v6321_v43  ;;  %10648 = vst [vmem:[#allocation48_spill] sm:$0xff] %v6324_v28  ;;  %vm6326_vm4 = vcmp.lt.s32.totalorder %v852_v56, 14  ;;  %v5724_v10 = vpop.eup %5723  ;;  %5747 = vrcp.f32 %v660_v38  ;;  %v679_v24 = vadd.f32 1.0, %v5722_v8  ;;  %vm6330_vm5 = vcmp.ge.s32.totalorder %v859_v17, 2 }
  0xf5   : > { %v585_v33 = vsub.f32 0.0, %v6317_v55  ;;  %v5726_v54 = vpop.eup %5725  ;;  %5749 = vrcp.f32 %v676_v23  ;;  %v661_v62 = vadd.f32 1.0, %v5724_v10  ;;  %v6336_v12 = vsel %vm1243_vm3, 0.0, %v10635_v49  ;;  %v5524_v23 = vpop.f32.mrf.mxu1 }
  0xf6   : > { %10653 = vst [vmem:[#allocation49_spill] sm:$0xff] %v6336_v12  ;;  %v6339_v56 = vadd.s32 200, %v6042_v19  ;;  %v5728_v31 = vpop.eup %5727  ;;  %5751 = vrcp.f32 %v663_v42  ;;  %v677_v17 = vadd.f32 1.0, %v5726_v54  ;;  %v6347_v32 = vsel %vm6326_vm4, 0.0, %v10635_v49 }
  0xf7   : > { %10655 = vst [vmem:[#allocation51_spill] sm:$0xff] %v6347_v32  ;;  %v6350_v38 = vadd.s32 208, %v6042_v19  ;;  %v5730_v8 = vpop.eup %5729  ;;  %v6353_v10 = vmul.f32 %v5728_v31, %v6146_v14  ;;  %5753 = vrcp.f32 %v679_v24  ;;  %v6359_v42 = vsel %vm6330_vm5, 0.0, %v10635_v49 }
  0xf8   : > { %10654 = vst [vmem:[#allocation50_spill] sm:$0xff] %v6339_v56  ;;  %10658 = vst [vmem:[#allocation54_spill] sm:$0xff] %v6359_v42  ;;  %v6361_v54 = vmul.f32 1.442695, %v585_v33  ;;  %v5732_v37 = vpop.eup %5731  ;;  %v6364_v55 = vmul.f32 %v5730_v8, %v6158_v20  ;;  %5755 = vrcp.f32 %v661_v62  ;;  %v6368_v14 = vadd.f32 %v5508_v25, %v6109_v1 }
  0xf9   : > { %10656 = vst [vmem:[#allocation52_spill] sm:$0xff] %v6350_v38  ;;  %10657 = vst [vmem:[#allocation53_spill] sm:$0xff] %v6353_v10  ;;  %v5734_v31 = vpop.eup %5733  ;;  %5757 = vrcp.f32 %v677_v17  ;;  %v6373_v42 = vadd.f32 %v5524_v23, %v6109_v1  ;;  %v6381_v24 = vmul.f32 %v5732_v37, %v6177_v26  ;;  %v10667_v12 = vrot.slane %v6353_v10, 1 }
  0xfa   : > { %10659 = vst [vmem:[#allocation55_spill] sm:$0xff] %v6361_v54  ;;  %10660 = vst [vmem:[#allocation56_spill] sm:$0xff] %v6364_v55  ;;  %v5736_v33 = vpop.eup %5735  ;;  %v6384_v17 = vmul.f32 %v5734_v31, %v6184_v30  ;;  %5759 = vpow2.f32 %v6289_v18  ;;  %v10670_v31 = vrot.slane %v6353_v10, 2  ;;  %v10690_v11 = vrot.slane %v6353_v10, 7 }
  0xfb   : > { %10661 = vst [vmem:[#allocation57_spill] sm:$0xff] %v6368_v14  ;;  %10662 = vst [vmem:[#allocation58_spill] sm:$0xff] %v6373_v42  ;;  %v5738_v25 = vpop.eup %5737  ;;  %v6387_v23 = vmul.f32 %v5736_v33, %v6198_v41  ;;  %5761 = vpow2.f32 %v6304_v21  ;;  %v10668_v21 = vrot.slane %v6353_v10, 7  ;;  %v10678_v42 = vrot.slane %v6364_v55, 2 }
  0xfc   : > { %10663 = vst [vmem:[#allocation59_spill] sm:$0xff] %v6381_v24  ;;  %10664 = vst [vmem:[#allocation60_spill] sm:$0xff] %v6384_v17  ;;  %v6392_v62 = vmul.f32 %v5738_v25, %v6202_v50  ;;  %v10688_v22 = vrot.slane %v6381_v24, 1  ;;  %v10692_v4 = vrot.slane %v6353_v10, 2  ;;  %v10693_v3 = vrot.slane %v6381_v24, 2 }
  0xfd   : > { %10665 = vst [vmem:[#allocation61_spill] sm:$0xff] %v6387_v23  ;;  %v5740_v8 = vpop.eup %5739  ;;  %v10314_v18 = vrot.slane %v6387_v23, 1  ;;  %v10315_v32 = vrot.slane %v6387_v23, 7  ;;  %v10669_v33 = vrot.slane %v6387_v23, 2 }
  0xfe   : > { %10666 = vst [vmem:[#allocation62_spill] sm:$0xff] %v6392_v62  ;;  %v5742_v41 = vpop.eup %5741 }
  0xff   : > { %v5744_v25 = vpop.eup %5743  ;;  %v1759_v26 = vsel %vm1730_vm6, %v10667_v12, %v10314_v18  ;;  %v6424_v37 = vsel %vm1859_vm7, %v10668_v21, %v10315_v32  ;;  %v2017_v50 = vsel %vm1988_vm8, %v10670_v31, %v10669_v33  ;;  %v10671_v12 = vrot.slane %v6387_v23, 6 }
 0x100   : > { %v5746_v20 = vpop.eup %5745  ;;  %v1797_v28 = vmax.f32 %v6353_v10, %v1759_v26  ;;  %v10672_v18 = vrot.slane %v6353_v10, 6  ;;  %v10673_v21 = vrot.slane %v6392_v62, 1  ;;  %v10674_v32 = vrot.slane %v6364_v55, 1 }
 0x101   : > { %v5748_v34 = vpop.eup %5747  ;;  %v10675_v31 = vrot.slane %v6392_v62, 7  ;;  %v10676_v33 = vrot.slane %v6364_v55, 7  ;;  %v6483_v13 = vmul.f32 %v5744_v25, %v6217_v16 }
 0x102   : > { %v5750_v30 = vpop.eup %5749  ;;  %v6439_v54 = vsel %vm2117_vm9, %v10672_v18, %v10671_v12  ;;  %v1743_v43 = vsel %vm1730_vm6, %v10674_v32, %v10673_v21  ;;  %v10677_v12 = vrot.slane %v6392_v62, 2  ;;  %v6467_v32 = vmul.f32 %v5740_v8, %v6209_v59 }
 0x103   : > { %v6453_v26 = vsel %vm1859_vm7, %v10676_v33, %v10675_v31  ;;  %v6455_v1 = vpop.eup %5751  ;;  %v1813_v18 = vmax.f32 %v6364_v55, %v1743_v43  ;;  %v6470_v21 = vmul.f32 %v5742_v41, %v6213_v7  ;;  %v10681_v33 = vrot.slane %v6392_v62, 6  ;;  %10683 = vst [vmem:[#allocation65_spill] sm:$0xff] %v6483_v13 }
 0x104   : > { %v6464_v6 = vsel %vm1988_vm8, %v10678_v42, %v10677_v12  ;;  %10679 = vst [vmem:[#allocation63_spill] sm:$0xff] %v6467_v32  ;;  %v6472_v31 = vpop.eup %5753  ;;  %v10682_v43 = vrot.slane %v6364_v55, 6  ;;  %v6486_v42 = vmul.f32 %v5746_v20, %v6225_v27  ;;  %v6489_v59 = vmul.f32 %v5748_v34, %v6237_v44 }
 0x105   : > { %10680 = vst [vmem:[#allocation64_spill] sm:$0xff] %v6470_v21  ;;  %v6491_v7 = vpop.eup %5755  ;;  %v1699_v8 = vrot.slane %v6467_v32, 1  ;;  %v1828_v41 = vrot.slane %v6467_v32, 7  ;;  %v1957_v12 = vrot.slane %v6467_v32, 2  ;;  %v1715_v16 = vrot.slane %v6470_v21, 1 }
 0x106   : > { %v6480_v14 = vsel %vm2117_vm9, %v10682_v43, %v10681_v33  ;;  %10684 = vst [vmem:[#allocation66_spill] sm:$0xff] %v6486_v42  ;;  %10685 = vst [vmem:[#allocation67_spill] sm:$0xff] %v6489_v59  ;;  %v2086_v33 = vrot.slane %v6467_v32, 6  ;;  %v6497_v43 = vpop.eup %5757  ;;  %v1844_v27 = vrot.slane %v6470_v21, 7  ;;  %v1973_v20 = vrot.slane %v6470_v21, 2 }
 0x107   : > { %v6503_v44 = vmul.f32 %v5750_v30, %v6241_v9  ;;  %v10687_v34 = vrot.slane %v6353_v10, 1  ;;  %v6513_v49 = vsel %vm1730_vm6, %v10688_v22, %v1699_v8  ;;  %v1889_v38 = vsel %vm1859_vm7, %v1828_v41, %v10690_v11 }
 0x108   : > { %10689 = vst [vmem:[#allocation69_spill] sm:$0xff] %v6513_v49  ;;  %v2102_v56 = vrot.slane %v6470_v21, 6  ;;  %v10691_v30 = vrot.slane %v6381_v24, 7  ;;  %v1894_v5 = vadd.f32 %v1889_v38, %v6056_v36  ;;  %v2018_v22 = vsel %vm1988_vm8, %v1957_v12, %v10692_v4 }
 0x109   : > { %10686 = vst [vmem:[#allocation68_spill] sm:$0xff] %v6503_v44  ;;  %v1760_v25 = vsel %vm1730_vm6, %v1699_v8, %v10687_v34  ;;  %v6530_v8 = vpop.eup %5759  ;;  %v10695_v38 = vrot.slane %v6353_v10, 6  ;;  %v10696_v11 = vrot.slane %v6381_v24, 6 }
 0x10a   : > { %v1764_v9 = vadd.f32 %v1760_v25, %v6053_v35  ;;  %v1890_v34 = vsel %vm1859_vm7, %v10691_v30, %v1828_v41  ;;  %v6538_v25 = vsel %vm1988_vm8, %v10693_v3, %v1957_v12  ;;  %v2022_v41 = vadd.f32 %v2018_v22, %v6061_v39  ;;  %v6545_v36 = vpop.eup %5761 }
 0x10b   : > { %10694 = vst [vmem:[#allocation70_spill] sm:$0xff] %v6538_v25  ;;  %v2147_v30 = vsel %vm2117_vm9, %v2086_v33, %v10695_v38  ;;  %v1926_v35 = vmax.f32 %v1797_v28, %v1894_v5  ;;  %v2148_v49 = vsel %vm2117_vm9, %v10696_v11, %v2086_v33  ;;  %v10697_v3 = vrot.slane %v6364_v55, 1 }
 0x10c   : > { %v1796_v4 = vmax.f32 %v6467_v32, %v1764_v9  ;;  %v2152_v22 = vadd.f32 %v2147_v30, %v6064_v40  ;;  %v10698_v39 = vrot.slane %v6384_v17, 1  ;;  %v10700_v28 = vrot.slane %v6364_v55, 7 }
 0x10d   : > { %v1744_v12 = vsel %vm1730_vm6, %v1715_v16, %v10697_v3  ;;  %v2055_v11 = vmax.f32 %v1926_v35, %v2017_v50  ;;  %v10701_v25 = vrot.slane %v6384_v17, 7  ;;  %v10749_v40 = vrot.slane %v6489_v59, 6 }
 0x10e   : > { %v6561_v38 = vsel %vm1730_vm6, %v10698_v39, %v1715_v16  ;;  %v1780_v5 = vadd.f32 %v1744_v12, %v6069_v45  ;;  %v1873_v33 = vsel %vm1859_vm7, %v1844_v27, %v10700_v28  ;;  %v1925_v9 = vmax.f32 %v1796_v4, %v1890_v34 }
 0x10f   : > { %10699 = vst [vmem:[#allocation71_spill] sm:$0xff] %v6561_v38  ;;  %v1874_v30 = vsel %vm1859_vm7, %v10701_v25, %v1844_v27  ;;  %v1910_v3 = vadd.f32 %v1873_v33, %v6072_v46  ;;  %v10702_v12 = vrot.slane %v6364_v55, 2  ;;  %v10703_v34 = vrot.slane %v6364_v55, 6 }
 0x110   : > { %v1812_v16 = vmax.f32 %v6470_v21, %v1780_v5  ;;  %v2054_v50 = vmax.f32 %v1925_v9, %v2022_v41  ;;  %v6584_v4 = vmax.f32 %v2055_v11, %v2152_v22  ;;  %v10705_v25 = vrot.slane %v6384_v17, 2  ;;  %v10839_v21 = vld [vmem:[#allocation31_spill] sm:$0xff] }
 0x111   : > { %v2002_v45 = vsel %vm1988_vm8, %v1973_v20, %v10702_v12  ;;  %v2131_v35 = vsel %vm2117_vm9, %v2102_v56, %v10703_v34  ;;  %v1942_v27 = vmax.f32 %v1813_v18, %v1910_v3  ;;  %v10707_v12 = vrot.slane %v6384_v17, 6 }
 0x112   : > { %10704 = vst [vmem:[#allocation72_spill] sm:$0xff] %v6584_v4  ;;  %v6590_v28 = vsel %vm1988_vm8, %v10705_v25, %v1973_v20  ;;  %v1941_v5 = vmax.f32 %v1812_v16, %v1874_v30  ;;  %v2038_v33 = vadd.f32 %v2002_v45, %v6075_v47  ;;  %v2168_v34 = vadd.f32 %v2131_v35, %v6078_v48  ;;  %v10739_v48 = vld [vmem:[#allocation20_spill] sm:$0xff] }
 0x113   : > { %10706 = vst [vmem:[#allocation73_spill] sm:$0xff] %v6590_v28  ;;  %v2132_v39 = vsel %vm2117_vm9, %v10707_v12, %v2102_v56  ;;  %v6598_v41 = vmax.f32 %v2054_v50, %v2148_v49  ;;  %v6601_v18 = vadd.f32 -inf, %v6584_v4  ;;  %v2071_v22 = vmax.f32 %v1942_v27, %v6464_v6 }
 0x114   : > { %v2070_v9 = vmax.f32 %v1941_v5, %v2038_v33  ;;  %v1702_v50 = vrot.slane %v6489_v59, 1  ;;  %v10338_v27 = vrot.slane %v6489_v59, 7  ;;  %v10339_v25 = vrot.slane %v6489_v59, 2 }
 0x115   : > { %10708 = vst [vmem:[#allocation74_spill] sm:$0xff] %v6598_v41  ;;  %10709 = vst [vmem:[#allocation75_spill] sm:$0xff] %v6601_v18  ;;  %v6609_v56 = vadd.f32 -inf, %v6598_v41  ;;  %v6611_v3 = vmax.f32 %v2071_v22, %v2168_v34  ;;  %v10340_v5 = vrot.slane %v6489_v59, 6  ;;  %v10341_v33 = vrot.slane %v6503_v44, 1  ;;  %v10786_v18 = vld [vmem:[#allocation58_spill] sm:$0xff] }
 0x116   : > { %v6615_v35 = vmax.f32 %v2070_v9, %v2132_v39  ;;  %v10342_v12 = vrot.slane %v6503_v44, 7  ;;  %v10713_v22 = vrot.slane %v6387_v23, 1  ;;  %v10714_v9 = vrot.slane %v6387_v23, 7 }
 0x117   : > { %10710 = vst [vmem:[#allocation76_spill] sm:$0xff] %v6609_v56  ;;  %10711 = vst [vmem:[#allocation77_spill] sm:$0xff] %v6611_v3  ;;  %v10343_v16 = vrot.slane %v6503_v44, 2  ;;  %v10715_v34 = vrot.slane %v6387_v23, 2  ;;  %v10717_v11 = vrot.slane %v6392_v62, 1  ;;  %v10719_v20 = vrot.slane %v6392_v62, 2 }
 0x118   : > { %10712 = vst [vmem:[#allocation78_spill] sm:$0xff] %v6615_v35  ;;  %v1758_v39 = vsel %vm1730_vm6, %v10713_v22, %v1702_v50  ;;  %v1887_v6 = vsel %vm1859_vm7, %v10714_v9, %v10338_v27  ;;  %v10716_v22 = vrot.slane %v6387_v23, 6  ;;  %v10742_v46 = vrot.slane %v6489_v59, 2 }
 0x119   : > { %v1766_v49 = vadd.f32 %v1758_v39, %v6081_v51  ;;  %v2016_v30 = vsel %vm1988_vm8, %v10715_v34, %v10339_v25  ;;  %v1896_v27 = vadd.f32 %v1887_v6, %v6084_v52  ;;  %v1742_v34 = vsel %vm1730_vm6, %v10717_v11, %v10341_v33 }
 0x11a   : > { %v2145_v45 = vsel %vm2117_vm9, %v10716_v22, %v10340_v5  ;;  %v2024_v39 = vadd.f32 %v2016_v30, %v6089_v57  ;;  %v10718_v25 = vrot.slane %v6392_v62, 7  ;;  %v1782_v30 = vadd.f32 %v1742_v34, %v6095_v60 }
 0x11b   : > { %v1798_v5 = vmax.f32 %v6387_v23, %v1766_v49  ;;  %v6666_v6 = vadd.f32 %v2145_v45, %v6092_v58  ;;  %v2000_v11 = vsel %vm1988_vm8, %v10719_v20, %v10343_v16  ;;  %v6681_v49 = vmul.f32 %v6455_v1, %v6245_v63 }
 0x11c   : > { %v1871_v22 = vsel %vm1859_vm7, %v10718_v25, %v10342_v12  ;;  %v2040_v9 = vadd.f32 %v2000_v11, %v6104_v0  ;;  %v6685_v45 = vmul.f32 %v6472_v31, %v6249_v15  ;;  %v1814_v34 = vmax.f32 %v6392_v62, %v1782_v30 }
 0x11d   : > { %v6676_v33 = vadd.f32 %v1871_v22, %v6098_v61  ;;  %10720 = vst [vmem:[#allocation79_spill] sm:$0xff] %v6681_v49  ;;  %v1927_v25 = vmax.f32 %v1798_v5, %v6424_v37  ;;  %v10722_v12 = vrot.slane %v6503_v44, 6  ;;  %v10723_v20 = vrot.slane %v6392_v62, 6 }
 0x11e   : > { %10721 = vst [vmem:[#allocation80_spill] sm:$0xff] %v6685_v45  ;;  %v6697_v11 = vmul.f32 %v6491_v7, %v6253_v29  ;;  %v10344_v1 = vrot.slane %v6681_v49, 1  ;;  %v10345_v63 = vrot.slane %v6681_v49, 7  ;;  %v10348_v15 = vrot.slane %v6681_v49, 2 }
 0x11f   : > { %v2129_v22 = vsel %vm2117_vm9, %v10723_v20, %v10722_v12  ;;  %v10346_v37 = vrot.slane %v6681_v49, 6  ;;  %v2056_v31 = vmax.f32 %v1927_v25, %v2024_v39  ;;  %v1943_v5 = vmax.f32 %v1814_v34, %v6453_v26 }
 0x120   : > { %10724 = vst [vmem:[#allocation81_spill] sm:$0xff] %v6697_v11  ;;  %v10347_v30 = vrot.slane %v6685_v45, 1  ;;  %v10349_v16 = vrot.slane %v6685_v45, 7  ;;  %v6707_v12 = vadd.f32 %v2129_v22, %v6112_v2  ;;  %v10725_v29 = vrot.slane %v6483_v13, 1 }
 0x121   : > { %v10726_v39 = vrot.slane %v6483_v13, 7  ;;  %v10727_v25 = vrot.slane %v6483_v13, 2  ;;  %v6730_v20 = vmax.f32 %v2056_v31, %v6439_v54  ;;  %v2072_v22 = vmax.f32 %v1943_v5, %v2040_v9 }
 0x122   : > { %v1755_v7 = vsel %vm1730_vm6, %v10725_v29, %v10344_v1  ;;  %v10729_v29 = vrot.slane %v6483_v13, 6  ;;  %v10354_v9 = vrot.slane %v6685_v45, 2  ;;  %v10357_v31 = vrot.slane %v6685_v45, 6 }
 0x123   : > { %v6721_v26 = vsel %vm1859_vm7, %v10726_v39, %v10345_v63  ;;  %v2013_v34 = vsel %vm1988_vm8, %v10727_v25, %v10348_v15  ;;  %10728 = vst [vmem:[#allocation82_spill] sm:$0xff] %v6730_v20  ;;  %v10730_v39 = vrot.slane %v6486_v42, 1  ;;  %v1801_v25 = vmax.f32 %v6483_v13, %v1755_v7 }
 0x124   : > { %v6738_v1 = vsel %vm2117_vm9, %v10729_v29, %v10346_v37  ;;  %v10731_v5 = vrot.slane %v6486_v42, 7  ;;  %v1703_v37 = vrot.slane %v6697_v11, 1  ;;  %v1961_v7 = vrot.slane %v6697_v11, 2 }
 0x125   : > { %v1739_v63 = vsel %vm1730_vm6, %v10730_v39, %v10347_v30  ;;  %v1832_v39 = vrot.slane %v6697_v11, 7  ;;  %v10733_v30 = vrot.slane %v6486_v42, 2  ;;  %v2090_v2 = vrot.slane %v6697_v11, 6 }
 0x126   : > { %v1817_v54 = vmax.f32 %v6486_v42, %v1739_v63  ;;  %v6756_v29 = vsel %vm1859_vm7, %v10731_v5, %v10349_v16  ;;  %v6762_v63 = vmax.f32 %v2072_v22, %v6480_v14  ;;  %v10734_v5 = vrot.slane %v6486_v42, 6 }
 0x127   : > { %v6770_v15 = vsel %vm1988_vm8, %v10733_v30, %v10354_v9  ;;  %v10735_v14 = vrot.slane %v6483_v13, 1  ;;  %v1757_v0 = vsel %vm1730_vm6, %v1702_v50, %v1703_v37  ;;  %v10736_v30 = vrot.slane %v6483_v13, 7 }
 0x128   : > { %10732 = vst [vmem:[#allocation83_spill] sm:$0xff] %v6762_v63  ;;  %v6778_v16 = vsel %vm2117_vm9, %v10734_v5, %v10357_v31  ;;  %v6793_v61 = vmul.f32 %v6497_v43, %v6257_v53  ;;  %v10738_v5 = vld [vmem:[#allocation19_spill] sm:$0xff]  ;;  %v1799_v60 = vmax.f32 %v6489_v59, %v1757_v0  ;;  %v2015_v53 = vsel %vm1988_vm8, %v10742_v46, %v1961_v7  ;;  %v10743_v43 = vld [vmem:[#allocation21_spill] sm:$0xff]  ;;  %v10745_v63 = vld [vmem:[#allocation50_spill] sm:$0xff] }
 0x129   : > { %v1756_v22 = vsel %vm1730_vm6, %v1703_v37, %v10735_v14  ;;  %v1885_v9 = vsel %vm1859_vm7, %v1832_v39, %v10736_v30  ;;  %v10740_v14 = vrot.slane %v6483_v13, 2  ;;  %v10741_v37 = vrot.slane %v6489_v59, 7 }
 0x12a   : > { %10737 = vst [vmem:[#allocation84_spill] sm:$0xff] %v6793_v61  ;;  %v1768_v31 = vadd.f32 %v1756_v22, %v10738_v5  ;;  %v1898_v47 = vadd.f32 %v1885_v9, %v10739_v48  ;;  %v10744_v0 = vrot.slane %v6483_v13, 6  ;;  %v10746_v3 = vand.u32 15, %v10745_v63 }
 0x12b   : > { %v2014_v50 = vsel %vm1988_vm8, %v1961_v7, %v10740_v14  ;;  %v1886_v30 = vsel %vm1859_vm7, %v10741_v37, %v1832_v39  ;;  %v1928_v37 = vmax.f32 %v1799_v60, %v1896_v27  ;;  %v2144_v46 = vsel %vm2117_vm9, %v10749_v40, %v2090_v2  ;;  %v10750_v7 = vld [vmem:[#allocation52_spill] sm:$0xff] }
 0x12c   : > { %v2026_v22 = vadd.f32 %v2014_v50, %v10743_v43  ;;  %v2143_v9 = vsel %vm2117_vm9, %v2090_v2, %v10744_v0  ;;  %vm6817_vm10 = vcmp.lt.s32.totalorder %v10746_v3, 15  ;;  %v1800_v39 = vmax.f32 %v6697_v11, %v1768_v31  ;;  %v10754_v0 = vld [vmem:[#allocation22_spill] sm:$0xff]  ;;  %v10779_v14 = vld [vmem:[#allocation44_spill] sm:$0xff] }
 0x12d   : > { %v1930_v35 = vmax.f32 %v1801_v25, %v1898_v47  ;;  %v10751_v50 = vand.u32 15, %v10750_v7  ;;  %v2156_v3 = vadd.f32 %v2143_v9, %v10754_v0  ;;  %v1719_v43 = vrot.slane %v6793_v61, 1 }
 0x12e   : > { %v1848_v48 = vrot.slane %v6793_v61, 7  ;;  %v1977_v60 = vrot.slane %v6793_v61, 2  ;;  %v1929_v47 = vmax.f32 %v1800_v39, %v1886_v30  ;;  %v2057_v27 = vmax.f32 %v1928_v37, %v2015_v53  ;;  %v10759_v53 = vld [vmem:[#allocation23_spill] sm:$0xff] }
 0x12f   : > { %vm6828_vm11 = vcmp.ge.s32.totalorder %v10751_v50, 1  ;;  %v2059_v25 = vmax.f32 %v1930_v35, %v2013_v34  ;;  %v2106_v31 = vrot.slane %v6793_v61, 6  ;;  %v10755_v40 = vrot.slane %v6486_v42, 1 }
 0x130   : > { %v10756_v50 = vrot.slane %v6503_v44, 1  ;;  %v10757_v0 = vrot.slane %v6486_v42, 7  ;;  %v666_v30 = vadd.f32 1.0, %v6530_v8  ;;  %v2058_v35 = vmax.f32 %v1929_v47, %v2026_v22 }
 0x131   : > { %v1740_v2 = vsel %vm1730_vm6, %v1719_v43, %v10755_v40  ;;  %v6851_v34 = vmax.f32 %v2057_v27, %v6666_v6  ;;  %v10760_v37 = vrot.slane %v6503_v44, 7  ;;  %v6858_v58 = vmax.f32 %v2059_v25, %v2156_v3 }
 0x132   : > { %v1741_v9 = vsel %vm1730_vm6, %v10756_v50, %v1719_v43  ;;  %v1869_v5 = vsel %vm1859_vm7, %v1848_v48, %v10757_v0  ;;  %v1784_v39 = vadd.f32 %v1740_v2, %v10759_v53  ;;  %v10762_v50 = vld [vmem:[#allocation24_spill] sm:$0xff]  ;;  %v10763_v0 = vrot.slane %v6486_v42, 2  ;;  %v10767_v2 = vld [vmem:[#allocation25_spill] sm:$0xff] }
 0x133   : > { %10758 = vst [vmem:[#allocation50_spill] sm:$0xff] %v6851_v34  ;;  %v1870_v40 = vsel %vm1859_vm7, %v10760_v37, %v1848_v48  ;;  %10761 = vst [vmem:[#allocation52_spill] sm:$0xff] %v6858_v58  ;;  %v1815_v43 = vmax.f32 %v6503_v44, %v1741_v9  ;;  %v1914_v57 = vadd.f32 %v1869_v5, %v10762_v50  ;;  %v10765_v47 = vrot.slane %v6503_v44, 2  ;;  %v10769_v37 = vld [vmem:[#allocation26_spill] sm:$0xff]  ;;  %v10796_v50 = vld [vmem:[#allocation32_spill] sm:$0xff] }
 0x134   : > { %v1998_v8 = vsel %vm1988_vm8, %v1977_v60, %v10763_v0  ;;  %v6866_v6 = vmax.f32 %v2058_v35, %v2144_v46  ;;  %v1816_v22 = vmax.f32 %v6793_v61, %v1784_v39  ;;  %v10766_v3 = vrot.slane %v6486_v42, 6  ;;  %v10825_v34 = vld [vmem:[#allocation28_spill] sm:$0xff]  ;;  %v10827_v61 = vld [vmem:[#allocation30_spill] sm:$0xff] }
 0x135   : > { %v1999_v48 = vsel %vm1988_vm8, %v10765_v47, %v1977_v60  ;;  %v1944_v5 = vmax.f32 %v1815_v43, %v6676_v33  ;;  %v1946_v25 = vmax.f32 %v1817_v54, %v1914_v57  ;;  %v2042_v9 = vadd.f32 %v1998_v8, %v10767_v2  ;;  %v10770_v57 = vld [vmem:[#allocation42_spill] sm:$0xff] }
 0x136   : > { %10764 = vst [vmem:[#allocation85_spill] sm:$0xff] %v6866_v6  ;;  %v2127_v27 = vsel %vm2117_vm9, %v2106_v31, %v10766_v3  ;;  %v10768_v46 = vrot.slane %v6503_v44, 6  ;;  %v1945_v39 = vmax.f32 %v1816_v22, %v1870_v40  ;;  %5763 = vrcp.f32 %v666_v30  ;;  %v481_v30 = vpop.f32.mrf.mxu0  ;;  %v10776_v22 = vld [vmem:[#allocation43_spill] sm:$0xff] }
 0x137   : > { %v2172_v0 = vadd.f32 %v2127_v27, %v10769_v37  ;;  %v682_v60 = vadd.f32 1.0, %v6545_v36  ;;  %v2073_v3 = vmax.f32 %v1944_v5, %v1999_v48  ;;  %v2075_v33 = vmax.f32 %v1946_v25, %v6770_v15  ;;  %v10781_v27 = vld [vmem:[#allocation57_spill] sm:$0xff]  ;;  %v10782_v25 = vld [vmem:[#allocation46_spill] sm:$0xff] }
 0x138   : > { %v2128_v35 = vsel %vm2117_vm9, %v10768_v46, %v2106_v31  ;;  %5765 = vpow2.f32 %v10770_v57  ;;  %v2074_v54 = vmax.f32 %v1945_v39, %v2042_v9  ;;  %v10771_v43 = vmov -inf  }
 0x139   : > { %5767 = vrcp.f32 %v682_v60  ;;  %v6892_v31 = vsel %vm6817_vm10, 0.0, %v10771_v43  ;;  %v10773_v40 = vand.u32 15, %v10745_v63  ;;  %v6897_v36 = vmax.f32 %v2073_v3, %v6707_v12  ;;  %v545_v12 = vpop.f32.mrf.mxu1  ;;  %v10788_v60 = vld [vmem:[#allocation47_spill] sm:$0xff] }
 0x13a   : > { %10772 = vst [vmem:[#allocation42_spill] sm:$0xff] %v6892_v31  ;;  %v6899_v8 = vmax.f32 %v2075_v33, %v2172_v0  ;;  %5769 = vpow2.f32 %v10776_v22  ;;  %v6905_v15 = vsel %vm6828_vm11, 0.0, %v10771_v43  ;;  %v6907_v48 = vmax.f32 %v2074_v54, %v2128_v35  ;;  %v10787_v35 = vld [vmem:[#allocation17_spill] sm:$0xff]  ;;  %v10789_v54 = vld [vmem:[#allocation55_spill] sm:$0xff] }
 0x13b   : > { %vm1450_vm12 = vcmp.lt.s32.totalorder %v10773_v40, 14  ;;  %10774 = vst [vmem:[#allocation86_spill] sm:$0xff] %v6897_v36  ;;  %10777 = vst [vmem:[#allocation43_spill] sm:$0xff] %v6905_v15  ;;  %5771 = vpow2.f32 %v10779_v14  ;;  %v574_v5 = vsub.f32 0.0, %v10781_v27  ;;  %v10783_v9 = vand.u32 15, %v10750_v7 }
 0x13c   : > { %10775 = vst [vmem:[#allocation87_spill] sm:$0xff] %v6899_v8  ;;  %10778 = vst [vmem:[#allocation88_spill] sm:$0xff] %v6907_v48  ;;  %v6911_v63 = vsel %vm1450_vm12, 0.0, %v10771_v43  ;;  %5773 = vpow2.f32 %v10782_v25  ;;  %v590_v39 = vsub.f32 0.0, %v10786_v18  ;;  %v6923_v0 = vadd.f32 %v10787_v35, %v481_v30  ;;  %v10801_v8 = vld [vmem:[#allocation33_spill] sm:$0xff] }
 0x13d   : > { %10780 = vst [vmem:[#allocation44_spill] sm:$0xff] %v6911_v63  ;;  %vm6917_vm13 = vcmp.ge.s32.totalorder %v10783_v9, 2  ;;  %5775 = vpow2.f32 %v10788_v60  ;;  %v620_v3 = vmul.f32 1.442695, %v574_v5  ;;  %v764_v33 = vadd.s32 88, %v6042_v19 }
 0x13e   : > { %v765_v57 = vadd.s32 96, %v6042_v19  ;;  %5777 = vpow2.f32 %v10789_v54  ;;  %v652_v40 = vmul.f32 1.442695, %v590_v39  ;;  %v572_v7 = vsub.f32 0.0, %v6923_v0  ;;  %v5509_v39 = vpop.f32.mrf.mxu0 }
 0x13f   : > { %v6931_v22 = vadd.f32 %v10787_v35, %v545_v12  ;;  %5779 = vpow2.f32 %v620_v3  ;;  %v866_v14 = vand.u32 15, %v764_v33  ;;  %v780_v30 = vadd.s32 216, %v6042_v19 }
 0x140   : > { %v873_v25 = vand.u32 15, %v765_v57  ;;  %5781 = vpow2.f32 %v652_v40  ;;  %v616_v9 = vmul.f32 1.442695, %v572_v7  ;;  %v781_v60 = vadd.s32 224, %v6042_v19 }
 0x141   : > { %v588_v5 = vsub.f32 0.0, %v6931_v22  ;;  %vm1180_vm14 = vcmp.lt.s32.totalorder %v866_v14, 15  ;;  %vm1436_vm0 = vcmp.lt.s32.totalorder %v866_v14, 14  ;;  %v6939_v12 = vsel %vm6917_vm13, 0.0, %v10771_v43  ;;  %v5525_v14 = vpop.f32.mrf.mxu1 }
 0x142   : > { %vm1245_vm15 = vcmp.ge.s32.totalorder %v873_v25, 1  ;;  %vm1501_vm1 = vcmp.ge.s32.totalorder %v873_v25, 2  ;;  %10790 = vst [vmem:[#allocation57_spill] sm:$0xff] %v6939_v12  ;;  %5783 = vpow2.f32 %v616_v9  ;;  %v6942_v3 = vsel %vm1180_vm14, 0.0, %v10771_v43 }
 0x143   : > { %10791 = vst [vmem:[#allocation46_spill] sm:$0xff] %v6942_v3  ;;  %v6945_v33 = vsel %vm1245_vm15, 0.0, %v10771_v43  ;;  %v6948_v57 = vsel %vm1436_vm0, 0.0, %v10771_v43  ;;  %v648_v54 = vmul.f32 1.442695, %v588_v5  ;;  %v978_v40 = vand.u32 15, %v780_v30  ;;  %v5764_v25 = vpop.eup %5763 }
 0x144   : > { %10792 = vst [vmem:[#allocation58_spill] sm:$0xff] %v6945_v33  ;;  %10793 = vst [vmem:[#allocation17_spill] sm:$0xff] %v6948_v57  ;;  %v985_v7 = vand.u32 15, %v781_v60  ;;  %v6951_v47 = vsel %vm1501_vm1, 0.0, %v10771_v43  ;;  %v6954_v46 = vadd.f32 %v5509_v39, %v10787_v35  ;;  %v768_v9 = vadd.s32 120, %v6042_v19 }
 0x145   : > { %10794 = vst [vmem:[#allocation47_spill] sm:$0xff] %v6951_v47  ;;  %v769_v37 = vadd.s32 128, %v6042_v19  ;;  %v5766_v2 = vpop.eup %5765  ;;  %v6959_v53 = vmul.f32 %v5764_v25, %v10796_v50  ;;  %5785 = vpow2.f32 %v648_v54  ;;  %vm1196_vm2 = vcmp.lt.s32.totalorder %v978_v40, 15  ;;  %v6967_v35 = vld [vmem:[%s10284_s2] ss:$0 sm:$0xff] }
 0x146   : > { %10795 = vst [vmem:[#allocation55_spill] sm:$0xff] %v6954_v46  ;;  %vm1261_vm3 = vcmp.ge.s32.totalorder %v985_v7, 1  ;;  %v5768_v30 = vpop.eup %5767  ;;  %v664_v5 = vadd.f32 1.0, %v5766_v2  ;;  %v6962_v60 = vsel %vm1196_vm2, 0.0, %v10771_v43  ;;  %vm1452_vm4 = vcmp.lt.s32.totalorder %v978_v40, 14 }
 0x147   : > { %10797 = vst [vmem:[#allocation32_spill] sm:$0xff] %v6959_v53  ;;  %10798 = vst [vmem:[#allocation89_spill] sm:$0xff] %v6962_v60  ;;  %v6970_v39 = vadd.f32 %v6967_v35, %v5525_v14  ;;  %v5770_v48 = vpop.eup %5769  ;;  %v6976_v2 = vsel %vm1261_vm3, 0.0, %v10771_v43  ;;  %v6980_v52 = vmul.f32 %v5768_v30, %v10801_v8  ;;  %v6983_v28 = vsel %vm1452_vm4, 0.0, %v10771_v43 }
 0x148   : > { %10800 = vst [vmem:[#allocation91_spill] sm:$0xff] %v6976_v2  ;;  %v5772_v36 = vpop.eup %5771  ;;  %5787 = vrcp.f32 %v664_v5  ;;  %v680_v51 = vadd.f32 1.0, %v5770_v48  ;;  %10802 = vst [vmem:[#allocation33_spill] sm:$0xff] %v6983_v28  ;;  %vm1517_vm5 = vcmp.ge.s32.totalorder %v985_v7, 2  ;;  %v894_v54 = vand.u32 15, %v768_v9 }
 0x149   : > { %10799 = vst [vmem:[#allocation90_spill] sm:$0xff] %v6970_v39  ;;  %v5774_v14 = vpop.eup %5773  ;;  %v667_v56 = vadd.f32 1.0, %v5772_v36  ;;  %v575_v40 = vsub.f32 0.0, %v6954_v46  ;;  %v6991_v7 = vsel %vm1517_vm5, 0.0, %v10771_v43  ;;  %v901_v9 = vand.u32 15, %v769_v37 }
 0x14a   : > { %v5776_v50 = vpop.eup %5775  ;;  %5789 = vrcp.f32 %v680_v51  ;;  %v683_v48 = vadd.f32 1.0, %v5774_v14  ;;  %10803 = vst [vmem:[#allocation92_spill] sm:$0xff] %v6991_v7  ;;  %vm1184_vm10 = vcmp.lt.s32.totalorder %v894_v54, 15  ;;  %vm1440_vm11 = vcmp.lt.s32.totalorder %v894_v54, 14 }
 0x14b   : > { %v5778_v8 = vpop.eup %5777  ;;  %v665_v36 = vadd.f32 1.0, %v5776_v50  ;;  %5791 = vrcp.f32 %v667_v56  ;;  %v622_v41 = vmul.f32 1.442695, %v575_v40  ;;  %vm1249_vm12 = vcmp.ge.s32.totalorder %v901_v9, 1  ;;  %v484_v50 = vpop.f32.mrf.mxu0 }
 0x14c   : > { %v5780_v5 = vpop.eup %5779  ;;  %v681_v6 = vadd.f32 1.0, %v5778_v8  ;;  %5793 = vrcp.f32 %v683_v48  ;;  %v6994_v51 = vsel %vm1184_vm10, 0.0, %v10771_v43  ;;  %v6997_v56 = vsel %vm1249_vm12, 0.0, %v10771_v43 }
 0x14d   : > { %v5782_v25 = vpop.eup %5781  ;;  %v670_v38 = vadd.f32 1.0, %v5780_v5  ;;  %5795 = vrcp.f32 %v665_v36  ;;  %10804 = vst [vmem:[#allocation93_spill] sm:$0xff] %v6994_v51  ;;  %10805 = vst [vmem:[#allocation94_spill] sm:$0xff] %v6997_v56  ;;  %vm1505_vm13 = vcmp.ge.s32.totalorder %v901_v9, 2  ;;  %v7000_v14 = vsel %vm1440_vm11, 0.0, %v10771_v43  ;;  %v10824_v51 = vld [vmem:[#allocation27_spill] sm:$0xff] }
 0x14e   : > { %v686_v58 = vadd.f32 1.0, %v5782_v25  ;;  %5797 = vrcp.f32 %v681_v6  ;;  %10806 = vst [vmem:[#allocation95_spill] sm:$0xff] %v7000_v14  ;;  %v591_v54 = vsub.f32 0.0, %v6970_v39  ;;  %v7004_v25 = vsel %vm1505_vm13, 0.0, %v10771_v43  ;;  %v548_v39 = vpop.f32.mrf.mxu1 }
 0x14f   : > { %v5784_v30 = vpop.eup %5783  ;;  %5799 = vrcp.f32 %v670_v38  ;;  %10807 = vst [vmem:[#allocation96_spill] sm:$0xff] %v7004_v25  ;;  %v784_v6 = vadd.s32 248, %v6042_v19  ;;  %v789_v40 = vand.u32 15, %v6042_v19  ;;  %v7009_v36 = vadd.f32 %v6967_v35, %v484_v50 }
 0x150   : > { %v668_v37 = vadd.f32 1.0, %v5784_v30  ;;  %5801 = vrcp.f32 %v686_v58  ;;  %v654_v48 = vmul.f32 1.442695, %v591_v54  ;;  %v7012_v38 = vadd.s32 104, %v6042_v19  ;;  %v10810_v54 = vld [vmem:[#allocation34_spill] sm:$0xff] }
 0x151   : > { %10808 = vst [vmem:[#allocation97_spill] sm:$0xff] %v7009_v36  ;;  %v1006_v5 = vand.u32 15, %v784_v6  ;;  %vm1233_vm14 = vcmp.ge.s32.totalorder %v789_v40, 1  ;;  %vm1489_vm15 = vcmp.ge.s32.totalorder %v789_v40, 2  ;;  %v573_v9 = vsub.f32 0.0, %v7009_v36  ;;  %v10815_v36 = vld [vmem:[#allocation35_spill] sm:$0xff] }
 0x152   : > { %v5786_v8 = vpop.eup %5785  ;;  %5803 = vrcp.f32 %v668_v37  ;;  %v7018_v50 = vsel %vm1233_vm14, 0.0, %v10771_v43  ;;  %v7027_v6 = vsel %vm1489_vm15, 0.0, %v10771_v43  ;;  %v7048_v58 = vadd.s32 232, %v6042_v19 }
 0x153   : > { %v684_v30 = vadd.f32 1.0, %v5786_v8  ;;  %5805 = vpow2.f32 %v622_v41  ;;  %vm1200_vm0 = vcmp.lt.s32.totalorder %v1006_v5, 15  ;;  %10809 = vst [vmem:[#allocation98_spill] sm:$0xff] %v7018_v50  ;;  %vm1456_vm1 = vcmp.lt.s32.totalorder %v1006_v5, 14  ;;  %10812 = vst [vmem:[#allocation99_spill] sm:$0xff] %v7027_v6 }
 0x154   : > { %5807 = vpow2.f32 %v654_v48  ;;  %v7024_v41 = vsel %vm1200_vm0, 0.0, %v10771_v43  ;;  %v618_v40 = vmul.f32 1.442695, %v573_v9  ;;  %v7030_v48 = vsel %vm1456_vm1, 0.0, %v10771_v43  ;;  %10817 = vst [vmem:[#allocation102_spill] sm:$0xff] %v7048_v58 }
 0x155   : > { %v5788_v37 = vpop.eup %5787  ;;  %5809 = vrcp.f32 %v684_v30  ;;  %10811 = vst [vmem:[#allocation34_spill] sm:$0xff] %v7024_v41  ;;  %10813 = vst [vmem:[#allocation100_spill] sm:$0xff] %v7030_v48  ;;  %v7033_v30 = vadd.s32 112, %v6042_v19  ;;  %v7037_v5 = vadd.f32 %v6967_v35, %v548_v39  ;;  %v10818_v39 = vrot.slane %v6681_v49, 1 }
 0x156   : > { %v7021_v8 = vmul.f32 %v5788_v37, %v10810_v54  ;;  %5811 = vpow2.f32 %v618_v40  ;;  %v10819_v9 = vrot.slane %v6681_v49, 7  ;;  %v10823_v56 = vrot.slane %v6681_v49, 6 }
 0x157   : > { %10814 = vst [vmem:[#allocation101_spill] sm:$0xff] %v7037_v5  ;;  %v5790_v37 = vpop.eup %5789  ;;  %v10832_v55 = vrot.slane %v6685_v45, 1  ;;  %v10860_v10 = vrot.slane %v6959_v53, 1  ;;  %v10866_v58 = vrot.slane %v6959_v53, 2  ;;  %vm2537_vm10 = vcmask 1040384  }
 0x158   : > { %v10398_v54 = vrot.slane %v7021_v8, 1  ;;  %v10406_v50 = vrot.slane %v7021_v8, 7  ;;  %v5792_v6 = vpop.eup %5791  ;;  %v7044_v48 = vmul.f32 %v5790_v37, %v10815_v36  ;;  %v10820_v40 = vrot.slane %v7021_v8, 2 }
 0x159   : > { %v5794_v35 = vpop.eup %5793  ;;  %v10821_v37 = vrot.slane %v6681_v49, 2  ;;  %v10822_v14 = vrot.slane %v7021_v8, 6  ;;  %vm2488_vm15 = vcmask 15360  }
 0x15a   : > { %10816 = vst [vmem:[#allocation35_spill] sm:$0xff] %v7044_v48  ;;  %v1754_v41 = vsel %vm1730_vm6, %v10818_v39, %v10398_v54  ;;  %v1883_v36 = vsel %vm1859_vm7, %v10819_v9, %v10406_v50  ;;  %v5796_v54 = vpop.eup %5795  ;;  %v10826_v9 = vld [vmem:[#allocation29_spill] sm:$0xff] }
 0x15b   : > { %v2012_v25 = vsel %vm1988_vm8, %v10821_v37, %v10820_v40  ;;  %v2141_v39 = vsel %vm2117_vm9, %v10823_v56, %v10822_v14  ;;  %v1770_v4 = vadd.f32 %v1754_v41, %v10824_v51  ;;  %v7076_v42 = vadd.f32 %v1883_v36, %v10825_v34  ;;  %v7082_v62 = vpop.eup %5797  ;;  %v10828_v36 = vld [vmem:[#allocation39_spill] sm:$0xff] }
 0x15c   : > { %v2028_v50 = vadd.f32 %v2012_v25, %v10826_v9  ;;  %v7080_v44 = vadd.f32 %v2141_v39, %v10827_v61  ;;  %v7088_v14 = vpop.eup %5799  ;;  %v7092_v34 = vmul.f32 %v5792_v6, %v10828_v36  ;;  %v10829_v25 = vld [vmem:[#allocation40_spill] sm:$0xff]  ;;  %v10830_v61 = vld [vmem:[#allocation41_spill] sm:$0xff]  ;;  %v10831_v37 = vrot.slane %v7044_v48, 1 }
 0x15d   : > { %v1802_v41 = vmax.f32 %v6681_v49, %v1770_v4  ;;  %v7095_v39 = vmul.f32 %v5794_v35, %v10829_v25  ;;  %v7098_v9 = vmul.f32 %v5796_v54, %v10830_v61  ;;  %v5802_v40 = vpop.eup %5801  ;;  %v10833_v51 = vrot.slane %v7044_v48, 7  ;;  %v10841_v49 = vld [vmem:[#allocation37_spill] sm:$0xff] }
 0x15e   : > { %v1738_v56 = vsel %vm1730_vm6, %v10832_v55, %v10831_v37  ;;  %v10834_v4 = vrot.slane %v6685_v45, 7  ;;  %v10835_v35 = vrot.slane %v7044_v48, 2  ;;  %v10836_v61 = vrot.slane %v6685_v45, 2 }
 0x15f   : > { %v10837_v36 = vrot.slane %v7044_v48, 6  ;;  %v10838_v25 = vrot.slane %v6685_v45, 6  ;;  %v5804_v37 = vpop.eup %5803  ;;  %v1931_v46 = vmax.f32 %v1802_v41, %v6721_v26  ;;  %v1786_v17 = vadd.f32 %v1738_v56, %v10839_v21 }
 0x160   : > { %v1867_v6 = vsel %vm1859_vm7, %v10834_v4, %v10833_v51  ;;  %v1996_v54 = vsel %vm1988_vm8, %v10836_v61, %v10835_v35  ;;  %v10840_v51 = vld [vmem:[#allocation36_spill] sm:$0xff]  ;;  %v7130_v11 = vpop.eup %5805  ;;  %v10842_v35 = vld [vmem:[#allocation38_spill] sm:$0xff]  ;;  %v10425_v59 = vrot.slane %v7092_v34, 1  ;;  %v10427_v41 = vrot.slane %v7095_v39, 7 }
 0x161   : > { %v2125_v55 = vsel %vm2117_vm9, %v10838_v25, %v10837_v36  ;;  %v7127_v4 = vadd.f32 %v1867_v6, %v10840_v51  ;;  %v2044_v13 = vadd.f32 %v1996_v54, %v10841_v49  ;;  %v7138_v25 = vpop.eup %5807  ;;  %v2060_v26 = vmax.f32 %v1931_v46, %v2028_v50 }
 0x162   : > { %v7133_v61 = vadd.f32 %v2125_v55, %v10842_v35  ;;  %v1818_v56 = vmax.f32 %v6685_v45, %v1786_v17  ;;  %v7143_v54 = vpop.eup %5809  ;;  %v10843_v55 = vrot.slane %v6959_v53, 1  ;;  %v10844_v36 = vrot.slane %v7092_v34, 7 }
 0x163   : > { %v10845_v35 = vrot.slane %v6959_v53, 7  ;;  %v10846_v46 = vrot.slane %v7092_v34, 2  ;;  %v10847_v50 = vrot.slane %v6959_v53, 2  ;;  %v7167_v49 = vmax.f32 %v2060_v26, %v6738_v1 }
 0x164   : > { %v1751_v23 = vsel %vm1730_vm6, %v10843_v55, %v10425_v59  ;;  %v1947_v55 = vmax.f32 %v1818_v56, %v6756_v29  ;;  %v10849_v51 = vrot.slane %v7092_v34, 6  ;;  %v10852_v21 = vrot.slane %v7095_v39, 1 }
 0x165   : > { %v7157_v17 = vsel %vm1859_vm7, %v10845_v35, %v10844_v36  ;;  %v2009_v6 = vsel %vm1988_vm8, %v10847_v50, %v10846_v46  ;;  %10848 = vst [vmem:[#allocation39_spill] sm:$0xff] %v7167_v49  ;;  %v1805_v59 = vmax.f32 %v6959_v53, %v1751_v23  ;;  %v10850_v35 = vrot.slane %v6959_v53, 6 }
 0x166   : > { %v10853_v46 = vrot.slane %v6980_v52, 1  ;;  %v10854_v29 = vrot.slane %v6980_v52, 7  ;;  %v10431_v26 = vrot.slane %v7095_v39, 2  ;;  %v2076_v56 = vmax.f32 %v1947_v55, %v2044_v13 }
 0x167   : > { %v7177_v36 = vsel %vm2117_vm9, %v10850_v35, %v10849_v51  ;;  %v10433_v51 = vrot.slane %v7095_v39, 6  ;;  %v1707_v35 = vrot.slane %v7098_v9, 1  ;;  %v1836_v49 = vrot.slane %v7098_v9, 7 }
 0x168   : > { %10851 = vst [vmem:[#allocation40_spill] sm:$0xff] %v7177_v36  ;;  %v1735_v1 = vsel %vm1730_vm6, %v10853_v46, %v10852_v21  ;;  %v7191_v23 = vsel %vm1859_vm7, %v10854_v29, %v10427_v41  ;;  %v7198_v21 = vpop.eup %5811  ;;  %v10856_v46 = vrot.slane %v6980_v52, 2  ;;  %v10857_v13 = vrot.slane %v6980_v52, 6 }
 0x169   : > { %10855 = vst [vmem:[#allocation41_spill] sm:$0xff] %v7191_v23  ;;  %v1821_v50 = vmax.f32 %v6980_v52, %v1735_v1  ;;  %v1965_v1 = vrot.slane %v7098_v9, 2  ;;  %v2094_v41 = vrot.slane %v7098_v9, 6  ;;  %v7219_v45 = vmax.f32 %v2076_v56, %v6778_v16  ;;  %v10871_v23 = vld [vmem:[#allocation54_spill] sm:$0xff] }
 0x16a   : > { %v7206_v29 = vsel %vm1988_vm8, %v10856_v46, %v10431_v26  ;;  %v7214_v55 = vsel %vm2117_vm9, %v10857_v13, %v10433_v51  ;;  %v1752_v46 = vsel %vm1730_vm6, %v1707_v35, %v10860_v10  ;;  %v10861_v26 = vrot.slane %v7021_v8, 1  ;;  %v10865_v10 = vld [vmem:[#allocation49_spill] sm:$0xff] }
 0x16b   : > { %10858 = vst [vmem:[#allocation103_spill] sm:$0xff] %v7214_v55  ;;  %10859 = vst [vmem:[#allocation104_spill] sm:$0xff] %v7219_v45  ;;  %v10862_v13 = vrot.slane %v6959_v53, 7  ;;  %v10863_v55 = vld [vmem:[#allocation48_spill] sm:$0xff]  ;;  %v10864_v56 = vrot.slane %v7021_v8, 7 }
 0x16c   : > { %v1753_v32 = vsel %vm1730_vm6, %v10861_v26, %v1707_v35  ;;  %v1772_v24 = vadd.f32 %v1752_v46, %v10863_v55  ;;  %v2010_v26 = vsel %vm1988_vm8, %v1965_v1, %v10866_v58  ;;  %v10867_v35 = vrot.slane %v7021_v8, 2 }
 0x16d   : > { %v1881_v51 = vsel %vm1859_vm7, %v1836_v49, %v10862_v13  ;;  %v1803_v16 = vmax.f32 %v7021_v8, %v1753_v32  ;;  %v1882_v45 = vsel %vm1859_vm7, %v10864_v56, %v1836_v49  ;;  %v10868_v46 = vrot.slane %v6959_v53, 6 }
 0x16e   : > { %v1902_v20 = vadd.f32 %v1881_v51, %v10865_v10  ;;  %v2011_v13 = vsel %vm1988_vm8, %v10867_v35, %v1965_v1  ;;  %v10869_v55 = vrot.slane %v7021_v8, 6  ;;  %v1804_v51 = vmax.f32 %v7098_v9, %v1772_v24  ;;  %v10870_v10 = vld [vmem:[#allocation51_spill] sm:$0xff]  ;;  %v10872_v1 = vld [vmem:[#allocation45_spill] sm:$0xff] }
 0x16f   : > { %v2139_v32 = vsel %vm2117_vm9, %v2094_v41, %v10868_v46  ;;  %v1932_v56 = vmax.f32 %v1803_v16, %v7076_v42  ;;  %v2030_v5 = vadd.f32 %v2010_v26, %v10870_v10  ;;  %v7262_v35 = vmul.f32 %v7082_v62, %v10872_v1 }
 0x170   : > { %v2140_v49 = vsel %vm2117_vm9, %v10869_v55, %v2094_v41  ;;  %v1934_v58 = vmax.f32 %v1805_v59, %v1902_v20  ;;  %v2160_v36 = vadd.f32 %v2139_v32, %v10871_v23  ;;  %v7266_v46 = vmul.f32 %v7088_v14, %v10781_v27  ;;  %v10941_v23 = vld [vmem:[#allocation50_spill] sm:$0xff] }
 0x171   : > { %10873 = vst [vmem:[#allocation45_spill] sm:$0xff] %v7262_v35  ;;  %v7269_v53 = vmul.f32 %v5802_v40, %v10786_v18  ;;  %v1933_v41 = vmax.f32 %v1804_v51, %v1882_v45  ;;  %v2061_v24 = vmax.f32 %v1932_v56, %v2011_v13  ;;  %v7272_v42 = vmul.f32 %v5804_v37, %v6923_v0  ;;  %v10925_v45 = vld [vmem:[#allocation79_spill] sm:$0xff] }
 0x172   : > { %v2063_v55 = vmax.f32 %v1934_v58, %v2009_v6  ;;  %v1723_v59 = vrot.slane %v7262_v35, 1  ;;  %v1852_v20 = vrot.slane %v7262_v35, 7  ;;  %v1981_v62 = vrot.slane %v7262_v35, 2 }
 0x173   : > { %v2110_v16 = vrot.slane %v7262_v35, 6  ;;  %v2062_v26 = vmax.f32 %v1933_v41, %v2030_v5  ;;  %v7279_v27 = vmax.f32 %v2061_v24, %v7080_v44  ;;  %v10874_v40 = vrot.slane %v6980_v52, 1 }
 0x174   : > { %v7281_v18 = vmax.f32 %v2063_v55, %v2160_v36  ;;  %v10875_v14 = vrot.slane %v7044_v48, 1  ;;  %v10876_v6 = vrot.slane %v6980_v52, 7  ;;  %v10877_v5 = vrot.slane %v7044_v48, 7 }
 0x175   : > { %v1736_v0 = vsel %vm1730_vm6, %v1723_v59, %v10874_v40  ;;  %v7300_v13 = vmax.f32 %v2062_v26, %v2140_v49  ;;  %v10878_v58 = vrot.slane %v6980_v52, 2  ;;  %v10879_v41 = vrot.slane %v7044_v48, 2 }
 0x176   : > { %v1737_v37 = vsel %vm1730_vm6, %v10875_v14, %v1723_v59  ;;  %v1865_v44 = vsel %vm1859_vm7, %v1852_v20, %v10876_v6  ;;  %v1866_v36 = vsel %vm1859_vm7, %v10877_v5, %v1852_v20  ;;  %v1788_v32 = vadd.f32 %v1736_v0, %v6892_v31 }
 0x177   : > { %v1819_v51 = vmax.f32 %v7044_v48, %v1737_v37  ;;  %v1918_v56 = vadd.f32 %v1865_v44, %v6905_v15  ;;  %v1994_v1 = vsel %vm1988_vm8, %v1981_v62, %v10878_v58  ;;  %v1995_v24 = vsel %vm1988_vm8, %v10879_v41, %v1981_v62  ;;  %v10923_v44 = vld [vmem:[#allocation81_spill] sm:$0xff]  ;;  %v10927_v15 = vld [vmem:[#allocation60_spill] sm:$0xff] }
 0x178   : > { %v10880_v55 = vrot.slane %v6980_v52, 6  ;;  %v10881_v59 = vrot.slane %v7044_v48, 6  ;;  %v1820_v26 = vmax.f32 %v7262_v35, %v1788_v32  ;;  %v2046_v14 = vadd.f32 %v1994_v1, %v6911_v63  ;;  %v10924_v62 = vld [vmem:[#allocation65_spill] sm:$0xff]  ;;  %v10952_v48 = vld [vmem:[#allocation95_spill] sm:$0xff] }
 0x179   : > { %v1948_v40 = vmax.f32 %v1819_v51, %v7127_v4  ;;  %v1950_v0 = vmax.f32 %v1821_v50, %v1918_v56  ;;  %v10882_v32 = vand.u32 15, %v7012_v38  ;;  %v10449_v1 = vrot.slane %v7272_v42, 1  ;;  %v1697_v4 = vld [vmem:[%s10285_s3] sm:$0x1]  ;;  %v10913_v51 = vld [vmem:[#allocation63_spill] sm:$0xff] }
 0x17a   : > { %v2123_v49 = vsel %vm2117_vm9, %v2110_v16, %v10880_v55  ;;  %v2124_v20 = vsel %vm2117_vm9, %v10881_v59, %v2110_v16  ;;  %v1949_v5 = vmax.f32 %v1820_v26, %v1866_v36  ;;  %v10444_v55 = vrot.slane %v7272_v42, 7  ;;  %v7469_v16 = vld [vmem:[%s10285_s3 + $0x3] sm:$0x1]  ;;  %5667 = vmatprep.subr.msk.bf16.mxu0 %vm2537_vm10, %v1697_v4 }
 0x17b   : > { %v2176_v37 = vadd.f32 %v2123_v49, %v6939_v12  ;;  %v2077_v58 = vmax.f32 %v1948_v40, %v1995_v24  ;;  %v2079_v41 = vmax.f32 %v1950_v0, %v7206_v29  ;;  %vm7332_vm2 = vcmp.lt.s32.totalorder %v10882_v32, 15 }
 0x17c   : > { %v2078_v36 = vmax.f32 %v1949_v5, %v2046_v14  ;;  %v10887_v49 = vrot.slane %v7092_v34, 1  ;;  %v10443_v26 = vrot.slane %v7272_v42, 2  ;;  %v10442_v40 = vrot.slane %v7272_v42, 6 }
 0x17d   : > { %v7341_v24 = vmax.f32 %v2077_v58, %v7133_v61  ;;  %v7343_v29 = vmax.f32 %v2079_v41, %v2176_v37  ;;  %v7356_v0 = vmul.f32 %v7143_v54, %v6931_v22  ;;  %v10890_v37 = vrot.slane %v7092_v34, 7 }
 0x17e   : > { %v1750_v59 = vsel %vm1730_vm6, %v10887_v49, %v10449_v1  ;;  %v7358_v61 = vmax.f32 %v2078_v36, %v2124_v20  ;;  %v671_v58 = vadd.f32 1.0, %v7130_v11  ;;  %v10891_v22 = vrot.slane %v7092_v34, 2 }
 0x17f   : > { %10885 = vst [vmem:[#allocation105_spill] sm:$0xff] %v7341_v24  ;;  %10886 = vst [vmem:[#allocation106_spill] sm:$0xff] %v7343_v29  ;;  %v1774_v14 = vadd.f32 %v1750_v59, %v6942_v3  ;;  %v1879_v5 = vsel %vm1859_vm7, %v10890_v37, %v10444_v55  ;;  %v10892_v20 = vrot.slane %v7092_v34, 6  ;;  %v10446_v36 = vrot.slane %v7356_v0, 1 }
 0x180   : > { %10888 = vst [vmem:[#allocation107_spill] sm:$0xff] %v7356_v0  ;;  %10889 = vst [vmem:[#allocation108_spill] sm:$0xff] %v7358_v61  ;;  %v7369_v41 = vadd.f32 %v1879_v5, %v6945_v33  ;;  %v2008_v54 = vsel %vm1988_vm8, %v10891_v22, %v10443_v26  ;;  %v10445_v37 = vrot.slane %v7356_v0, 7  ;;  %v10893_v5 = vrot.slane %v7095_v39, 1  ;;  %v10937_v33 = vld [vmem:[#allocation74_spill] sm:$0xff] }
 0x181   : > { %v2137_v32 = vsel %vm2117_vm9, %v10892_v20, %v10442_v40  ;;  %v1806_v11 = vmax.f32 %v7092_v34, %v1774_v14  ;;  %v2032_v49 = vadd.f32 %v2008_v54, %v6948_v57  ;;  %v10447_v20 = vrot.slane %v7356_v0, 2  ;;  %v10936_v57 = vld [vmem:[#allocation80_spill] sm:$0xff] }
 0x182   : > { %v7387_v59 = vadd.f32 %v2137_v32, %v6951_v47  ;;  %v1734_v22 = vsel %vm1730_vm6, %v10893_v5, %v10446_v36  ;;  %v10448_v40 = vrot.slane %v7356_v0, 6  ;;  %5813 = vrcp.f32 %v671_v58  ;;  %v10934_v47 = vld [vmem:[#allocation84_spill] sm:$0xff]  ;;  %v10958_v0 = vld [vmem:[#allocation90_spill] sm:$0xff] }
 0x183   : > { %v1935_v14 = vmax.f32 %v1806_v11, %v7157_v17  ;;  %v1790_v54 = vadd.f32 %v1734_v22, %v6962_v60  ;;  %v10894_v32 = vrot.slane %v7095_v39, 7  ;;  %v687_v55 = vadd.f32 1.0, %v7138_v25 }
 0x184   : > { %v10896_v58 = vrot.slane %v7095_v39, 2  ;;  %v10897_v11 = vrot.slane %v7095_v39, 6  ;;  %v1684_v12 = vpack.c.bf16 %v10925_v45, %v10924_v62  ;;  %v10931_v62 = vld [vmem:[#allocation56_spill] sm:$0xff]  ;;  %v10944_v61 = vrot.slane %v10927_v15, 1 }
 0x185   : > { %v1863_v26 = vsel %vm1859_vm7, %v10894_v32, %v10445_v37  ;;  %v669_v32 = vadd.f32 1.0, %v7198_v21  ;;  %v2064_v25 = vmax.f32 %v1935_v14, %v2032_v49  ;;  %5815 = vrcp.f32 %v687_v55  ;;  %v10902_v21 = vld [vmem:[#allocation40_spill] sm:$0xff]  ;;  %v10904_v14 = vld [vmem:[#allocation41_spill] sm:$0xff] }
 0x186   : > { %v7408_v5 = vadd.f32 %v1863_v26, %v6976_v2  ;;  %v1992_v17 = vsel %vm1988_vm8, %v10896_v58, %v10447_v20  ;;  %v2121_v22 = vsel %vm2117_vm9, %v10897_v11, %v10448_v40  ;;  %v1822_v26 = vmax.f32 %v7095_v39, %v1790_v54  ;;  %v10910_v40 = vld [vmem:[#allocation82_spill] sm:$0xff]  ;;  %v10943_v2 = vld [vmem:[#allocation72_spill] sm:$0xff] }
 0x187   : > { %v2048_v37 = vadd.f32 %v1992_v17, %v6983_v28  ;;  %v7426_v36 = vadd.f32 %v2121_v22, %v6991_v7  ;;  %v7431_v58 = vsel %vm7332_vm2, 0.0, %v10771_v43  ;;  %v10900_v20 = vand.u32 15, %v7033_v30  ;;  %v10942_v28 = vld [vmem:[#allocation39_spill] sm:$0xff] }
 0x188   : > { %10895 = vst [vmem:[#allocation109_spill] sm:$0xff] %v7408_v5  ;;  %10899 = vst [vmem:[#allocation111_spill] sm:$0xff] %v7431_v58  ;;  %v10901_v11 = vand.u32 15, %v7012_v38  ;;  %v7438_v49 = vmax.f32 %v2064_v25, %v10902_v21  ;;  %v1951_v54 = vmax.f32 %v1822_v26, %v10904_v14  ;;  %5817 = vrcp.f32 %v669_v32  ;;  %v10907_v38 = vld [vmem:[#allocation101_spill] sm:$0xff]  ;;  %v5335_v32 = vld [vmem:[%s10285_s3 + $0x1] sm:$0x1] }
 0x189   : > { %10898 = vst [vmem:[#allocation110_spill] sm:$0xff] %v7426_v36  ;;  %vm1247_vm3 = vcmp.ge.s32.totalorder %v10900_v20, 1  ;;  %vm1503_vm5 = vcmp.ge.s32.totalorder %v10900_v20, 2  ;;  %v589_v22 = vsub.f32 0.0, %v10907_v38  ;;  %v783_v25 = vadd.s32 240, %v6042_v19  ;;  %v10909_v21 = vld [vmem:[#allocation102_spill] sm:$0xff]  ;;  %5666 = vmatprep.subr.msk.bf16.mxu1 %vm2537_vm10, %v5335_v32 }
 0x18a   : > { %vm1438_vm4 = vcmp.lt.s32.totalorder %v10901_v11, 14  ;;  %10903 = vst [vmem:[#allocation40_spill] sm:$0xff] %v7438_v49  ;;  %v7442_v17 = vsel %vm1247_vm3, 0.0, %v10771_v43  ;;  %v2080_v26 = vmax.f32 %v1951_v54, %v2048_v37  ;;  %v7458_v11 = vsel %vm1503_vm5, 0.0, %v10771_v43  ;;  %v10912_v20 = vld [vmem:[#allocation59_spill] sm:$0xff] }
 0x18b   : > { %10905 = vst [vmem:[#allocation41_spill] sm:$0xff] %v7442_v17  ;;  %v7448_v55 = vsel %vm1438_vm4, 0.0, %v10771_v43  ;;  %10908 = vst [vmem:[#allocation101_spill] sm:$0xff] %v7458_v11  ;;  %v992_v14 = vand.u32 15, %v10909_v21  ;;  %v7462_v1 = vadd.f32 -inf, %v10910_v40  ;;  %v999_v30 = vand.u32 15, %v783_v25 }
 0x18c   : > { %10906 = vst [vmem:[#allocation112_spill] sm:$0xff] %v7448_v55  ;;  %v650_v56 = vmul.f32 1.442695, %v589_v22  ;;  %v1681_v50 = vpack.c.bf16 %v10913_v51, %v10912_v20  ;;  %v10914_v37 = vld [vmem:[#allocation103_spill] sm:$0xff]  ;;  %v2751_v21 = vsel %vm2537_vm10, %v1697_v4, 0  ;;  %v10919_v4 = vld [vmem:[#allocation53_spill] sm:$0xff] }
 0x18d   : > { %10911 = vst [vmem:[#allocation102_spill] sm:$0xff] %v7462_v1  ;;  %v7472_v54 = vmax.f32 %v2080_v26, %v10914_v37  ;;  %vm1198_vm11 = vcmp.lt.s32.totalorder %v992_v14, 15  ;;  %vm1454_vm12 = vcmp.lt.s32.totalorder %v992_v14, 14  ;;  %vm1263_vm13 = vcmp.ge.s32.totalorder %v999_v30, 1  ;;  %5561 = vmatpush3.bf16.msra.mxu0 %v2751_v21  ;;  %v5368_v25 = vld [vmem:[%s10285_s3 + $0x2] sm:$0x1] }
 0x18e   : > { %5819 = vpow2.f32 %v650_v56  ;;  %v7478_v22 = vsel %vm1198_vm11, 0.0, %v10771_v43  ;;  %v7481_v51 = vsel %vm1454_vm12, 0.0, %v10771_v43  ;;  %v7487_v26 = vsel %vm1263_vm13, 0.0, %v10771_v43  ;;  %v10920_v14 = vld [vmem:[#allocation61_spill] sm:$0xff]  ;;  %5669 = vmatprep.subr.msk.bf16.mxu0 %vm2537_vm10, %v7469_v16  ;;  %5562 = vmatprep.mubr.msk.bf16.mxu0 %vm2488_vm15, %v1681_v50  ;;  %v10922_v21 = vld [vmem:[#allocation67_spill] sm:$0xff]  ;;  %v10928_v50 = vld [vmem:[#allocation64_spill] sm:$0xff] }
 0x18f   : > { %10915 = vst [vmem:[#allocation82_spill] sm:$0xff] %v7472_v54  ;;  %10916 = vst [vmem:[#allocation59_spill] sm:$0xff] %v7478_v22  ;;  %vm1519_vm14 = vcmp.ge.s32.totalorder %v999_v30, 2  ;;  %v1682_v56 = vpack.c.bf16 %v10920_v14, %v10919_v4  ;;  %v1683_v6 = vpack.c.bf16 %v10923_v44, %v10922_v21  ;;  %v2539_v30 = vsel %vm2537_vm10, %v5335_v32, 0  ;;  %v5814_v63 = vpop.eup %5813  ;;  %v10926_v14 = vld [vmem:[#allocation32_spill] sm:$0xff]  ;;  %v10930_v21 = vld [vmem:[#allocation55_spill] sm:$0xff] }
 0x190   : > { %10917 = vst [vmem:[#allocation63_spill] sm:$0xff] %v7481_v51  ;;  %10918 = vst [vmem:[#allocation103_spill] sm:$0xff] %v7487_v26  ;;  %v7494_v37 = vsel %vm1519_vm14, 0.0, %v10771_v43  ;;  %5527 = vmatpush3.bf16.msra.mxu1 %v2539_v30  ;;  %v1685_v4 = vpack.c.bf16 %v7098_v9, %v7021_v8  ;;  %v7510_v44 = vsel %vm2537_vm10, %v5368_v25, 0  ;;  %v7513_v45 = vmul.f32 %v5814_v63, %v10930_v21  ;;  %v10932_v32 = vld [vmem:[#allocation62_spill] sm:$0xff]  ;;  %v10933_v30 = vld [vmem:[#allocation68_spill] sm:$0xff] }
 0x191   : > { %10921 = vst [vmem:[#allocation53_spill] sm:$0xff] %v7494_v37  ;;  %5563 = vmatmul.mubr.msk.bf16.vlgmr.msra.gmra.mxu0 %vm2488_vm15, %v1682_v56  ;;  %10929 = vst [vmem:[#allocation61_spill] sm:$0xff] %v7510_v44  ;;  %v10938_v63 = vld [vmem:[#allocation85_spill] sm:$0xff]  ;;  %5668 = vmatprep.subr.msk.bf16.mxu1 %vm2537_vm10, %v5368_v25  ;;  %v10940_v56 = vld [vmem:[#allocation52_spill] sm:$0xff]  ;;  %v10945_v54 = vrot.slane %v7266_v46, 1  ;;  %v10951_v22 = vrot.slane %v7266_v46, 2 }
 0x192   : > { %5566 = vmatprep.mubr.msk.bf16.mxu0 %vm2488_vm15, %v1683_v6  ;;  %v10939_v21 = vmax.f32 %v10910_v40, %v10938_v63  ;;  %v2250_v8 = vmax.f32 %v10941_v23, %v10940_v56  ;;  %v1713_v10 = vrot.slane %v7513_v45, 1  ;;  %v1842_v43 = vrot.slane %v7513_v45, 7  ;;  %v5816_v3 = vpop.eup %5815  ;;  %v10948_v37 = vld [vmem:[#allocation93_spill] sm:$0xff]  ;;  %v10949_v51 = vld [vmem:[#allocation94_spill] sm:$0xff] }
 0x193   : > { %v1971_v31 = vrot.slane %v7513_v45, 2  ;;  %v2100_v44 = vrot.slane %v7513_v45, 6  ;;  %v2251_v25 = vmax.f32 %v10938_v63, %v10942_v28 }
 0x194   : > { %v7530_v6 = vmax.f32 %v10939_v21, %v10937_v33  ;;  %v7546_v60 = vmax.f32 %v2250_v8, %v10943_v2  ;;  %v1746_v24 = vsel %vm1730_vm6, %v1713_v10, %v10944_v61  ;;  %v7556_v7 = vsel %vm1730_vm6, %v10945_v54, %v1713_v10 }
 0x195   : > { %v5818_v1 = vpop.eup %5817  ;;  %v10946_v21 = vrot.slane %v10927_v15, 7  ;;  %v10947_v8 = vrot.slane %v7266_v46, 7  ;;  %v1778_v5 = vadd.f32 %v1746_v24, %v10948_v37  ;;  %v1809_v61 = vmax.f32 %v7266_v46, %v7556_v7 }
 0x196   : > { %v10950_v10 = vrot.slane %v10927_v15, 2  ;;  %v10953_v24 = vrot.slane %v10927_v15, 6 }
 0x197   : > { %v1875_v29 = vsel %vm1859_vm7, %v1842_v43, %v10946_v21  ;;  %v1876_v36 = vsel %vm1859_vm7, %v10947_v8, %v1842_v43  ;;  %v7578_v21 = vsel %vm1988_vm8, %v10951_v22, %v1971_v31 }
 0x198   : > { %v1908_v26 = vadd.f32 %v1875_v29, %v10949_v51  ;;  %v2004_v54 = vsel %vm1988_vm8, %v1971_v31, %v10950_v10  ;;  %v2133_v7 = vsel %vm2117_vm9, %v2100_v44, %v10953_v24  ;;  %v10954_v29 = vrot.slane %v7266_v46, 6  ;;  %v10955_v51 = vld [vmem:[#allocation71_spill] sm:$0xff]  ;;  %v10957_v31 = vld [vmem:[#allocation96_spill] sm:$0xff] }
 0x199   : > { %v2036_v43 = vadd.f32 %v2004_v54, %v10952_v48  ;;  %v1810_v10 = vmax.f32 %v7513_v45, %v1778_v5  ;;  %v10956_v37 = vmax.f32 %v10927_v15, %v10955_v51  ;;  %v2166_v22 = vadd.f32 %v2133_v7, %v10957_v31  ;;  %5567 = vmatmul.mubr.msk.bf16.gmra.mxu0 %vm2488_vm15, %v1684_v12  ;;  %v10959_v48 = vld [vmem:[#allocation97_spill] sm:$0xff] }
 0x19a   : > { %v2134_v8 = vsel %vm2117_vm9, %v10954_v29, %v2100_v44  ;;  %v7595_v54 = vmul.f32 %v5816_v3, %v10958_v0  ;;  %v7599_v24 = vmul.f32 %v5818_v1, %v10959_v48  ;;  %5570 = vmatprep.mubr.msk.bf16.mxu0 %vm2488_vm15, %v1685_v4  ;;  %v7603_v44 = vmax.f32 %v2251_v25, %v10910_v40  ;;  %v10960_v3 = vld [vmem:[#allocation73_spill] sm:$0xff] }
 0x19b   : > { %v1940_v35 = vmax.f32 %v10956_v37, %v1908_v26  ;;  %v4779_v51 = vsel %vm2537_vm10, %v7469_v16, 0  ;;  %v5820_v26 = vpop.eup %5819  ;;  %v1939_v37 = vmax.f32 %v1810_v10, %v1876_v36  ;;  %v10962_v16 = vrot.slane %v7269_v53, 1 }
 0x19c   : > { %v1729_v12 = vrot.slane %v7595_v54, 1  ;;  %v1858_v48 = vrot.slane %v7595_v54, 7  ;;  %5629 = vmatpush3.bf16.msra.mxu0 %v4779_v51  ;;  %v1987_v1 = vrot.slane %v7595_v54, 2  ;;  %v2116_v4 = vrot.slane %v7595_v54, 6  ;;  %v10965_v51 = vld [vmem:[#allocation34_spill] sm:$0xff] }
 0x19d   : > { %v2069_v0 = vmax.f32 %v1940_v35, %v10960_v3  ;;  %v1711_v25 = vrot.slane %v7599_v24, 1  ;;  %v1840_v7 = vrot.slane %v7599_v24, 7  ;;  %v2068_v29 = vmax.f32 %v1939_v37, %v2036_v43 }
 0x19e   : > { %v7622_v35 = vsel %vm1730_vm6, %v10962_v16, %v1729_v12  ;;  %v10964_v36 = vrot.slane %v10912_v20, 1  ;;  %v10966_v43 = vrot.slane %v7269_v53, 7  ;;  %v10967_v37 = vrot.slane %v10912_v20, 7 }
 0x19f   : > { %v7616_v5 = vmax.f32 %v2069_v0, %v2166_v22  ;;  %10963 = vst [vmem:[#allocation81_spill] sm:$0xff] %v7622_v35  ;;  %v7639_v16 = vmax.f32 %v2068_v29, %v2134_v8  ;;  %v10973_v8 = vrot.slane %v7269_v53, 6  ;;  %v10974_v29 = vrot.slane %v10912_v20, 6 }
 0x1a0   : > { %v1762_v10 = vsel %vm1730_vm6, %v1729_v12, %v10964_v36  ;;  %v1860_v22 = vsel %vm1859_vm7, %v10966_v43, %v1858_v48  ;;  %v1891_v0 = vsel %vm1859_vm7, %v1858_v48, %v10967_v37  ;;  %v10970_v12 = vrot.slane %v7269_v53, 2 }
 0x1a1   : > { %10961 = vst [vmem:[#allocation67_spill] sm:$0xff] %v7616_v5  ;;  %v1794_v3 = vadd.f32 %v1762_v10, %v10965_v51  ;;  %10968 = vst [vmem:[#allocation65_spill] sm:$0xff] %v7639_v16  ;;  %v10969_v5 = vld [vmem:[#allocation98_spill] sm:$0xff]  ;;  %v10971_v10 = vrot.slane %v10912_v20, 2  ;;  %v10972_v51 = vld [vmem:[#allocation100_spill] sm:$0xff]  ;;  %v2118_v48 = vsel %vm2117_vm9, %v10973_v8, %v2116_v4  ;;  %v2149_v37 = vsel %vm2117_vm9, %v2116_v4, %v10974_v29 }
 0x1a2   : > { %v1892_v9 = vadd.f32 %v1891_v0, %v10969_v5  ;;  %v7646_v36 = vsel %vm1988_vm8, %v10970_v12, %v1987_v1  ;;  %v10975_v0 = vld [vmem:[#allocation69_spill] sm:$0xff]  ;;  %v10977_v5 = vld [vmem:[#allocation99_spill] sm:$0xff]  ;;  %v10981_v29 = vrot.slane %v7266_v46, 7 }
 0x1a3   : > { %v2020_v43 = vsel %vm1988_vm8, %v1987_v1, %v10971_v10  ;;  %v1826_v31 = vmax.f32 %v7595_v54, %v1794_v3  ;;  %v10976_v12 = vmax.f32 %v10912_v20, %v10975_v0  ;;  %v2150_v1 = vadd.f32 %v2149_v37, %v10977_v5  ;;  %v10982_v0 = vld [vmem:[#allocation70_spill] sm:$0xff] }
 0x1a4   : > { %v2052_v35 = vadd.f32 %v2020_v43, %v10972_v51  ;;  %v10978_v3 = vrot.slane %v7266_v46, 1  ;;  %v10979_v43 = vrot.slane %v7272_v42, 1  ;;  %v10980_v51 = vpack.c.bf16 %v7092_v34, %v10926_v14 }
 0x1a5   : > { %v1924_v16 = vmax.f32 %v10976_v12, %v1892_v9  ;;  %v1955_v4 = vmax.f32 %v1826_v31, %v1860_v22  ;;  %v1877_v37 = vsel %vm1859_vm7, %v1840_v7, %v10981_v29  ;;  %v1969_v14 = vrot.slane %v7599_v24, 2 }
 0x1a6   : > { %v1748_v10 = vsel %vm1730_vm6, %v1711_v25, %v10978_v3  ;;  %v1749_v8 = vsel %vm1730_vm6, %v10979_v43, %v1711_v25  ;;  %5571 = vmatmul.mubr.msk.bf16.gmra.mxu0 %vm2488_vm15, %v10980_v51  ;;  %v10983_v3 = vrot.slane %v7272_v42, 7  ;;  %v1906_v34 = vadd.f32 %v1877_v37, %v7442_v17 }
 0x1a7   : > { %v1776_v20 = vadd.f32 %v1748_v10, %v7431_v58  ;;  %v1807_v9 = vmax.f32 %v7272_v42, %v1749_v8  ;;  %v2053_v12 = vmax.f32 %v1924_v16, %v10982_v0  ;;  %v2084_v31 = vmax.f32 %v1955_v4, %v2052_v35  ;;  %v11022_v58 = vld [vmem:[#allocation109_spill] sm:$0xff] }
 0x1a8   : > { %v1878_v25 = vsel %vm1859_vm7, %v10983_v3, %v1840_v7  ;;  %v2098_v10 = vrot.slane %v7599_v24, 6  ;;  %v1938_v8 = vmax.f32 %v1809_v61, %v1906_v34  ;;  %v10984_v16 = vrot.slane %v7266_v46, 2  ;;  %v10988_v3 = vld [vmem:[#allocation76_spill] sm:$0xff] }
 0x1a9   : > { %v1808_v51 = vmax.f32 %v7599_v24, %v1776_v20  ;;  %v1936_v22 = vmax.f32 %v1807_v9, %v7369_v41  ;;  %v7694_v43 = vmax.f32 %v2053_v12, %v2150_v1  ;;  %v10985_v7 = vrot.slane %v7272_v42, 2 }
 0x1aa   : > { %v2006_v29 = vsel %vm1988_vm8, %v1969_v14, %v10984_v16  ;;  %v7704_v35 = vmax.f32 %v2084_v31, %v2118_v48  ;;  %v10986_v61 = vmax.f32 %v10943_v2, %v10941_v23  ;;  %v2067_v0 = vmax.f32 %v1938_v8, %v7578_v21 }
 0x1ab   : > { %v2007_v37 = vsel %vm1988_vm8, %v10985_v7, %v1969_v14  ;;  %v1937_v4 = vmax.f32 %v1808_v51, %v1878_v25  ;;  %v2034_v41 = vadd.f32 %v2006_v29, %v7448_v55  ;;  %v7708_v1 = vadd.f32 -inf, %v7694_v43 }
 0x1ac   : > { %v2065_v20 = vmax.f32 %v1936_v22, %v2007_v37  ;;  %v7714_v9 = vmax.f32 %v10986_v61, %v7694_v43  ;;  %v10987_v12 = vrot.slane %v7266_v46, 6  ;;  %v10989_v14 = vrot.slane %v7272_v42, 6 }
 0x1ad   : > { %v2066_v34 = vmax.f32 %v1937_v4, %v2034_v41  ;;  %v685_v21 = vadd.f32 1.0, %v5820_v26  ;;  %v1687_v8 = vpack.c.bf16 %v7599_v24, %v7272_v42  ;;  %v2279_v37 = vadd.f32 -inf, %v7704_v35 }
 0x1ae   : > { %v2135_v48 = vsel %vm2117_vm9, %v2098_v10, %v10987_v12  ;;  %v2136_v31 = vsel %vm2117_vm9, %v10989_v14, %v2098_v10  ;;  %v7729_v22 = vmax.f32 %v2065_v20, %v7387_v59  ;;  %v2379_v59 = vmax.f32 %v7603_v44, %v7300_v13  ;;  %v10998_v10 = vld [vmem:[#allocation12_spill] sm:$0xff] }
 0x1af   : > { %v2164_v51 = vadd.f32 %v2135_v48, %v7458_v11  ;;  %v7735_v29 = vmax.f32 %v2066_v34, %v2136_v31  ;;  %5821 = vrcp.f32 %v685_v21  ;;  %5574 = vmatprep.mubr.msk.bf16.mxu0 %vm2488_vm15, %v1687_v8  ;;  %v10991_v42 = vmax.f32 %v7546_v60, %v7279_v27 }
 0x1b0   : > { %v10992_v4 = vpack.c.bf16 %v7513_v45, %v7266_v46  ;;  %v10993_v41 = vmax.f32 %v10937_v33, %v10910_v40  ;;  %v10994_v44 = vmax.f32 %v7530_v6, %v10942_v28  ;;  %v2252_v60 = vmax.f32 %v10940_v56, %v7279_v27 }
 0x1b1   : > { %v7737_v7 = vmax.f32 %v2067_v0, %v2164_v51  ;;  %v7749_v24 = vmax.f32 %v10991_v42, %v7694_v43  ;;  %v2253_v0 = vmax.f32 %v10942_v28, %v7300_v13  ;;  %v10995_v46 = vpack.c.bf16 %v10928_v50, %v10927_v15 }
 0x1b2   : > { %5575 = vmatmul.mubr.msk.bf16.gmra.mxu0 %vm2488_vm15, %v10992_v4  ;;  %v7760_v20 = vmax.f32 %v10993_v41, %v2279_v37  ;;  %v7765_v61 = vmax.f32 %v10994_v44, %v2279_v37  ;;  %v7776_v45 = vmax.f32 %v2379_v59, %v10937_v33  ;;  %v10996_v41 = vld [vmem:[#allocation10_spill] sm:$0xff]  ;;  %v10997_v33 = vld [vmem:[#allocation11_spill] sm:$0xff]  ;;  %v2316_v16 = vmax.f32 %v2252_v60, %v10941_v23 }
 0x1b3   : > { %10990 = vst [vmem:[#allocation79_spill] sm:$0xff] %v7737_v7  ;;  %5578 = vmatprep.mubr.msk.bf16.mxu0 %vm2488_vm15, %v10995_v46  ;;  %v2918_v12 = vrot.slane %v7749_v24, 1  ;;  %v3046_v6 = vrot.slane %v7749_v24, 7  ;;  %v3174_v48 = vrot.slane %v7749_v24, 2  ;;  %v2254_v34 = vmax.f32 %v7279_v27, %v7281_v18 }
 0x1b4   : > { %v10490_v14 = vrot.slane %v7765_v61, 1  ;;  %v10489_v31 = vrot.slane %v7765_v61, 7  ;;  %v10491_v15 = vrot.slane %v7765_v61, 2  ;;  %v10492_v50 = vrot.slane %v7765_v61, 6 }
 0x1b5   : > { %v2919_v51 = vrot.slane %v7776_v45, 1  ;;  %v10495_v21 = vrot.slane %v7776_v45, 7  ;;  %v10494_v59 = vrot.slane %v7776_v45, 2  ;;  %v2255_v25 = vmax.f32 %v7300_v13, %v7438_v49 }
 0x1b6   : > { %v2973_v8 = vsel %vm1730_vm6, %v10490_v14, %v2918_v12  ;;  %v3101_v37 = vsel %vm1859_vm7, %v10489_v31, %v3046_v6  ;;  %v3229_v42 = vsel %vm1988_vm8, %v10491_v15, %v3174_v48  ;;  %v11001_v60 = vpack.c.bf16 %v10934_v47, %v10933_v30 }
 0x1b7   : > { %v2972_v4 = vsel %vm1730_vm6, %v2918_v12, %v2919_v51  ;;  %v7807_v44 = vadd.f32 %v2973_v8, %v10996_v41  ;;  %v7813_v46 = vsel %vm1859_vm7, %v3046_v6, %v10495_v21  ;;  %v3110_v31 = vadd.f32 %v3101_v37, %v10997_v33  ;;  %v11013_v33 = vld [vmem:[#allocation35_spill] sm:$0xff] }
 0x1b8   : > { %v3014_v14 = vmax.f32 %v7749_v24, %v2972_v4  ;;  %v3228_v15 = vsel %vm1988_vm8, %v3174_v48, %v10494_v59  ;;  %v7822_v12 = vadd.f32 %v3229_v42, %v10998_v10  ;;  %v3302_v8 = vrot.slane %v7749_v24, 6  ;;  %v11012_v10 = vld [vmem:[#allocation45_spill] sm:$0xff] }
 0x1b9   : > { %v10493_v6 = vrot.slane %v7776_v45, 6  ;;  %v2317_v37 = vmax.f32 %v2253_v0, %v10938_v63  ;;  %v11000_v4 = vpack.c.bf16 %v10932_v32, %v10931_v62  ;;  %v11002_v32 = vld [vmem:[#allocation13_spill] sm:$0xff]  ;;  %v7859_v47 = vmax.f32 %v2255_v25, %v10942_v28 }
 0x1ba   : > { %10999 = vst [vmem:[#allocation32_spill] sm:$0xff] %v7822_v12  ;;  %v3142_v48 = vmax.f32 %v3014_v14, %v3110_v31  ;;  %v3357_v42 = vsel %vm2117_vm9, %v10492_v50, %v3302_v8  ;;  %v2380_v14 = vmax.f32 %v2316_v16, %v7281_v18  ;;  %v7856_v50 = vmax.f32 %v2254_v34, %v10940_v56  ;;  %v11023_v28 = vld [vmem:[#allocation81_spill] sm:$0xff] }
 0x1bb   : > { %5579 = vmatmul.mubr.msk.bf16.gmra.mxu0 %vm2488_vm15, %v11000_v4  ;;  %v7850_v62 = vsel %vm2117_vm9, %v3302_v8, %v10493_v6  ;;  %v3366_v0 = vadd.f32 %v3357_v42, %v11002_v32  ;;  %v2381_v31 = vmax.f32 %v2317_v37, %v7438_v49  ;;  %v11014_v41 = vpack.c.bf16 %v11012_v10, %v11013_v33 }
 0x1bc   : > { %5582 = vmatprep.mubr.msk.bf16.mxu0 %vm2488_vm15, %v11001_v60  ;;  %v3270_v4 = vmax.f32 %v3142_v48, %v3228_v15  ;;  %v7864_v60 = vmax.f32 %v2380_v14, %v10943_v2  ;;  %v5822_v34 = vpop.eup %5821  ;;  %v11006_v14 = vld [vmem:[#allocation107_spill] sm:$0xff]  ;;  %v11017_v55 = vrot.slane %v7269_v53, 2  ;;  %v11020_v33 = vrot.slane %v7269_v53, 6 }
 0x1bd   : > { %v7867_v8 = vmax.f32 %v2381_v31, %v10910_v40  ;;  %v749_v40 = vmul.f32 %v5822_v34, %v10907_v38  ;;  %v11004_v38 = vld [vmem:[#allocation66_spill] sm:$0xff]  ;;  %v11018_v17 = vrot.slane %v11006_v14, 2 }
 0x1be   : > { %v7873_v37 = vmax.f32 %v3270_v4, %v3366_v0  ;;  %v2920_v31 = vrot.slane %v7864_v60, 1  ;;  %v3048_v0 = vrot.slane %v7864_v60, 7  ;;  %v3176_v16 = vrot.slane %v7864_v60, 2 }
 0x1bf   : > { %v10496_v15 = vrot.slane %v7867_v8, 1  ;;  %v10497_v4 = vrot.slane %v7867_v8, 7  ;;  %v1727_v25 = vrot.slane %v749_v40, 1  ;;  %v1856_v30 = vrot.slane %v749_v40, 7 }
 0x1c0   : > { %11003 = vst [vmem:[#allocation60_spill] sm:$0xff] %v7873_v37  ;;  %v1985_v42 = vrot.slane %v749_v40, 2  ;;  %v2114_v6 = vrot.slane %v749_v40, 6  ;;  %v11005_v34 = vpack.c.bf16 %v10936_v57, %v11004_v38  ;;  %v1695_v26 = vpack.c.bf16 %v749_v40, %v11006_v14 }
 0x1c1   : > { %v2970_v59 = vsel %vm1730_vm6, %v2920_v31, %v10496_v15  ;;  %v2971_v21 = vsel %vm1730_vm6, %v2919_v51, %v2920_v31  ;;  %v7905_v48 = vsel %vm1859_vm7, %v3048_v0, %v10497_v4  ;;  %v11008_v57 = vrot.slane %v7269_v53, 1 }
 0x1c2   : > { %11007 = vst [vmem:[#allocation64_spill] sm:$0xff] %v7905_v48  ;;  %v11010_v15 = vrot.slane %v7269_v53, 7  ;;  %v11011_v31 = vrot.slane %v11006_v14, 7  ;;  %v11024_v48 = vmax.f32 %v7269_v53, %v11023_v28  ;;  %v3016_v49 = vmax.f32 %v7864_v60, %v2970_v59 }
 0x1c3   : > { %5583 = vmatmul.mubr.msk.bf16.gmra.mxu0 %vm2488_vm15, %v11005_v34  ;;  %v1732_v38 = vsel %vm1730_vm6, %v1727_v25, %v11008_v57  ;;  %v11009_v34 = vrot.slane %v11006_v14, 1  ;;  %v11015_v57 = vld [vmem:[#allocation59_spill] sm:$0xff]  ;;  %v11030_v59 = vrot.slane %v7776_v45, 2 }
 0x1c4   : > { %v1861_v51 = vsel %vm1859_vm7, %v1856_v30, %v11010_v15  ;;  %v1862_v4 = vsel %vm1859_vm7, %v11011_v31, %v1856_v30  ;;  %5586 = vmatprep.mubr.msk.bf16.mxu0 %vm2488_vm15, %v11014_v41  ;;  %v1792_v37 = vadd.f32 %v1732_v38, %v11015_v57  ;;  %v1990_v15 = vsel %vm1988_vm8, %v1985_v42, %v11017_v55  ;;  %v11019_v31 = vld [vmem:[#allocation63_spill] sm:$0xff] }
 0x1c5   : > { %v1733_v32 = vsel %vm1730_vm6, %v11009_v34, %v1727_v25  ;;  %v11016_v25 = vld [vmem:[#allocation103_spill] sm:$0xff]  ;;  %v1991_v30 = vsel %vm1988_vm8, %v11018_v17, %v1985_v42  ;;  %v2050_v10 = vadd.f32 %v1990_v15, %v11019_v31  ;;  %v2119_v41 = vsel %vm2117_vm9, %v2114_v6, %v11020_v33  ;;  %v11025_v17 = vld [vmem:[#allocation53_spill] sm:$0xff] }
 0x1c6   : > { %v1823_v11 = vmax.f32 %v11006_v14, %v1733_v32  ;;  %v1922_v34 = vadd.f32 %v1861_v51, %v11016_v25  ;;  %v11021_v32 = vrot.slane %v11006_v14, 6  ;;  %v1824_v51 = vmax.f32 %v749_v40, %v1792_v37  ;;  %v11026_v15 = vld [vmem:[#allocation19_spill] sm:$0xff] }
 0x1c7   : > { %v2180_v42 = vadd.f32 %v2119_v41, %v11025_v17  ;;  %v2983_v12 = vadd.f32 %v2971_v21, %v11026_v15  ;;  %v11027_v33 = vrot.slane %v7776_v45, 7  ;;  %v10512_v41 = vrot.slane %v7867_v8, 6  ;;  %v11045_v15 = vld [vmem:[#allocation102_spill] sm:$0xff] }
 0x1c8   : > { %v2120_v38 = vsel %vm2117_vm9, %v11021_v32, %v2114_v6  ;;  %v1952_v55 = vmax.f32 %v1823_v11, %v11022_v58  ;;  %v1954_v7 = vmax.f32 %v11024_v48, %v1922_v34  ;;  %v11028_v6 = vrot.slane %v7867_v8, 2  ;;  %v11029_v48 = vld [vmem:[#allocation20_spill] sm:$0xff] }
 0x1c9   : > { %v3099_v14 = vsel %vm1859_vm7, %v11027_v33, %v3048_v0  ;;  %v1953_v11 = vmax.f32 %v1824_v51, %v1862_v4  ;;  %v3015_v21 = vmax.f32 %v7776_v45, %v2983_v12  ;;  %v3227_v34 = vsel %vm1988_vm8, %v11030_v59, %v3176_v16  ;;  %v11031_v33 = vld [vmem:[#allocation110_spill] sm:$0xff] }
 0x1ca   : > { %v7962_v58 = vsel %vm1988_vm8, %v3176_v16, %v11028_v6  ;;  %v2081_v28 = vmax.f32 %v1952_v55, %v1991_v30  ;;  %v2083_v37 = vmax.f32 %v1954_v7, %v7646_v36  ;;  %v3112_v40 = vadd.f32 %v3099_v14, %v11029_v48  ;;  %v11034_v16 = vld [vmem:[#allocation21_spill] sm:$0xff]  ;;  %v11044_v48 = vld [vmem:[#allocation75_spill] sm:$0xff] }
 0x1cb   : > { %v3304_v0 = vrot.slane %v7864_v60, 6  ;;  %v2082_v32 = vmax.f32 %v1953_v11, %v2050_v10  ;;  %v11033_v36 = vpack.c.bf16 %v7095_v39, %v6980_v52  ;;  %v7984_v12 = vmax.f32 %v3015_v21, %v7813_v46  ;;  %v11040_v21 = vld [vmem:[#allocation105_spill] sm:$0xff] }
 0x1cc   : > { %v7974_v6 = vmax.f32 %v2081_v28, %v11031_v33  ;;  %v2212_v4 = vmax.f32 %v2083_v37, %v2180_v42  ;;  %v7980_v7 = vmax.f32 %v3016_v49, %v3112_v40  ;;  %v7987_v30 = vadd.f32 %v3227_v34, %v11034_v16  ;;  %v11039_v37 = vld [vmem:[#allocation82_spill] sm:$0xff]  ;;  %v11043_v28 = vld [vmem:[#allocation108_spill] sm:$0xff] }
 0x1cd   : > { %5587 = vmatmul.mubr.msk.bf16.gmra.mxu0 %vm2488_vm15, %v11033_v36  ;;  %v7993_v10 = vsel %vm2117_vm9, %v3304_v0, %v10512_v41  ;;  %v11036_v52 = vrot.slane %v7776_v45, 6  ;;  %v8001_v49 = vmax.f32 %v2082_v32, %v2120_v38  ;;  %v11041_v32 = vmax.f32 %v7704_v35, %v10988_v3 }
 0x1ce   : > { %11032 = vst [vmem:[#allocation55_spill] sm:$0xff] %v7974_v6  ;;  %5590 = vmatprep.mubr.msk.bf16.mxu0 %vm2488_vm15, %v1695_v26  ;;  %11035 = vst [vmem:[#allocation56_spill] sm:$0xff] %v7993_v10  ;;  %v11038_v26 = vld [vmem:[#allocation106_spill] sm:$0xff]  ;;  %v2274_v51 = vmax.f32 %v7974_v6, %v2212_v4  ;;  %v2276_v55 = vmax.f32 %v2212_v4, %v7708_v1  ;;  %v2278_v42 = vadd.f32 -inf, %v2212_v4  ;;  %v2406_v14 = vadd.f32 -inf, %v7974_v6 }
 0x1cf   : > { %v7999_v39 = vsel %vm2117_vm9, %v11036_v52, %v3304_v0  ;;  %11037 = vst [vmem:[#allocation62_spill] sm:$0xff] %v8001_v49  ;;  %v2272_v46 = vmax.f32 %v11038_v26, %v7974_v6  ;;  %v2273_v38 = vmax.f32 %v11039_v37, %v8001_v49  ;;  %v2275_v40 = vmax.f32 %v8001_v49, %v7704_v35 }
 0x1d0   : > { %v2338_v34 = vmax.f32 %v2274_v51, %v11038_v26  ;;  %v2340_v0 = vmax.f32 %v2276_v55, %v7974_v6  ;;  %v2341_v33 = vmax.f32 %v11041_v32, %v8001_v49  ;;  %v11042_v36 = vmax.f32 %v7694_v43, %v10943_v2 }
 0x1d1   : > { %v2336_v59 = vmax.f32 %v2272_v46, %v11040_v21  ;;  %v2407_v41 = vadd.f32 -inf, %v8001_v49  ;;  %v2337_v11 = vmax.f32 %v2273_v38, %v11043_v28  ;;  %v2339_v16 = vmax.f32 %v2275_v40, %v11039_v37 }
 0x1d2   : > { %v2310_v52 = vmax.f32 %v11042_v36, %v2278_v42  ;;  %v2402_v51 = vmax.f32 %v2338_v34, %v7708_v1  ;;  %v2404_v55 = vmax.f32 %v2340_v0, %v11044_v48  ;;  %v2405_v6 = vmax.f32 %v2341_v33, %v11045_v15  ;;  %v11047_v36 = vld [vmem:[#allocation87_spill] sm:$0xff] }
 0x1d3   : > { %v2400_v46 = vmax.f32 %v2336_v59, %v2212_v4  ;;  %v11046_v32 = vmax.f32 %v7760_v20, %v10938_v63  ;;  %v2401_v43 = vmax.f32 %v2337_v11, %v7704_v35  ;;  %v2403_v38 = vmax.f32 %v2339_v16, %v10988_v3  ;;  %v11054_v4 = vld [vmem:[#allocation104_spill] sm:$0xff] }
 0x1d4   : > { %v2374_v10 = vmax.f32 %v2310_v52, %v10941_v23  ;;  %v8044_v1 = vmax.f32 %v2402_v51, %v11040_v21  ;;  %v11050_v15 = vpack.c.bf16 %v7595_v54, %v7269_v53  ;;  %v8051_v48 = vmax.f32 %v2404_v55, %v11038_v26 }
 0x1d5   : > { %v8036_v2 = vmax.f32 %v11046_v32, %v2407_v41  ;;  %v8041_v40 = vmax.f32 %v2400_v46, %v11047_v36  ;;  %v8054_v20 = vmax.f32 %v2405_v6, %v11039_v37  ;;  %v11053_v3 = vmax.f32 %v7714_v9, %v10940_v56 }
 0x1d6   : > { %11049 = vst [vmem:[#allocation84_spill] sm:$0xff] %v8044_v1  ;;  %5591 = vmatmul.mubr.msk.bf16.gmra.mxu0 %vm2488_vm15, %v11050_v15  ;;  %11051 = vst [vmem:[#allocation80_spill] sm:$0xff] %v8051_v48  ;;  %v8056_v35 = vmax.f32 %v2374_v10, %v2406_v14  ;;  %v8064_v16 = vmax.f32 %v2401_v43, %v11054_v4  ;;  %v8067_v53 = vmax.f32 %v2403_v38, %v11043_v28  ;;  %v11057_v15 = vld [vmem:[#allocation89_spill] sm:$0xff] }
 0x1d7   : > { %11048 = vst [vmem:[#allocation68_spill] sm:$0xff] %v8041_v40  ;;  %11052 = vst [vmem:[#allocation74_spill] sm:$0xff] %v8054_v20  ;;  %v8061_v41 = vmax.f32 %v11053_v3, %v2278_v42  ;;  %v2942_v54 = vrot.slane %v8044_v1, 1  ;;  %v10519_v11 = vrot.slane %v8041_v40, 7  ;;  %v2944_v6 = vrot.slane %v8051_v48, 1 }
 0x1d8   : > { %11055 = vst [vmem:[#allocation85_spill] sm:$0xff] %v8064_v16  ;;  %11056 = vst [vmem:[#allocation52_spill] sm:$0xff] %v8067_v53  ;;  %v10514_v10 = vrot.slane %v8054_v20, 1  ;;  %v3070_v14 = vrot.slane %v8044_v1, 7  ;;  %v3072_v9 = vrot.slane %v8051_v48, 7  ;;  %v10515_v42 = vrot.slane %v8064_v16, 1 }
 0x1d9   : > { %v2943_v59 = vrot.slane %v8067_v53, 1  ;;  %v3069_v34 = vrot.slane %v8064_v16, 7  ;;  %v3071_v0 = vrot.slane %v8067_v53, 7  ;;  %v10516_v52 = vrot.slane %v8054_v20, 7 }
 0x1da   : > { %v2946_v33 = vsel %vm1730_vm6, %v2944_v6, %v10514_v10  ;;  %v3198_v51 = vrot.slane %v8044_v1, 2  ;;  %v2949_v43 = vsel %vm1730_vm6, %v10515_v42, %v2942_v54  ;;  %v11058_v42 = vld [vmem:[#allocation91_spill] sm:$0xff] }
 0x1db   : > { %v2947_v55 = vsel %vm1730_vm6, %v2943_v59, %v2944_v6  ;;  %v2948_v32 = vsel %vm1730_vm6, %v2942_v54, %v2943_v59  ;;  %v3040_v38 = vmax.f32 %v8051_v48, %v2946_v33  ;;  %v3005_v3 = vadd.f32 %v2949_v43, %v11057_v15 }
 0x1dc   : > { %v3007_v10 = vadd.f32 %v2947_v55, %v11015_v57  ;;  %v3038_v46 = vmax.f32 %v8044_v1, %v2948_v32  ;;  %v8102_v6 = vsel %vm1859_vm7, %v3072_v9, %v10516_v52  ;;  %v3075_v59 = vsel %vm1859_vm7, %v3071_v0, %v3072_v9 }
 0x1dd   : > { %v3076_v54 = vsel %vm1859_vm7, %v3070_v14, %v3071_v0  ;;  %v3077_v33 = vsel %vm1859_vm7, %v3069_v34, %v3070_v14  ;;  %v3078_v55 = vsel %vm1859_vm7, %v10519_v11, %v3069_v34  ;;  %v3037_v32 = vmax.f32 %v8064_v16, %v3005_v3 }
 0x1de   : > { %v3039_v43 = vmax.f32 %v8067_v53, %v3007_v10  ;;  %v3134_v52 = vadd.f32 %v3077_v33, %v11058_v42  ;;  %v3136_v15 = vadd.f32 %v3075_v59, %v11016_v25  ;;  %v3199_v9 = vrot.slane %v8067_v53, 2  ;;  %v11060_v25 = vld [vmem:[#allocation33_spill] sm:$0xff] }
 0x1df   : > { %v3200_v0 = vrot.slane %v8051_v48, 2  ;;  %v10524_v57 = vrot.slane %v8054_v20, 2  ;;  %v11059_v14 = vrot.slane %v8064_v16, 2  ;;  %v3165_v34 = vmax.f32 %v3037_v32, %v3078_v55 }
 0x1e0   : > { %v3166_v11 = vmax.f32 %v3038_v46, %v3134_v52  ;;  %v3167_v3 = vmax.f32 %v3039_v43, %v3076_v54  ;;  %v3168_v37 = vmax.f32 %v3040_v38, %v3136_v15  ;;  %v3204_v33 = vsel %vm1988_vm8, %v3198_v51, %v3199_v9 }
 0x1e1   : > { %v3205_v49 = vsel %vm1988_vm8, %v11059_v14, %v3198_v51  ;;  %v3202_v10 = vsel %vm1988_vm8, %v3200_v0, %v10524_v57  ;;  %v3203_v59 = vsel %vm1988_vm8, %v3199_v9, %v3200_v0  ;;  %v10523_v52 = vrot.slane %v8041_v40, 6 }
 0x1e2   : > { %v3261_v42 = vadd.f32 %v3205_v49, %v11060_v25  ;;  %v3263_v26 = vadd.f32 %v3203_v59, %v11019_v31  ;;  %v3294_v14 = vmax.f32 %v3166_v11, %v3204_v33  ;;  %v3296_v55 = vmax.f32 %v3168_v37, %v3202_v10  ;;  %v11070_v25 = vld [vmem:[#allocation2_spill] sm:$0xff] }
 0x1e3   : > { %v3325_v38 = vrot.slane %v8064_v16, 6  ;;  %v3326_v15 = vrot.slane %v8044_v1, 6  ;;  %v3327_v54 = vrot.slane %v8067_v53, 6  ;;  %v3328_v43 = vrot.slane %v8051_v48, 6 }
 0x1e4   : > { %v3293_v46 = vmax.f32 %v3165_v34, %v3261_v42  ;;  %v3295_v32 = vmax.f32 %v3167_v3, %v3263_v26  ;;  %v3329_v51 = vrot.slane %v8054_v20, 6  ;;  %v2470_v49 = vpack.c.bf16 %v8036_v2, %v8056_v35  ;;  %v11061_v34 = vld [vmem:[#allocation92_spill] sm:$0xff] }
 0x1e5   : > { %v3332_v37 = vsel %vm2117_vm9, %v3326_v15, %v3327_v54  ;;  %v3333_v11 = vsel %vm2117_vm9, %v3325_v38, %v3326_v15  ;;  %v3334_v42 = vsel %vm2117_vm9, %v10523_v52, %v3325_v38  ;;  %v2914_v26 = vrot.slane %v8056_v35, 1 }
 0x1e6   : > { %v8154_v9 = vsel %vm2117_vm9, %v3328_v43, %v3329_v51  ;;  %v3331_v0 = vsel %vm2117_vm9, %v3327_v54, %v3328_v43  ;;  %v3390_v3 = vadd.f32 %v3333_v11, %v11061_v34  ;;  %v8159_v10 = vmax.f32 %v3293_v46, %v3334_v42  ;;  %5528 = vmatprep.mubr.msk.bf16.mxu1 %vm2488_vm15, %v2470_v49 }
 0x1e7   : > { %v3392_v59 = vadd.f32 %v3331_v0, %v11025_v17  ;;  %v8163_v33 = vmax.f32 %v3295_v32, %v3332_v37  ;;  %v2915_v38 = vrot.slane %v8036_v2, 1  ;;  %v2916_v15 = vrot.slane %v8061_v41, 1  ;;  %v11069_v0 = vld [vmem:[#allocation34_spill] sm:$0xff] }
 0x1e8   : > { %11062 = vst [vmem:[#allocation50_spill] sm:$0xff] %v8159_v10  ;;  %v8167_v52 = vmax.f32 %v3294_v14, %v3390_v3  ;;  %v11065_v57 = vrot.slane %v8054_v20, 1  ;;  %v3042_v46 = vrot.slane %v8056_v35, 7  ;;  %v3043_v43 = vrot.slane %v8036_v2, 7 }
 0x1e9   : > { %11063 = vst [vmem:[#allocation72_spill] sm:$0xff] %v8163_v33  ;;  %v8175_v49 = vmax.f32 %v3296_v55, %v3392_v59  ;;  %v8180_v37 = vadd.f32 -inf, %v8163_v33  ;;  %v11068_v14 = vrot.slane %v7765_v61, 1  ;;  %v2976_v42 = vsel %vm1730_vm6, %v2914_v26, %v2915_v38  ;;  %v11072_v59 = vld [vmem:[#allocation98_spill] sm:$0xff] }
 0x1ea   : > { %11064 = vst [vmem:[#allocation71_spill] sm:$0xff] %v8167_v52  ;;  %v2977_v54 = vsel %vm1730_vm6, %v11065_v57, %v2914_v26  ;;  %v2975_v57 = vsel %vm1730_vm6, %v2915_v38, %v2916_v15  ;;  %v3104_v26 = vsel %vm1859_vm7, %v3042_v46, %v3043_v43  ;;  %v11071_v38 = vrot.slane %v8054_v20, 7 }
 0x1eb   : > { %11066 = vst [vmem:[#allocation90_spill] sm:$0xff] %v8175_v49  ;;  %11067 = vst [vmem:[#allocation97_spill] sm:$0xff] %v8180_v37  ;;  %v2974_v11 = vsel %vm1730_vm6, %v2916_v15, %v11068_v14  ;;  %v3009_v55 = vadd.f32 %v2977_v54, %v11069_v0  ;;  %v8195_v32 = vadd.f32 -inf, %v8175_v49  ;;  %v2979_v48 = vadd.f32 %v2975_v57, %v11070_v25  ;;  %v11073_v0 = vld [vmem:[#allocation3_spill] sm:$0xff] }
 0x1ec   : > { %v3012_v3 = vmax.f32 %v8061_v41, %v2974_v11  ;;  %v3010_v14 = vmax.f32 %v8056_v35, %v2976_v42  ;;  %v3044_v15 = vrot.slane %v8061_v41, 7  ;;  %v3105_v54 = vsel %vm1859_vm7, %v11071_v38, %v3042_v46 }
 0x1ed   : > { %v3041_v53 = vmax.f32 %v8054_v20, %v3009_v55  ;;  %v3011_v11 = vmax.f32 %v8036_v2, %v2979_v48  ;;  %v3106_v1 = vadd.f32 %v3105_v54, %v11072_v59  ;;  %v3170_v57 = vrot.slane %v8056_v35, 2 }
 0x1ee   : > { %v3171_v42 = vrot.slane %v8036_v2, 2  ;;  %v3103_v55 = vsel %vm1859_vm7, %v3043_v43, %v3044_v15  ;;  %v3172_v34 = vrot.slane %v8061_v41, 2  ;;  %v3298_v31 = vrot.slane %v8056_v35, 6 }
 0x1ef   : > { %v3169_v17 = vmax.f32 %v3041_v53, %v8102_v6  ;;  %v3108_v25 = vadd.f32 %v3103_v55, %v11073_v0  ;;  %v3138_v46 = vmax.f32 %v3010_v14, %v3106_v1  ;;  %v3139_v38 = vmax.f32 %v3011_v11, %v3104_v26  ;;  %v11076_v14 = vld [vmem:[#allocation4_spill] sm:$0xff] }
 0x1f0   : > { %v3232_v48 = vsel %vm1988_vm8, %v3170_v57, %v3171_v42  ;;  %v11074_v54 = vrot.slane %v7765_v61, 2  ;;  %v3231_v43 = vsel %vm1988_vm8, %v3171_v42, %v3172_v34  ;;  %v11075_v53 = vrot.slane %v8054_v20, 2  ;;  %v11077_v11 = vld [vmem:[#allocation100_spill] sm:$0xff]  ;;  %v11109_v20 = vld [vmem:[#allocation67_spill] sm:$0xff] }
 0x1f1   : > { %v3299_v6 = vrot.slane %v8036_v2, 6  ;;  %v3140_v1 = vmax.f32 %v3012_v3, %v3108_v25  ;;  %v3235_v26 = vadd.f32 %v3231_v43, %v11076_v14  ;;  %v3266_v0 = vmax.f32 %v3138_v46, %v3232_v48 }
 0x1f2   : > { %v3230_v59 = vsel %vm1988_vm8, %v3172_v34, %v11074_v54  ;;  %v3233_v35 = vsel %vm1988_vm8, %v11075_v53, %v3170_v57  ;;  %v3300_v37 = vrot.slane %v8061_v41, 6  ;;  %v3361_v34 = vsel %vm2117_vm9, %v3329_v51, %v3298_v31  ;;  %v11080_v51 = vld [vmem:[#allocation22_spill] sm:$0xff] }
 0x1f3   : > { %v3265_v55 = vadd.f32 %v3233_v35, %v11077_v11  ;;  %v3360_v54 = vsel %vm2117_vm9, %v3298_v31, %v3299_v6  ;;  %v2471_v42 = vpack.c.bf16 %v7765_v61, %v8061_v41  ;;  %v3267_v57 = vmax.f32 %v3139_v38, %v3235_v26 }
 0x1f4   : > { %v3268_v53 = vmax.f32 %v3140_v1, %v3230_v59  ;;  %v3362_v25 = vadd.f32 %v3361_v34, %v10977_v5  ;;  %v3359_v3 = vsel %vm2117_vm9, %v3299_v6, %v3300_v37  ;;  %v11078_v46 = vrot.slane %v7765_v61, 7  ;;  %v11081_v59 = vld [vmem:[#allocation5_spill] sm:$0xff] }
 0x1f5   : > { %v3297_v2 = vmax.f32 %v3169_v17, %v3265_v55  ;;  %5529 = vmatmul.mubr.msk.bf16.vlgmr.msra.gmra.mxu1 %vm2488_vm15, %v2471_v42  ;;  %v11079_v31 = vrot.slane %v7765_v61, 6  ;;  %v3368_v17 = vadd.f32 %v7999_v39, %v11080_v51  ;;  %v3364_v38 = vadd.f32 %v3359_v3, %v11081_v59  ;;  %v11082_v1 = vld [vmem:[#allocation61_spill] sm:$0xff] }
 0x1f6   : > { %v3102_v48 = vsel %vm1859_vm7, %v3044_v15, %v11078_v46  ;;  %v8254_v43 = vmax.f32 %v3266_v0, %v3362_v25  ;;  %v8256_v35 = vmax.f32 %v3267_v57, %v3360_v54  ;;  %5595 = vmatpush3.bf16.msra.mxu1 %v11082_v1  ;;  %v11083_v15 = vpack.c.bf16 %v7776_v45, %v7749_v24 }
 0x1f7   : > { %v3358_v41 = vsel %vm2117_vm9, %v3300_v37, %v11079_v31  ;;  %v8259_v6 = vmax.f32 %v3297_v2, %v8154_v9  ;;  %v11084_v37 = vmax.f32 %v7765_v61, %v7807_v44  ;;  %v11085_v0 = vmax.f32 %v7984_v12, %v7987_v30 }
 0x1f8   : > { %5532 = vmatprep.mubr.msk.bf16.mxu1 %vm2488_vm15, %v11083_v15  ;;  %v11087_v9 = vmax.f32 %v7980_v7, %v7962_v58  ;;  %v11089_v24 = vmax.f32 %v7856_v50, %v7729_v22  ;;  %v8284_v54 = vmax.f32 %v3268_v53, %v3364_v38  ;;  %v11090_v61 = vmax.f32 %v7859_v47, %v7735_v29  ;;  %v11092_v7 = vld [vmem:[#allocation40_spill] sm:$0xff] }
 0x1f9   : > { %v3141_v39 = vmax.f32 %v11084_v37, %v3102_v48  ;;  %v8273_v26 = vmax.f32 %v11085_v0, %v7850_v62  ;;  %v11091_v62 = vmax.f32 %v7281_v18, %v7729_v22  ;;  %v11093_v12 = vmax.f32 %v11092_v7, %v7735_v29  ;;  %v11094_v50 = vld [vmem:[#allocation32_spill] sm:$0xff] }
 0x1fa   : > { %v8278_v55 = vmax.f32 %v11087_v9, %v3368_v17  ;;  %v2446_v45 = vmax.f32 %v11089_v24, %v10941_v23  ;;  %v8290_v44 = vmax.f32 %v11090_v61, %v10938_v63  ;;  %v11095_v3 = vrot.slane %v7867_v8, 1 }
 0x1fb   : > { %11086 = vst [vmem:[#allocation73_spill] sm:$0xff] %v8273_v26  ;;  %v2320_v58 = vmax.f32 %v11091_v62, %v7279_v27  ;;  %v2321_v30 = vmax.f32 %v11093_v12, %v7300_v13  ;;  %v3269_v23 = vmax.f32 %v3141_v39, %v11094_v50  ;;  %v11096_v48 = vrot.slane %v7867_v8, 7  ;;  %v11099_v39 = vld [vmem:[#allocation28_spill] sm:$0xff]  ;;  %v11101_v62 = vld [vmem:[#allocation29_spill] sm:$0xff] }
 0x1fc   : > { %11088 = vst [vmem:[#allocation69_spill] sm:$0xff] %v8278_v55  ;;  %v2922_v34 = vrot.slane %v2446_v45, 1  ;;  %v3050_v42 = vrot.slane %v2446_v45, 7  ;;  %v3178_v57 = vrot.slane %v2446_v45, 2  ;;  %v2474_v53 = vpack.c.bf16 %v8290_v44, %v2446_v45 }
 0x1fd   : > { %v2923_v63 = vrot.slane %v8290_v44, 1  ;;  %v3051_v47 = vrot.slane %v8290_v44, 7  ;;  %v3179_v2 = vrot.slane %v8290_v44, 2  ;;  %v8305_v25 = vmax.f32 %v3269_v23, %v3358_v41  ;;  %v11098_v41 = vld [vmem:[#allocation27_spill] sm:$0xff] }
 0x1fe   : > { %v2969_v46 = vsel %vm1730_vm6, %v11095_v3, %v2922_v34  ;;  %v3097_v31 = vsel %vm1859_vm7, %v11096_v48, %v3050_v42  ;;  %v11097_v17 = vrot.slane %v7867_v8, 2  ;;  %v11100_v9 = vpack.c.bf16 %v7867_v8, %v7864_v60 }
 0x1ff   : > { %v2968_v1 = vsel %vm1730_vm6, %v2922_v34, %v2923_v63  ;;  %v2985_v15 = vadd.f32 %v2969_v46, %v11098_v41  ;;  %v3096_v37 = vsel %vm1859_vm7, %v3050_v42, %v3051_v47  ;;  %v3114_v0 = vadd.f32 %v3097_v31, %v11099_v39  ;;  %v11102_v42 = vld [vmem:[#allocation79_spill] sm:$0xff]  ;;  %v11103_v46 = vld [vmem:[#allocation65_spill] sm:$0xff] }
 0x200   : > { %v3225_v38 = vsel %vm1988_vm8, %v11097_v17, %v3178_v57  ;;  %5533 = vmatmul.mubr.msk.bf16.gmra.mxu1 %vm2488_vm15, %v11100_v9  ;;  %v3018_v24 = vmax.f32 %v2446_v45, %v2968_v1  ;;  %v3224_v61 = vsel %vm1988_vm8, %v3178_v57, %v3179_v2  ;;  %v3306_v50 = vrot.slane %v2446_v45, 6  ;;  %v11108_v9 = vld [vmem:[#allocation39_spill] sm:$0xff] }
 0x201   : > { %v3241_v12 = vadd.f32 %v3225_v38, %v11101_v62  ;;  %5536 = vmatprep.mubr.msk.bf16.mxu1 %vm2488_vm15, %v2474_v53  ;;  %v3017_v23 = vmax.f32 %v7867_v8, %v2985_v15  ;;  %v3307_v34 = vrot.slane %v8290_v44, 6  ;;  %v2384_v3 = vmax.f32 %v2320_v58, %v11102_v42  ;;  %v11106_v38 = vld [vmem:[#allocation64_spill] sm:$0xff] }
 0x202   : > { %v2385_v48 = vmax.f32 %v2321_v30, %v11103_v46  ;;  %v3146_v60 = vmax.f32 %v3018_v24, %v3114_v0  ;;  %v11104_v31 = vrot.slane %v7867_v8, 6  ;;  %v2259_v57 = vmax.f32 %v7735_v29, %v11103_v46  ;;  %v11107_v30 = vld [vmem:[#allocation30_spill] sm:$0xff] }
 0x203   : > { %v11105_v45 = vmax.f32 %v7729_v22, %v11102_v42  ;;  %v3145_v1 = vmax.f32 %v3017_v23, %v11106_v38  ;;  %v3352_v58 = vsel %vm2117_vm9, %v3306_v50, %v3307_v34  ;;  %v2448_v8 = vmax.f32 %v2384_v3, %v10940_v56 }
 0x204   : > { %v3353_v17 = vsel %vm2117_vm9, %v11104_v31, %v3306_v50  ;;  %v3274_v0 = vmax.f32 %v3146_v60, %v3224_v61  ;;  %v8353_v24 = vmax.f32 %v2385_v48, %v11108_v9  ;;  %v2323_v31 = vmax.f32 %v2259_v57, %v11092_v7  ;;  %v11110_v61 = vld [vmem:[#allocation56_spill] sm:$0xff] }
 0x205   : > { %v2322_v53 = vmax.f32 %v11105_v45, %v7281_v18  ;;  %v3370_v15 = vadd.f32 %v3353_v17, %v11107_v30  ;;  %v3273_v51 = vmax.f32 %v3145_v1, %v3241_v12  ;;  %v2924_v59 = vrot.slane %v2448_v8, 1 }
 0x206   : > { %v3052_v45 = vrot.slane %v2448_v8, 7  ;;  %v3180_v5 = vrot.slane %v2448_v8, 2  ;;  %v2475_v50 = vpack.c.bf16 %v8353_v24, %v2448_v8  ;;  %v2925_v17 = vrot.slane %v8353_v24, 1 }
 0x207   : > { %v2386_v39 = vmax.f32 %v2322_v53, %v11109_v20  ;;  %v8357_v23 = vmax.f32 %v3274_v0, %v3370_v15  ;;  %v3053_v56 = vrot.slane %v8353_v24, 7  ;;  %v8363_v3 = vmax.f32 %v3273_v51, %v11110_v61  ;;  %v11111_v53 = vld [vmem:[#allocation48_spill] sm:$0xff]  ;;  %v11112_v51 = vld [vmem:[#allocation49_spill] sm:$0xff]  ;;  %v11113_v61 = vld [vmem:[#allocation51_spill] sm:$0xff] }
 0x208   : > { %v2967_v48 = vsel %vm1730_vm6, %v2923_v63, %v2924_v59  ;;  %v3095_v12 = vsel %vm1859_vm7, %v3051_v47, %v3052_v45  ;;  %v3181_v60 = vrot.slane %v8353_v24, 2  ;;  %5537 = vmatmul.mubr.msk.bf16.gmra.mxu1 %vm2488_vm15, %v2475_v50  ;;  %v2966_v57 = vsel %vm1730_vm6, %v2924_v59, %v2925_v17 }
 0x209   : > { %v2987_v38 = vadd.f32 %v2967_v48, %v11111_v53  ;;  %v3094_v1 = vsel %vm1859_vm7, %v3052_v45, %v3053_v56  ;;  %v3116_v15 = vadd.f32 %v3095_v12, %v11112_v51  ;;  %v3020_v0 = vmax.f32 %v2448_v8, %v2966_v57  ;;  %v11114_v48 = vld [vmem:[#allocation78_spill] sm:$0xff] }
 0x20a   : > { %v3222_v63 = vsel %vm1988_vm8, %v3180_v5, %v3181_v60  ;;  %v3223_v47 = vsel %vm1988_vm8, %v3179_v2, %v3180_v5  ;;  %v3308_v9 = vrot.slane %v2448_v8, 6  ;;  %v3309_v59 = vrot.slane %v8353_v24, 6 }
 0x20b   : > { %v3019_v50 = vmax.f32 %v8290_v44, %v2987_v38  ;;  %v3243_v30 = vadd.f32 %v3223_v47, %v11113_v61  ;;  %v2387_v53 = vmax.f32 %v2323_v31, %v11114_v48  ;;  %v3148_v11 = vmax.f32 %v3020_v0, %v3116_v15  ;;  %v11115_v44 = vld [vmem:[#allocation54_spill] sm:$0xff] }
 0x20c   : > { %v3351_v45 = vsel %vm2117_vm9, %v3307_v34, %v3308_v9  ;;  %v2450_v12 = vmax.f32 %v2386_v39, %v7279_v27  ;;  %v2260_v57 = vmax.f32 %v11102_v42, %v11109_v20  ;;  %v3350_v5 = vsel %vm2117_vm9, %v3308_v9, %v3309_v59 }
 0x20d   : > { %v3147_v51 = vmax.f32 %v3019_v50, %v3096_v37  ;;  %v3372_v2 = vadd.f32 %v3351_v45, %v11115_v44  ;;  %v8394_v8 = vmax.f32 %v2387_v53, %v7300_v13  ;;  %v3276_v38 = vmax.f32 %v3148_v11, %v3222_v63  ;;  %v11122_v44 = vld [vmem:[#allocation86_spill] sm:$0xff] }
 0x20e   : > { %v2926_v31 = vrot.slane %v2450_v12, 1  ;;  %v3054_v15 = vrot.slane %v2450_v12, 7  ;;  %v3182_v0 = vrot.slane %v2450_v12, 2 }
 0x20f   : > { %v3275_v47 = vmax.f32 %v3147_v51, %v3243_v30  ;;  %v2476_v34 = vpack.c.bf16 %v8394_v8, %v2450_v12  ;;  %v2927_v27 = vrot.slane %v8394_v8, 1  ;;  %v3055_v39 = vrot.slane %v8394_v8, 7  ;;  %v11116_v51 = vld [vmem:[#allocation46_spill] sm:$0xff] }
 0x210   : > { %v8399_v37 = vmax.f32 %v3276_v38, %v3372_v2  ;;  %v2965_v9 = vsel %vm1730_vm6, %v2925_v17, %v2926_v31  ;;  %v3093_v13 = vsel %vm1859_vm7, %v3053_v56, %v3054_v15  ;;  %v3183_v11 = vrot.slane %v8394_v8, 2  ;;  %v11117_v2 = vld [vmem:[#allocation58_spill] sm:$0xff] }
 0x211   : > { %v8406_v53 = vmax.f32 %v3275_v47, %v3352_v58  ;;  %5540 = vmatprep.mubr.msk.bf16.mxu1 %vm2488_vm15, %v2476_v34  ;;  %v2964_v30 = vsel %vm1730_vm6, %v2926_v31, %v2927_v27  ;;  %v2989_v63 = vadd.f32 %v2965_v9, %v11116_v51  ;;  %v3092_v50 = vsel %vm1859_vm7, %v3054_v15, %v3055_v39  ;;  %v11118_v51 = vld [vmem:[#allocation17_spill] sm:$0xff] }
 0x212   : > { %v3022_v45 = vmax.f32 %v2450_v12, %v2964_v30  ;;  %v3118_v56 = vadd.f32 %v3093_v13, %v11117_v2  ;;  %v3220_v58 = vsel %vm1988_vm8, %v3182_v0, %v3183_v11  ;;  %v3221_v47 = vsel %vm1988_vm8, %v3181_v60, %v3182_v0  ;;  %v11119_v60 = vld [vmem:[#allocation77_spill] sm:$0xff] }
 0x213   : > { %v3021_v38 = vmax.f32 %v8353_v24, %v2989_v63  ;;  %v3310_v31 = vrot.slane %v2450_v12, 6  ;;  %v3311_v34 = vrot.slane %v8394_v8, 6  ;;  %v3245_v15 = vadd.f32 %v3221_v47, %v11118_v51  ;;  %v11120_v63 = vld [vmem:[#allocation47_spill] sm:$0xff] }
 0x214   : > { %v3150_v9 = vmax.f32 %v3022_v45, %v3118_v56  ;;  %v2261_v17 = vmax.f32 %v11103_v46, %v11114_v48  ;;  %v2324_v30 = vmax.f32 %v2260_v57, %v7729_v22  ;;  %v2262_v12 = vmax.f32 %v11109_v20, %v11119_v60  ;;  %v11121_v57 = vld [vmem:[#allocation83_spill] sm:$0xff] }
 0x215   : > { %v3149_v13 = vmax.f32 %v3021_v38, %v3094_v1  ;;  %v8429_v2 = vsel %vm2117_vm9, %v3310_v31, %v3311_v34  ;;  %v3349_v24 = vsel %vm2117_vm9, %v3309_v59, %v3310_v31  ;;  %v2263_v1 = vmax.f32 %v11114_v48, %v11121_v57 }
 0x216   : > { %v3278_v0 = vmax.f32 %v3150_v9, %v3220_v58  ;;  %v3374_v45 = vadd.f32 %v3349_v24, %v11120_v63  ;;  %v2325_v56 = vmax.f32 %v2261_v17, %v7735_v29  ;;  %v2388_v47 = vmax.f32 %v2324_v30, %v11119_v60  ;;  %v11124_v9 = vld [vmem:[#allocation88_spill] sm:$0xff] }
 0x217   : > { %v3277_v51 = vmax.f32 %v3149_v13, %v3245_v15  ;;  %v2326_v38 = vmax.f32 %v2262_v12, %v11102_v42  ;;  %v2264_v61 = vmax.f32 %v11119_v60, %v11122_v44  ;;  %v2265_v17 = vmax.f32 %v11121_v57, %v11124_v9 }
 0x218   : > { %v8443_v59 = vmax.f32 %v3278_v0, %v3374_v45  ;;  %v2389_v31 = vmax.f32 %v2325_v56, %v11121_v57  ;;  %v2452_v58 = vmax.f32 %v2388_v47, %v7281_v18  ;;  %v2327_v15 = vmax.f32 %v2263_v1, %v11103_v46 }
 0x219   : > { %v8449_v24 = vmax.f32 %v3277_v51, %v3350_v5  ;;  %v2390_v30 = vmax.f32 %v2326_v38, %v11122_v44  ;;  %v8454_v13 = vmax.f32 %v2264_v61, %v11109_v20  ;;  %v2329_v5 = vmax.f32 %v2265_v17, %v11114_v48  ;;  %v11126_v61 = vld [vmem:[#allocation111_spill] sm:$0xff] }
 0x21a   : > { %11123 = vst [vmem:[#allocation70_spill] sm:$0xff] %v8443_v59  ;;  %v2453_v12 = vmax.f32 %v2389_v31, %v11092_v7  ;;  %v2928_v0 = vrot.slane %v2452_v58, 1  ;;  %v3056_v45 = vrot.slane %v2452_v58, 7  ;;  %v3184_v63 = vrot.slane %v2452_v58, 2 }
 0x21b   : > { %11125 = vst [vmem:[#allocation76_spill] sm:$0xff] %v8449_v24  ;;  %v3312_v56 = vrot.slane %v2452_v58, 6  ;;  %v2391_v18 = vmax.f32 %v2327_v15, %v11124_v9  ;;  %v2454_v47 = vmax.f32 %v2390_v30, %v7729_v22  ;;  %v11127_v15 = vld [vmem:[#allocation41_spill] sm:$0xff]  ;;  %v11128_v30 = vld [vmem:[#allocation112_spill] sm:$0xff] }
 0x21c   : > { %v2477_v51 = vpack.c.bf16 %v2453_v12, %v2452_v58  ;;  %v2929_v62 = vrot.slane %v2453_v12, 1  ;;  %v2963_v1 = vsel %vm1730_vm6, %v2927_v27, %v2928_v0  ;;  %v3057_v38 = vrot.slane %v2453_v12, 7 }
 0x21d   : > { %v2991_v14 = vadd.f32 %v2963_v1, %v11126_v61  ;;  %v3091_v7 = vsel %vm1859_vm7, %v3055_v39, %v3056_v45  ;;  %v3185_v31 = vrot.slane %v2453_v12, 2  ;;  %v3219_v41 = vsel %vm1988_vm8, %v3183_v11, %v3184_v63 }
 0x21e   : > { %5541 = vmatmul.mubr.msk.bf16.gmra.mxu1 %vm2488_vm15, %v2477_v51  ;;  %v2962_v22 = vsel %vm1730_vm6, %v2928_v0, %v2929_v62  ;;  %v3090_v17 = vsel %vm1859_vm7, %v3056_v45, %v3057_v38  ;;  %v3120_v27 = vadd.f32 %v3091_v7, %v11127_v15  ;;  %v3247_v59 = vadd.f32 %v3219_v41, %v11128_v30  ;;  %v11129_v7 = vld [vmem:[#allocation101_spill] sm:$0xff] }
 0x21f   : > { %v3023_v1 = vmax.f32 %v8394_v8, %v2991_v14  ;;  %v3024_v61 = vmax.f32 %v2452_v58, %v2962_v22  ;;  %v3218_v39 = vsel %vm1988_vm8, %v3184_v63, %v3185_v31  ;;  %v3313_v24 = vrot.slane %v2453_v12, 6  ;;  %v11130_v22 = vld [vmem:[#allocation93_spill] sm:$0xff] }
 0x220   : > { %v3347_v11 = vsel %vm2117_vm9, %v3311_v34, %v3312_v56  ;;  %v8480_v51 = vmax.f32 %v2391_v18, %v7735_v29  ;;  %v2930_v0 = vrot.slane %v2454_v47, 1  ;;  %v3058_v52 = vrot.slane %v2454_v47, 7 }
 0x221   : > { %v3151_v45 = vmax.f32 %v3023_v1, %v3092_v50  ;;  %v3152_v10 = vmax.f32 %v3024_v61, %v3120_v27  ;;  %v3346_v41 = vsel %vm2117_vm9, %v3312_v56, %v3313_v24  ;;  %v3376_v14 = vadd.f32 %v3347_v11, %v11129_v7  ;;  %v11131_v27 = vld [vmem:[#allocation94_spill] sm:$0xff]  ;;  %v11183_v7 = vld [vmem:[#allocation97_spill] sm:$0xff] }
 0x222   : > { %v2478_v8 = vpack.c.bf16 %v8480_v51, %v2454_v47  ;;  %v2931_v63 = vrot.slane %v8480_v51, 1  ;;  %v2961_v58 = vsel %vm1730_vm6, %v2929_v62, %v2930_v0  ;;  %v3059_v34 = vrot.slane %v8480_v51, 7 }
 0x223   : > { %v3279_v29 = vmax.f32 %v3151_v45, %v3247_v59  ;;  %v3280_v18 = vmax.f32 %v3152_v10, %v3218_v39  ;;  %v2993_v15 = vadd.f32 %v2961_v58, %v11130_v22  ;;  %v3089_v50 = vsel %vm1859_vm7, %v3057_v38, %v3058_v52  ;;  %v11133_v22 = vld [vmem:[#allocation95_spill] sm:$0xff] }
 0x224   : > { %5544 = vmatprep.mubr.msk.bf16.mxu1 %vm2488_vm15, %v2478_v8  ;;  %v2960_v56 = vsel %vm1730_vm6, %v2930_v0, %v2931_v63  ;;  %v3088_v61 = vsel %vm1859_vm7, %v3058_v52, %v3059_v34  ;;  %v3122_v1 = vadd.f32 %v3089_v50, %v11131_v27  ;;  %v3186_v62 = vrot.slane %v2454_v47, 2 }
 0x225   : > { %v8500_v11 = vmax.f32 %v3279_v29, %v8429_v2  ;;  %v8502_v10 = vmax.f32 %v3280_v18, %v3376_v14  ;;  %v3025_v59 = vmax.f32 %v2453_v12, %v2993_v15  ;;  %v3026_v39 = vmax.f32 %v2454_v47, %v2960_v56 }
 0x226   : > { %v3187_v38 = vrot.slane %v8480_v51, 2  ;;  %v3217_v45 = vsel %vm1988_vm8, %v3185_v31, %v3186_v62  ;;  %v3314_v8 = vrot.slane %v2454_v47, 6  ;;  %v3315_v0 = vrot.slane %v8480_v51, 6 }
 0x227   : > { %11132 = vst [vmem:[#allocation66_spill] sm:$0xff] %v8502_v10  ;;  %v3153_v58 = vmax.f32 %v3025_v59, %v3090_v17  ;;  %v3154_v52 = vmax.f32 %v3026_v39, %v3122_v1  ;;  %v3249_v50 = vadd.f32 %v3217_v45, %v11133_v22  ;;  %v2392_v2 = vmax.f32 %v8454_v13, %v11047_v36  ;;  %v11134_v17 = vld [vmem:[#allocation96_spill] sm:$0xff] }
 0x228   : > { %v3216_v14 = vsel %vm1988_vm8, %v3186_v62, %v3187_v38  ;;  %v3344_v12 = vsel %vm2117_vm9, %v3314_v8, %v3315_v0  ;;  %v3345_v15 = vsel %vm2117_vm9, %v3313_v24, %v3314_v8  ;;  %v2393_v47 = vmax.f32 %v2329_v5, %v11054_v4  ;;  %v11139_v22 = vld [vmem:[#allocation8_spill] sm:$0xff] }
 0x229   : > { %v3281_v31 = vmax.f32 %v3153_v58, %v3249_v50  ;;  %v3282_v29 = vmax.f32 %v3154_v52, %v3216_v14  ;;  %v3378_v18 = vadd.f32 %v3345_v15, %v11134_v17  ;;  %v2456_v56 = vmax.f32 %v2392_v2, %v11102_v42  ;;  %v11137_v15 = vld [vmem:[#allocation6_spill] sm:$0xff] }
 0x22a   : > { %v8521_v1 = vmax.f32 %v2393_v47, %v11103_v46  ;;  %v2266_v13 = vmax.f32 %v11122_v44, %v11047_v36  ;;  %v2267_v62 = vmax.f32 %v11124_v9, %v11054_v4  ;;  %v2268_v24 = vmax.f32 %v11047_v36, %v11040_v21 }
 0x22b   : > { %v8529_v59 = vmax.f32 %v3281_v31, %v3346_v41  ;;  %v8531_v5 = vmax.f32 %v3282_v29, %v3378_v18  ;;  %v2932_v39 = vrot.slane %v2456_v56, 1  ;;  %v3060_v45 = vrot.slane %v2456_v56, 7  ;;  %v11138_v29 = vld [vmem:[#allocation7_spill] sm:$0xff] }
 0x22c   : > { %v2479_v42 = vpack.c.bf16 %v8521_v1, %v2456_v56  ;;  %v2933_v46 = vrot.slane %v8521_v1, 1  ;;  %v3061_v8 = vrot.slane %v8521_v1, 7  ;;  %v3188_v58 = vrot.slane %v2456_v56, 2 }
 0x22d   : > { %11135 = vst [vmem:[#allocation107_spill] sm:$0xff] %v8529_v59  ;;  %11136 = vst [vmem:[#allocation45_spill] sm:$0xff] %v8531_v5  ;;  %v2959_v52 = vsel %vm1730_vm6, %v2931_v63, %v2932_v39  ;;  %v3087_v50 = vsel %vm1859_vm7, %v3059_v34, %v3060_v45  ;;  %v3189_v41 = vrot.slane %v8521_v1, 2  ;;  %v3316_v2 = vrot.slane %v2456_v56, 6  ;;  %v11195_v5 = vld [vmem:[#allocation98_spill] sm:$0xff] }
 0x22e   : > { %5545 = vmatmul.mubr.msk.bf16.gmra.mxu1 %vm2488_vm15, %v2479_v42  ;;  %v2958_v14 = vsel %vm1730_vm6, %v2932_v39, %v2933_v46  ;;  %v2995_v47 = vadd.f32 %v2959_v52, %v11137_v15  ;;  %v3086_v31 = vsel %vm1859_vm7, %v3060_v45, %v3061_v8  ;;  %v3124_v18 = vadd.f32 %v3087_v50, %v11138_v29  ;;  %v11140_v50 = vld [vmem:[#allocation9_spill] sm:$0xff] }
 0x22f   : > { %v3028_v17 = vmax.f32 %v2456_v56, %v2958_v14  ;;  %v3214_v63 = vsel %vm1988_vm8, %v3188_v58, %v3189_v41  ;;  %v3215_v34 = vsel %vm1988_vm8, %v3187_v38, %v3188_v58  ;;  %v3317_v27 = vrot.slane %v8521_v1, 6 }
 0x230   : > { %v3027_v42 = vmax.f32 %v8480_v51, %v2995_v47  ;;  %v3251_v39 = vadd.f32 %v3215_v34, %v11139_v22  ;;  %v3343_v52 = vsel %vm2117_vm9, %v3315_v0, %v3316_v2  ;;  %v2330_v45 = vmax.f32 %v2266_v13, %v11119_v60 }
 0x231   : > { %v3156_v15 = vmax.f32 %v3028_v17, %v3124_v18  ;;  %v8560_v56 = vsel %vm2117_vm9, %v3316_v2, %v3317_v27  ;;  %v3380_v14 = vadd.f32 %v3343_v52, %v11140_v50  ;;  %v2331_v38 = vmax.f32 %v2267_v62, %v11121_v57  ;;  %v11141_v17 = vld [vmem:[#allocation106_spill] sm:$0xff] }
 0x232   : > { %v3155_v58 = vmax.f32 %v3027_v42, %v3088_v61  ;;  %v2394_v29 = vmax.f32 %v2330_v45, %v11040_v21  ;;  %v2269_v51 = vmax.f32 %v11054_v4, %v11043_v28  ;;  %v2332_v47 = vmax.f32 %v2268_v24, %v11122_v44  ;;  %v11142_v2 = vld [vmem:[#allocation82_spill] sm:$0xff] }
 0x233   : > { %v3284_v0 = vmax.f32 %v3156_v15, %v3214_v63  ;;  %v2395_v13 = vmax.f32 %v2331_v38, %v11043_v28  ;;  %v2270_v18 = vmax.f32 %v11040_v21, %v11141_v17  ;;  %v2271_v34 = vmax.f32 %v11043_v28, %v11142_v2 }
 0x234   : > { %v3283_v52 = vmax.f32 %v3155_v58, %v3251_v39  ;;  %v2458_v62 = vmax.f32 %v2394_v29, %v11109_v20  ;;  %v2333_v61 = vmax.f32 %v2269_v51, %v11124_v9  ;;  %v2396_v42 = vmax.f32 %v2332_v47, %v11141_v17  ;;  %v11145_v47 = vld [vmem:[#allocation14_spill] sm:$0xff]  ;;  %v11146_v17 = vld [vmem:[#allocation15_spill] sm:$0xff] }
 0x235   : > { %v8576_v45 = vmax.f32 %v3284_v0, %v3380_v14  ;;  %v2459_v24 = vmax.f32 %v2395_v13, %v11114_v48  ;;  %v8580_v15 = vmax.f32 %v2270_v18, %v11047_v36  ;;  %v8583_v63 = vmax.f32 %v2271_v34, %v11054_v4  ;;  %v11147_v34 = vld [vmem:[#allocation16_spill] sm:$0xff] }
 0x236   : > { %v8585_v21 = vmax.f32 %v3283_v52, %v3344_v12  ;;  %v2934_v28 = vrot.slane %v2458_v62, 1  ;;  %v3062_v39 = vrot.slane %v2458_v62, 7  ;;  %v3190_v38 = vrot.slane %v2458_v62, 2 }
 0x237   : > { %11143 = vst [vmem:[#allocation35_spill] sm:$0xff] %v8576_v45  ;;  %v2480_v20 = vpack.c.bf16 %v2459_v24, %v2458_v62  ;;  %v2935_v29 = vrot.slane %v2459_v24, 1  ;;  %v3063_v58 = vrot.slane %v2459_v24, 7  ;;  %v3191_v51 = vrot.slane %v2459_v24, 2  ;;  %v11194_v45 = vld [vmem:[#allocation11_spill] sm:$0xff] }
 0x238   : > { %11144 = vst [vmem:[#allocation109_spill] sm:$0xff] %v8585_v21  ;;  %v2957_v14 = vsel %vm1730_vm6, %v2933_v46, %v2934_v28  ;;  %v3085_v48 = vsel %vm1859_vm7, %v3061_v8, %v3062_v39  ;;  %v3213_v36 = vsel %vm1988_vm8, %v3189_v41, %v3190_v38  ;;  %v3318_v4 = vrot.slane %v2458_v62, 6 }
 0x239   : > { %5548 = vmatprep.mubr.msk.bf16.mxu1 %vm2488_vm15, %v2480_v20  ;;  %v2956_v12 = vsel %vm1730_vm6, %v2934_v28, %v2935_v29  ;;  %v2997_v0 = vadd.f32 %v2957_v14, %v11145_v47  ;;  %v3084_v13 = vsel %vm1859_vm7, %v3062_v39, %v3063_v58  ;;  %v3126_v18 = vadd.f32 %v3085_v48, %v11146_v17 }
 0x23a   : > { %v3030_v46 = vmax.f32 %v2458_v62, %v2956_v12  ;;  %v3212_v8 = vsel %vm1988_vm8, %v3190_v38, %v3191_v51  ;;  %v3253_v52 = vadd.f32 %v3213_v36, %v11147_v34  ;;  %v3319_v41 = vrot.slane %v2459_v24, 6  ;;  %v11148_v62 = vld [vmem:[#allocation18_spill] sm:$0xff]  ;;  %v11149_v12 = vld [vmem:[#allocation55_spill] sm:$0xff] }
 0x23b   : > { %v3029_v50 = vmax.f32 %v8521_v1, %v2997_v0  ;;  %v3341_v20 = vsel %vm2117_vm9, %v3317_v27, %v3318_v4  ;;  %v2397_v28 = vmax.f32 %v2333_v61, %v11142_v2  ;;  %v2460_v14 = vmax.f32 %v2396_v42, %v11119_v60  ;;  %v11150_v61 = vld [vmem:[#allocation62_spill] sm:$0xff] }
 0x23c   : > { %v3158_v47 = vmax.f32 %v3030_v46, %v3126_v18  ;;  %v3340_v39 = vsel %vm2117_vm9, %v3318_v4, %v3319_v41  ;;  %v3382_v48 = vadd.f32 %v3341_v20, %v11148_v62  ;;  %v2398_v38 = vmax.f32 %v8580_v15, %v11149_v12 }
 0x23d   : > { %v3157_v36 = vmax.f32 %v3029_v50, %v3086_v31  ;;  %v8614_v17 = vmax.f32 %v2397_v28, %v11121_v57  ;;  %v2936_v1 = vrot.slane %v2460_v14, 1  ;;  %v3064_v0 = vrot.slane %v2460_v14, 7  ;;  %v11152_v57 = vld [vmem:[#allocation23_spill] sm:$0xff] }
 0x23e   : > { %v3286_v27 = vmax.f32 %v3158_v47, %v3212_v8  ;;  %v3192_v34 = vrot.slane %v2460_v14, 2  ;;  %v3320_v2 = vrot.slane %v2460_v14, 6  ;;  %v2399_v60 = vmax.f32 %v8583_v63, %v11150_v61 }
 0x23f   : > { %v3285_v42 = vmax.f32 %v3157_v36, %v3253_v52  ;;  %v2481_v4 = vpack.c.bf16 %v8614_v17, %v2460_v14  ;;  %v2937_v18 = vrot.slane %v8614_v17, 1  ;;  %v2955_v15 = vsel %vm1730_vm6, %v2935_v29, %v2936_v1  ;;  %v11154_v52 = vld [vmem:[#allocation24_spill] sm:$0xff]  ;;  %v11155_v36 = vld [vmem:[#allocation25_spill] sm:$0xff] }
 0x240   : > { %v8622_v31 = vmax.f32 %v3286_v27, %v3382_v48  ;;  %v2999_v50 = vadd.f32 %v2955_v15, %v11152_v57  ;;  %v3065_v46 = vrot.slane %v8614_v17, 7  ;;  %v3083_v47 = vsel %vm1859_vm7, %v3063_v58, %v3064_v0 }
 0x241   : > { %v8629_v8 = vmax.f32 %v3285_v42, %v8560_v56  ;;  %5549 = vmatmul.mubr.msk.bf16.gmra.mxu1 %vm2488_vm15, %v2481_v4  ;;  %v2954_v63 = vsel %vm1730_vm6, %v2936_v1, %v2937_v18  ;;  %v3128_v20 = vadd.f32 %v3083_v47, %v11154_v52  ;;  %v3193_v29 = vrot.slane %v8614_v17, 2 }
 0x242   : > { %11151 = vst [vmem:[#allocation81_spill] sm:$0xff] %v8622_v31  ;;  %v3031_v28 = vmax.f32 %v2459_v24, %v2999_v50  ;;  %v3032_v48 = vmax.f32 %v2460_v14, %v2954_v63  ;;  %v3082_v12 = vsel %vm1859_vm7, %v3064_v0, %v3065_v46  ;;  %v3211_v58 = vsel %vm1988_vm8, %v3191_v51, %v3192_v34  ;;  %v11156_v24 = vld [vmem:[#allocation26_spill] sm:$0xff] }
 0x243   : > { %11153 = vst [vmem:[#allocation110_spill] sm:$0xff] %v8629_v8  ;;  %v3210_v56 = vsel %vm1988_vm8, %v3192_v34, %v3193_v29  ;;  %v3255_v27 = vadd.f32 %v3211_v58, %v11155_v36  ;;  %v3321_v61 = vrot.slane %v8614_v17, 6  ;;  %v3339_v1 = vsel %vm2117_vm9, %v3319_v41, %v3320_v2 }
 0x244   : > { %v3159_v42 = vmax.f32 %v3031_v28, %v3084_v13  ;;  %v3160_v4 = vmax.f32 %v3032_v48, %v3128_v20  ;;  %v3384_v14 = vadd.f32 %v3339_v1, %v11156_v24  ;;  %v2462_v15 = vmax.f32 %v2398_v38, %v11122_v44 }
 0x245   : > { %v3338_v0 = vsel %vm2117_vm9, %v3320_v2, %v3321_v61  ;;  %v2463_v51 = vmax.f32 %v2399_v60, %v11124_v9  ;;  %v2940_v34 = vrot.slane %v8041_v40, 1  ;;  %v3196_v50 = vrot.slane %v8041_v40, 2 }
 0x246   : > { %v3287_v47 = vmax.f32 %v3159_v42, %v3255_v27  ;;  %v3288_v63 = vmax.f32 %v3160_v4, %v3210_v56  ;;  %v2938_v58 = vrot.slane %v2462_v15, 1  ;;  %v3066_v52 = vrot.slane %v2462_v15, 7  ;;  %v11160_v27 = vld [vmem:[#allocation31_spill] sm:$0xff]  ;;  %v11162_v4 = vld [vmem:[#allocation42_spill] sm:$0xff] }
 0x247   : > { %v2482_v41 = vpack.c.bf16 %v2463_v51, %v2462_v15  ;;  %v2939_v13 = vrot.slane %v2463_v51, 1  ;;  %v11157_v20 = vrot.slane %v8064_v16, 1  ;;  %v3067_v38 = vrot.slane %v2463_v51, 7 }
 0x248   : > { %v8657_v28 = vmax.f32 %v3287_v47, %v3340_v39  ;;  %v8659_v2 = vmax.f32 %v3288_v63, %v3384_v14  ;;  %v2953_v9 = vsel %vm1730_vm6, %v2937_v18, %v2938_v58  ;;  %v11161_v39 = vrot.slane %v8041_v40, 7 }
 0x249   : > { %v2950_v44 = vsel %vm1730_vm6, %v2940_v34, %v11157_v20  ;;  %5552 = vmatprep.mubr.msk.bf16.mxu1 %vm2488_vm15, %v2482_v41  ;;  %v2951_v48 = vsel %vm1730_vm6, %v2939_v13, %v2940_v34  ;;  %v2952_v56 = vsel %vm1730_vm6, %v2938_v58, %v2939_v13  ;;  %v3001_v1 = vadd.f32 %v2953_v9, %v11160_v27  ;;  %v11163_v41 = vld [vmem:[#allocation36_spill] sm:$0xff]  ;;  %v11164_v13 = vld [vmem:[#allocation43_spill] sm:$0xff] }
 0x24a   : > { %11158 = vst [vmem:[#allocation105_spill] sm:$0xff] %v8657_v28  ;;  %11159 = vst [vmem:[#allocation108_spill] sm:$0xff] %v8659_v2  ;;  %v3036_v60 = vmax.f32 %v8041_v40, %v2950_v44  ;;  %v3079_v42 = vsel %vm1859_vm7, %v3067_v38, %v11161_v39  ;;  %v3003_v14 = vadd.f32 %v2951_v48, %v11162_v4  ;;  %v3194_v44 = vrot.slane %v2462_v15, 2 }
 0x24b   : > { %v3034_v18 = vmax.f32 %v2462_v15, %v2952_v56  ;;  %v3080_v47 = vsel %vm1859_vm7, %v3066_v52, %v3067_v38  ;;  %v3081_v63 = vsel %vm1859_vm7, %v3065_v46, %v3066_v52  ;;  %v3033_v34 = vmax.f32 %v8614_v17, %v3001_v1 }
 0x24c   : > { %v3130_v58 = vadd.f32 %v3081_v63, %v11163_v41  ;;  %v3132_v20 = vadd.f32 %v3079_v42, %v11164_v13  ;;  %v3035_v9 = vmax.f32 %v2463_v51, %v3003_v14  ;;  %v3195_v27 = vrot.slane %v2463_v51, 2  ;;  %v11166_v42 = vld [vmem:[#allocation37_spill] sm:$0xff]  ;;  %v11167_v63 = vld [vmem:[#allocation44_spill] sm:$0xff] }
 0x24d   : > { %v11165_v39 = vrot.slane %v8064_v16, 2  ;;  %v3322_v56 = vrot.slane %v2462_v15, 6  ;;  %v3161_v4 = vmax.f32 %v3033_v34, %v3082_v12  ;;  %v3209_v46 = vsel %vm1988_vm8, %v3193_v29, %v3194_v44  ;;  %v11170_v34 = vld [vmem:[#allocation57_spill] sm:$0xff]  ;;  %v11196_v16 = vld [vmem:[#allocation20_spill] sm:$0xff] }
 0x24e   : > { %v3162_v38 = vmax.f32 %v3034_v18, %v3130_v58  ;;  %v3164_v24 = vmax.f32 %v3036_v60, %v3132_v20  ;;  %v3163_v17 = vmax.f32 %v3035_v9, %v3080_v47  ;;  %v3207_v52 = vsel %vm1988_vm8, %v3195_v27, %v3196_v50 }
 0x24f   : > { %v3206_v48 = vsel %vm1988_vm8, %v3196_v50, %v11165_v39  ;;  %v3208_v1 = vsel %vm1988_vm8, %v3194_v44, %v3195_v27  ;;  %v3257_v14 = vadd.f32 %v3209_v46, %v11166_v42  ;;  %v3259_v13 = vadd.f32 %v3207_v52, %v11167_v63 }
 0x250   : > { %v3290_v41 = vmax.f32 %v3162_v38, %v3208_v1  ;;  %v3292_v39 = vmax.f32 %v3164_v24, %v3206_v48  ;;  %v3323_v15 = vrot.slane %v2463_v51, 6  ;;  %v3337_v60 = vsel %vm2117_vm9, %v3321_v61, %v3322_v56  ;;  %v11169_v51 = vld [vmem:[#allocation38_spill] sm:$0xff]  ;;  %v11174_v48 = vld [vmem:[#allocation60_spill] sm:$0xff] }
 0x251   : > { %v3289_v12 = vmax.f32 %v3161_v4, %v3257_v14  ;;  %v8697_v29 = vadd.f32 -inf, %v8254_v43  ;;  %v8700_v18 = vadd.f32 -inf, %v8256_v35  ;;  %v3291_v50 = vmax.f32 %v3163_v17, %v3259_v13 }
 0x252   : > { %v11168_v27 = vrot.slane %v8041_v40, 6  ;;  %v3336_v24 = vsel %vm2117_vm9, %v3322_v56, %v3323_v15  ;;  %v3386_v4 = vadd.f32 %v3337_v60, %v11169_v51  ;;  %v3458_v20 = vmax.f32 %v8254_v43, %v8284_v54 }
 0x253   : > { %v8710_v61 = vmax.f32 %v3289_v12, %v3338_v0  ;;  %v3459_v13 = vmax.f32 %v8256_v35, %v8305_v25  ;;  %v8718_v9 = vmax.f32 %v3291_v50, %v3336_v24  ;;  %v3460_v38 = vmax.f32 %v8284_v54, %v11174_v48 }
 0x254   : > { %v3335_v47 = vsel %vm2117_vm9, %v3323_v15, %v11168_v27  ;;  %v8716_v44 = vmax.f32 %v3290_v41, %v3386_v4  ;;  %v3461_v56 = vmax.f32 %v8305_v25, %v8273_v26  ;;  %v3462_v0 = vmax.f32 %v11174_v48, %v8278_v55 }
 0x255   : > { %v3388_v58 = vadd.f32 %v3335_v47, %v11170_v34  ;;  %11171 = vst [vmem:[#allocation75_spill] sm:$0xff] %v8710_v61  ;;  %11173 = vst [vmem:[#allocation87_spill] sm:$0xff] %v8718_v9  ;;  %v3463_v17 = vmax.f32 %v8273_v26, %v8363_v3  ;;  %v3464_v41 = vmax.f32 %v8278_v55, %v8357_v23  ;;  %v3491_v15 = vadd.f32 -inf, %v8259_v6 }
 0x256   : > { %11172 = vst [vmem:[#allocation102_spill] sm:$0xff] %v8716_v44  ;;  %v3465_v52 = vmax.f32 %v8363_v3, %v8406_v53  ;;  %v3487_v1 = vmax.f32 %v8163_v33, %v8259_v6  ;;  %v3488_v14 = vmax.f32 %v8175_v49, %v8697_v29  ;;  %v3522_v12 = vmax.f32 %v3458_v20, %v8195_v32  ;;  %v11177_v20 = vld [vmem:[#allocation50_spill] sm:$0xff] }
 0x257   : > { %v8724_v46 = vmax.f32 %v3292_v39, %v3388_v58  ;;  %v3489_v39 = vmax.f32 %v8259_v6, %v8700_v18  ;;  %v3524_v60 = vmax.f32 %v3460_v38, %v8254_v43  ;;  %v3525_v50 = vmax.f32 %v3461_v56, %v8256_v35  ;;  %v11179_v56 = vld [vmem:[#allocation71_spill] sm:$0xff] }
 0x258   : > { %v3526_v27 = vmax.f32 %v3462_v0, %v8284_v54  ;;  %v3527_v47 = vmax.f32 %v3463_v17, %v8305_v25  ;;  %v3528_v24 = vmax.f32 %v3464_v41, %v11174_v48  ;;  %v3529_v4 = vmax.f32 %v3465_v52, %v8273_v26 }
 0x259   : > { %11175 = vst [vmem:[#allocation104_spill] sm:$0xff] %v8724_v46  ;;  %v3523_v58 = vmax.f32 %v3459_v13, %v3491_v15  ;;  %v11176_v34 = vmax.f32 %v8357_v23, %v8399_v37  ;;  %v11178_v38 = vmax.f32 %v11177_v20, %v8163_v33  ;;  %v11180_v0 = vmax.f32 %v11179_v56, %v8175_v49  ;;  %v11181_v49 = vld [vmem:[#allocation76_spill] sm:$0xff] }
 0x25a   : > { %v3551_v41 = vmax.f32 %v3487_v1, %v11177_v20  ;;  %v3552_v52 = vmax.f32 %v3488_v14, %v11179_v56  ;;  %v3553_v13 = vmax.f32 %v3489_v39, %v8163_v33  ;;  %v3584_v42 = vadd.f32 -inf, %v8284_v54  ;;  %v11182_v33 = vld [vmem:[#allocation70_spill] sm:$0xff] }
 0x25b   : > { %v3530_v51 = vmax.f32 %v11176_v34, %v8278_v55  ;;  %v3549_v63 = vmax.f32 %v11178_v38, %v8718_v9  ;;  %v3550_v17 = vmax.f32 %v11180_v0, %v8724_v46  ;;  %v3585_v34 = vadd.f32 -inf, %v8305_v25 }
 0x25c   : > { %v3586_v36 = vmax.f32 %v3522_v12, %v11174_v48  ;;  %v3587_v57 = vmax.f32 %v3523_v58, %v8273_v26  ;;  %v3588_v38 = vmax.f32 %v3524_v60, %v8278_v55  ;;  %v3589_v62 = vmax.f32 %v3525_v50, %v8363_v3 }
 0x25d   : > { %v3590_v0 = vmax.f32 %v3526_v27, %v8357_v23  ;;  %v3591_v1 = vmax.f32 %v3527_v47, %v8406_v53  ;;  %v3592_v14 = vmax.f32 %v3528_v24, %v8399_v37  ;;  %v3593_v39 = vmax.f32 %v3529_v4, %v11181_v49 }
 0x25e   : > { %v3594_v22 = vmax.f32 %v3530_v51, %v11182_v33  ;;  %v3613_v2 = vmax.f32 %v3549_v63, %v8259_v6  ;;  %v3614_v12 = vmax.f32 %v3550_v17, %v8697_v29  ;;  %v3615_v58 = vmax.f32 %v3551_v41, %v8700_v18 }
 0x25f   : > { %v3616_v28 = vmax.f32 %v3552_v52, %v3584_v42  ;;  %v3617_v60 = vmax.f32 %v3553_v13, %v3585_v34  ;;  %v3618_v50 = vadd.f32 -inf, %v11179_v56  ;;  %v8779_v27 = vmax.f32 %v3587_v57, %v11183_v7 }
 0x260   : > { %v8782_v47 = vmax.f32 %v3588_v38, %v8195_v32  ;;  %v8784_v24 = vmax.f32 %v3589_v62, %v3491_v15  ;;  %v8787_v51 = vmax.f32 %v3590_v0, %v8254_v43  ;;  %v8792_v63 = vmax.f32 %v3591_v1, %v8256_v35 }
 0x261   : > { %v8789_v6 = vmax.f32 %v3586_v36, %v3618_v50  ;;  %v8795_v42 = vmax.f32 %v3592_v14, %v8284_v54  ;;  %v8798_v29 = vmax.f32 %v3593_v39, %v8305_v25  ;;  %v8801_v7 = vmax.f32 %v3594_v22, %v11174_v48 }
 0x262   : > { %v8804_v32 = vmax.f32 %v3613_v2, %v8710_v61  ;;  %v8807_v43 = vmax.f32 %v3614_v12, %v8716_v44  ;;  %v8810_v62 = vmax.f32 %v3615_v58, %v8718_v9  ;;  %v8813_v35 = vmax.f32 %v3616_v28, %v8724_v46 }
 0x263   : > { %v8816_v54 = vmax.f32 %v3617_v60, %v11177_v20  ;;  %v3944_v25 = vrot.slane %v8789_v6, 1  ;;  %v3945_v22 = vrot.slane %v8779_v27, 1  ;;  %v3946_v57 = vrot.slane %v8782_v47, 1  ;;  %v11191_v20 = vld [vmem:[#allocation59_spill] sm:$0xff] }
 0x264   : > { %11184 = vst [vmem:[#allocation61_spill] sm:$0xff] %v8810_v62  ;;  %11185 = vst [vmem:[#allocation40_spill] sm:$0xff] %v8813_v35  ;;  %v3947_v36 = vrot.slane %v8784_v24, 1  ;;  %v3948_v2 = vrot.slane %v8787_v51, 1  ;;  %v3949_v18 = vrot.slane %v8792_v63, 1  ;;  %v3950_v48 = vrot.slane %v8795_v42, 1 }
 0x265   : > { %11186 = vst [vmem:[#allocation32_spill] sm:$0xff] %v8816_v54  ;;  %v3951_v28 = vrot.slane %v8798_v29, 1  ;;  %v10542_v15 = vrot.slane %v8801_v7, 1  ;;  %v10544_v4 = vrot.slane %v8807_v43, 1  ;;  %v3973_v17 = vrot.slane %v8810_v62, 1 }
 0x266   : > { %v3974_v41 = vrot.slane %v8813_v35, 1  ;;  %v3975_v52 = vrot.slane %v8816_v54, 1  ;;  %v8833_v13 = vsel %vm1730_vm6, %v3948_v2, %v3949_v18  ;;  %v4001_v0 = vsel %vm1730_vm6, %v3949_v18, %v3950_v48  ;;  %v11187_v18 = vld [vmem:[#allocation10_spill] sm:$0xff] }
 0x267   : > { %v3999_v34 = vsel %vm1730_vm6, %v3951_v28, %v10542_v15  ;;  %v8841_v38 = vsel %vm1730_vm6, %v3950_v48, %v3951_v28  ;;  %v4003_v1 = vsel %vm1730_vm6, %v3947_v36, %v3948_v2  ;;  %v8857_v12 = vsel %vm1730_vm6, %v10544_v4, %v3973_v17  ;;  %v11188_v28 = vld [vmem:[#allocation2_spill] sm:$0xff]  ;;  %v11189_v15 = vld [vmem:[#allocation19_spill] sm:$0xff] }
 0x268   : > { %v8849_v14 = vsel %vm1730_vm6, %v3974_v41, %v3975_v52  ;;  %v3977_v39 = vsel %vm1730_vm6, %v3973_v17, %v3974_v41  ;;  %v4004_v58 = vsel %vm1730_vm6, %v3946_v57, %v3947_v36  ;;  %v4005_v60 = vsel %vm1730_vm6, %v3945_v22, %v3946_v57  ;;  %v11190_v17 = vld [vmem:[#allocation27_spill] sm:$0xff]  ;;  %v11192_v36 = vld [vmem:[#allocation34_spill] sm:$0xff] }
 0x269   : > { %v4006_v50 = vsel %vm1730_vm6, %v3944_v25, %v3945_v22  ;;  %v4007_v2 = vsel %vm1730_vm6, %v3975_v52, %v3944_v25  ;;  %v4011_v48 = vadd.f32 %v4003_v1, %v11187_v18  ;;  %v4009_v41 = vadd.f32 %v4005_v60, %v11188_v28 }
 0x26a   : > { %v4013_v56 = vadd.f32 %v4001_v0, %v11189_v15  ;;  %v4015_v4 = vadd.f32 %v3999_v34, %v11190_v17  ;;  %v4037_v46 = vadd.f32 %v3977_v39, %v11191_v20  ;;  %v4039_v9 = vadd.f32 %v4007_v2, %v11192_v36 }
 0x26b   : > { %v4040_v57 = vmax.f32 %v8789_v6, %v4006_v50  ;;  %v4042_v44 = vmax.f32 %v8782_v47, %v4004_v58  ;;  %v4043_v22 = vmax.f32 %v8784_v24, %v4011_v48  ;;  %v4041_v25 = vmax.f32 %v8779_v27, %v4009_v41 }
 0x26c   : > { %v4044_v52 = vmax.f32 %v8787_v51, %v8833_v13  ;;  %v4045_v1 = vmax.f32 %v8792_v63, %v4013_v56  ;;  %v4046_v15 = vmax.f32 %v8795_v42, %v8841_v38  ;;  %v4047_v20 = vmax.f32 %v8798_v29, %v4015_v4 }
 0x26d   : > { %v4068_v34 = vmax.f32 %v8807_v43, %v8857_v12  ;;  %v4069_v0 = vmax.f32 %v8810_v62, %v4037_v46  ;;  %v4070_v39 = vmax.f32 %v8813_v35, %v8849_v14  ;;  %v4071_v58 = vmax.f32 %v8816_v54, %v4039_v9 }
 0x26e   : > { %v4072_v60 = vrot.slane %v8789_v6, 7  ;;  %v4073_v13 = vrot.slane %v8779_v27, 7  ;;  %v4074_v56 = vrot.slane %v8782_v47, 7  ;;  %v4075_v38 = vrot.slane %v8784_v24, 7 }
 0x26f   : > { %v4076_v4 = vrot.slane %v8787_v51, 7  ;;  %v4077_v50 = vrot.slane %v8792_v63, 7  ;;  %v4078_v12 = vrot.slane %v8795_v42, 7  ;;  %v10557_v46 = vrot.slane %v8798_v29, 7 }
 0x270   : > { %v10556_v14 = vrot.slane %v8804_v32, 7  ;;  %v4100_v9 = vrot.slane %v8807_v43, 7  ;;  %v4101_v2 = vrot.slane %v8810_v62, 7  ;;  %v4102_v18 = vrot.slane %v8813_v35, 7 }
 0x271   : > { %v4103_v48 = vrot.slane %v8816_v54, 7  ;;  %v4129_v28 = vsel %vm1859_vm7, %v4077_v50, %v4078_v12  ;;  %v4130_v41 = vsel %vm1859_vm7, %v4076_v4, %v4077_v50  ;;  %v4128_v61 = vsel %vm1859_vm7, %v4078_v12, %v10557_v46  ;;  %v11193_v46 = vld [vmem:[#allocation3_spill] sm:$0xff] }
 0x272   : > { %v4106_v17 = vsel %vm1859_vm7, %v4100_v9, %v4101_v2  ;;  %v4107_v36 = vsel %vm1859_vm7, %v10556_v14, %v4100_v9  ;;  %v4131_v31 = vsel %vm1859_vm7, %v4075_v38, %v4076_v4  ;;  %v4105_v50 = vsel %vm1859_vm7, %v4101_v2, %v4102_v18 }
 0x273   : > { %v4104_v8 = vsel %vm1859_vm7, %v4102_v18, %v4103_v48  ;;  %v4132_v30 = vsel %vm1859_vm7, %v4074_v56, %v4075_v38  ;;  %v4133_v9 = vsel %vm1859_vm7, %v4073_v13, %v4074_v56  ;;  %v4134_v14 = vsel %vm1859_vm7, %v4072_v60, %v4073_v13  ;;  %v11197_v18 = vld [vmem:[#allocation91_spill] sm:$0xff] }
 0x274   : > { %v4135_v12 = vsel %vm1859_vm7, %v4103_v48, %v4072_v60  ;;  %v4138_v4 = vadd.f32 %v4133_v9, %v11193_v46  ;;  %v4140_v21 = vadd.f32 %v4131_v31, %v11194_v45  ;;  %v4142_v2 = vadd.f32 %v4129_v28, %v11196_v16  ;;  %v11198_v38 = vld [vmem:[#allocation103_spill] sm:$0xff] }
 0x275   : > { %v4136_v59 = vadd.f32 %v4135_v12, %v11195_v5  ;;  %v4164_v40 = vadd.f32 %v4107_v36, %v11197_v18  ;;  %v4166_v55 = vadd.f32 %v4105_v50, %v11198_v38  ;;  %v8936_v26 = vmax.f32 %v4041_v25, %v4134_v14  ;;  %v11199_v12 = vld [vmem:[#allocation4_spill] sm:$0xff]  ;;  %v11201_v38 = vld [vmem:[#allocation21_spill] sm:$0xff] }
 0x276   : > { %v8938_v56 = vmax.f32 %v4042_v44, %v4138_v4  ;;  %v8940_v13 = vmax.f32 %v4043_v22, %v4132_v30  ;;  %v8942_v10 = vmax.f32 %v4044_v52, %v4140_v21  ;;  %v8946_v46 = vmax.f32 %v4045_v1, %v4130_v41 }
 0x277   : > { %v8944_v60 = vmax.f32 %v4040_v57, %v4136_v59  ;;  %v8948_v45 = vmax.f32 %v4046_v15, %v4142_v2  ;;  %v8950_v5 = vmax.f32 %v4047_v20, %v4128_v61  ;;  %v8952_v16 = vmax.f32 %v4068_v34, %v4164_v40  ;;  %v11200_v2 = vld [vmem:[#allocation12_spill] sm:$0xff] }
 0x278   : > { %v8954_v31 = vmax.f32 %v4069_v0, %v4106_v17  ;;  %v8956_v25 = vmax.f32 %v4070_v39, %v4166_v55  ;;  %v8958_v44 = vmax.f32 %v4071_v58, %v4104_v8  ;;  %v4200_v30 = vrot.slane %v8789_v6, 2 }
 0x279   : > { %v4201_v21 = vrot.slane %v8779_v27, 2  ;;  %v4202_v59 = vrot.slane %v8782_v47, 2  ;;  %v4203_v57 = vrot.slane %v8784_v24, 2  ;;  %v4204_v22 = vrot.slane %v8787_v51, 2 }
 0x27a   : > { %v4205_v61 = vrot.slane %v8792_v63, 2  ;;  %v4206_v40 = vrot.slane %v8795_v42, 2  ;;  %v4207_v52 = vrot.slane %v8798_v29, 2  ;;  %v10569_v55 = vrot.slane %v8801_v7, 2 }
 0x27b   : > { %v10567_v8 = vrot.slane %v8807_v43, 2  ;;  %v4229_v1 = vrot.slane %v8810_v62, 2  ;;  %v4230_v15 = vrot.slane %v8813_v35, 2  ;;  %v4231_v20 = vrot.slane %v8816_v54, 2 }
 0x27c   : > { %v8975_v34 = vsel %vm1988_vm8, %v4206_v40, %v4207_v52  ;;  %v4257_v0 = vsel %vm1988_vm8, %v4205_v61, %v4206_v40  ;;  %v8981_v39 = vsel %vm1988_vm8, %v4204_v22, %v4205_v61  ;;  %v4255_v48 = vsel %vm1988_vm8, %v4207_v52, %v10569_v55  ;;  %v11202_v61 = vld [vmem:[#allocation29_spill] sm:$0xff]  ;;  %v11203_v52 = vld [vmem:[#allocation63_spill] sm:$0xff] }
 0x27d   : > { %v4233_v58 = vsel %vm1988_vm8, %v4229_v1, %v4230_v15  ;;  %v8989_v14 = vsel %vm1988_vm8, %v10567_v8, %v4229_v1  ;;  %v4259_v28 = vsel %vm1988_vm8, %v4203_v57, %v4204_v22  ;;  %v8999_v41 = vsel %vm1988_vm8, %v4230_v15, %v4231_v20 }
 0x27e   : > { %v4260_v17 = vsel %vm1988_vm8, %v4202_v59, %v4203_v57  ;;  %v4261_v36 = vsel %vm1988_vm8, %v4201_v21, %v4202_v59  ;;  %v4262_v50 = vsel %vm1988_vm8, %v4200_v30, %v4201_v21  ;;  %v4263_v9 = vsel %vm1988_vm8, %v4231_v20, %v4200_v30  ;;  %v11204_v57 = vld [vmem:[#allocation100_spill] sm:$0xff] }
 0x27f   : > { %v4265_v4 = vadd.f32 %v4261_v36, %v11199_v12  ;;  %v4267_v18 = vadd.f32 %v4259_v28, %v11200_v2  ;;  %v4269_v22 = vadd.f32 %v4257_v0, %v11201_v38  ;;  %v4271_v40 = vadd.f32 %v4255_v48, %v11202_v61 }
 0x280   : > { %v4293_v1 = vadd.f32 %v4233_v58, %v11203_v52  ;;  %v4295_v15 = vadd.f32 %v4263_v9, %v11204_v57  ;;  %v4296_v59 = vmax.f32 %v8944_v60, %v4262_v50  ;;  %v4298_v21 = vmax.f32 %v8938_v56, %v4260_v17  ;;  %v11205_v52 = vld [vmem:[#allocation99_spill] sm:$0xff]  ;;  %v11206_v57 = vld [vmem:[#allocation5_spill] sm:$0xff] }
 0x281   : > { %v4297_v8 = vmax.f32 %v8936_v26, %v4265_v4  ;;  %v4299_v30 = vmax.f32 %v8940_v13, %v4267_v18  ;;  %v4300_v20 = vmax.f32 %v8942_v10, %v8981_v39  ;;  %v4301_v28 = vmax.f32 %v8946_v46, %v4269_v22 }
 0x282   : > { %v4302_v0 = vmax.f32 %v8948_v45, %v8975_v34  ;;  %v4303_v58 = vmax.f32 %v8950_v5, %v4271_v40  ;;  %v4324_v48 = vmax.f32 %v8952_v16, %v8989_v14  ;;  %v4325_v60 = vmax.f32 %v8954_v31, %v4293_v1 }
 0x283   : > { %v4326_v26 = vmax.f32 %v8956_v25, %v8999_v41  ;;  %v4327_v56 = vmax.f32 %v8958_v44, %v4295_v15  ;;  %v4328_v13 = vrot.slane %v8789_v6, 6  ;;  %v4329_v10 = vrot.slane %v8779_v27, 6 }
 0x284   : > { %v4330_v46 = vrot.slane %v8782_v47, 6  ;;  %v4331_v45 = vrot.slane %v8784_v24, 6  ;;  %v4332_v5 = vrot.slane %v8787_v51, 6  ;;  %v4333_v34 = vrot.slane %v8792_v63, 6 }
 0x285   : > { %v4334_v16 = vrot.slane %v8795_v42, 6  ;;  %v4335_v31 = vrot.slane %v8798_v29, 6  ;;  %v10568_v25 = vrot.slane %v8804_v32, 6  ;;  %v4356_v44 = vrot.slane %v8807_v43, 6 }
 0x286   : > { %v4357_v39 = vrot.slane %v8810_v62, 6  ;;  %v4358_v14 = vrot.slane %v8813_v35, 6  ;;  %v4359_v41 = vrot.slane %v8816_v54, 6  ;;  %v4386_v50 = vsel %vm2117_vm9, %v4332_v5, %v4333_v34 }
 0x287   : > { %v4384_v17 = vsel %vm2117_vm9, %v4334_v16, %v4335_v31  ;;  %v4385_v36 = vsel %vm2117_vm9, %v4333_v34, %v4334_v16  ;;  %v4387_v9 = vsel %vm2117_vm9, %v4331_v45, %v4332_v5  ;;  %v4363_v18 = vsel %vm2117_vm9, %v10568_v25, %v4356_v44  ;;  %v11207_v5 = vld [vmem:[#allocation13_spill] sm:$0xff]  ;;  %v11208_v16 = vld [vmem:[#allocation22_spill] sm:$0xff] }
 0x288   : > { %v4360_v12 = vsel %vm2117_vm9, %v4358_v14, %v4359_v41  ;;  %v4361_v4 = vsel %vm2117_vm9, %v4357_v39, %v4358_v14  ;;  %v4362_v2 = vsel %vm2117_vm9, %v4356_v44, %v4357_v39  ;;  %v4388_v38 = vsel %vm2117_vm9, %v4330_v46, %v4331_v45  ;;  %v11209_v39 = vld [vmem:[#allocation92_spill] sm:$0xff]  ;;  %v11210_v45 = vld [vmem:[#allocation53_spill] sm:$0xff] }
 0x289   : > { %v4389_v22 = vsel %vm2117_vm9, %v4329_v10, %v4330_v46  ;;  %v4390_v61 = vsel %vm2117_vm9, %v4328_v13, %v4329_v10  ;;  %v4391_v40 = vsel %vm2117_vm9, %v4359_v41, %v4328_v13  ;;  %v4396_v34 = vadd.f32 %v4387_v9, %v11207_v5 }
 0x28a   : > { %v4392_v1 = vadd.f32 %v4391_v40, %v11205_v52  ;;  %v4394_v15 = vadd.f32 %v4389_v22, %v11206_v57  ;;  %v4398_v44 = vadd.f32 %v4385_v36, %v11208_v16  ;;  %v4420_v14 = vadd.f32 %v4363_v18, %v11209_v39 }
 0x28b   : > { %v4422_v25 = vadd.f32 %v4361_v4, %v11210_v45  ;;  %v9076_v55 = vmax.f32 %v4297_v8, %v4390_v61  ;;  %v9078_v46 = vmax.f32 %v4299_v30, %v4388_v38  ;;  %v9084_v13 = vmax.f32 %v4300_v20, %v4396_v34 }
 0x28c   : > { %v9080_v10 = vmax.f32 %v4296_v59, %v4392_v1  ;;  %v9082_v54 = vmax.f32 %v4298_v21, %v4394_v15  ;;  %v9086_v41 = vmax.f32 %v4301_v28, %v4386_v50  ;;  %v9088_v22 = vmax.f32 %v4302_v0, %v4398_v44  ;;  %v11220_v44 = vld [vmem:[#allocation66_spill] sm:$0xff] }
 0x28d   : > { %11211 = vst [vmem:[#allocation79_spill] sm:$0xff] %v9076_v55  ;;  %11212 = vst [vmem:[#allocation65_spill] sm:$0xff] %v9078_v46  ;;  %v9090_v9 = vmax.f32 %v4303_v58, %v4384_v17  ;;  %v9092_v36 = vmax.f32 %v4324_v48, %v4420_v14  ;;  %v9094_v18 = vmax.f32 %v4325_v60, %v4362_v2  ;;  %v4080_v50 = vrot.slane %v8801_v7, 7 }
 0x28e   : > { %11213 = vst [vmem:[#allocation64_spill] sm:$0xff] %v9080_v10  ;;  %11214 = vst [vmem:[#allocation39_spill] sm:$0xff] %v9082_v54  ;;  %v9096_v8 = vmax.f32 %v4326_v26, %v4422_v25  ;;  %v9098_v30 = vmax.f32 %v4327_v56, %v4360_v12  ;;  %v4488_v59 = vmax.f32 %v9080_v10, %v9082_v54  ;;  %v4336_v12 = vrot.slane %v8801_v7, 6 }
 0x28f   : > { %11215 = vst [vmem:[#allocation67_spill] sm:$0xff] %v9092_v36  ;;  %11216 = vst [vmem:[#allocation56_spill] sm:$0xff] %v9094_v18  ;;  %v4489_v21 = vmax.f32 %v9076_v55, %v9078_v46  ;;  %v4490_v20 = vmax.f32 %v9082_v54, %v9084_v13  ;;  %v4491_v28 = vmax.f32 %v9078_v46, %v9086_v41  ;;  %v4648_v0 = vadd.f32 -inf, %v9092_v36 }
 0x290   : > { %11217 = vst [vmem:[#allocation78_spill] sm:$0xff] %v9096_v8  ;;  %11218 = vst [vmem:[#allocation77_spill] sm:$0xff] %v9098_v30  ;;  %v4649_v58 = vadd.f32 -inf, %v9094_v18  ;;  %v4520_v48 = vadd.f32 -inf, %v9096_v8  ;;  %v4521_v60 = vadd.f32 -inf, %v9098_v30  ;;  %v3467_v26 = vmax.f32 %v8406_v53, %v11181_v49 }
 0x291   : > { %v3468_v56 = vmax.f32 %v8399_v37, %v11182_v33  ;;  %v4554_v25 = vmax.f32 %v4490_v20, %v9080_v10  ;;  %v4555_v17 = vmax.f32 %v4491_v28, %v9076_v55  ;;  %v11219_v1 = vrot.slane %v8798_v29, 7  ;;  %v11222_v20 = vld [vmem:[#allocation30_spill] sm:$0xff] }
 0x292   : > { %v4552_v4 = vmax.f32 %v4488_v59, %v4520_v48  ;;  %v4553_v2 = vmax.f32 %v4489_v21, %v4521_v60  ;;  %v3531_v38 = vmax.f32 %v3467_v26, %v8363_v3  ;;  %v4383_v15 = vsel %vm2117_vm9, %v4335_v31, %v4336_v12  ;;  %v11221_v59 = vld [vmem:[#allocation28_spill] sm:$0xff]  ;;  %v11224_v31 = vld [vmem:[#allocation69_spill] sm:$0xff] }
 0x293   : > { %v3532_v61 = vmax.f32 %v3468_v56, %v8357_v23  ;;  %v4618_v40 = vmax.f32 %v4554_v25, %v9088_v22  ;;  %v4619_v52 = vmax.f32 %v4555_v17, %v9090_v9  ;;  %v4127_v57 = vsel %vm1859_vm7, %v11219_v1, %v4080_v50  ;;  %v11223_v25 = vld [vmem:[#allocation73_spill] sm:$0xff] }
 0x294   : > { %v4616_v5 = vmax.f32 %v4552_v4, %v9084_v13  ;;  %v4617_v34 = vmax.f32 %v4553_v2, %v9086_v41  ;;  %v3595_v16 = vmax.f32 %v3531_v38, %v8500_v11  ;;  %v4144_v21 = vadd.f32 %v4127_v57, %v11221_v59  ;;  %v11226_v38 = vld [vmem:[#allocation85_spill] sm:$0xff] }
 0x295   : > { %v3596_v39 = vmax.f32 %v3532_v61, %v11220_v44  ;;  %v4682_v14 = vmax.f32 %v4618_v40, %v4520_v48  ;;  %v4683_v45 = vmax.f32 %v4619_v52, %v4521_v60  ;;  %v4400_v28 = vadd.f32 %v4383_v15, %v11222_v20  ;;  %v11225_v60 = vld [vmem:[#allocation68_spill] sm:$0xff] }
 0x296   : > { %v4680_v26 = vmax.f32 %v4616_v5, %v4648_v0  ;;  %v4681_v56 = vmax.f32 %v4617_v34, %v4649_v58  ;;  %v9137_v17 = vmax.f32 %v3595_v16, %v11223_v25  ;;  %v4492_v2 = vmax.f32 %v9084_v13, %v9088_v22  ;;  %v11228_v20 = vld [vmem:[#allocation48_spill] sm:$0xff] }
 0x297   : > { %v9140_v1 = vmax.f32 %v3596_v39, %v11224_v31  ;;  %v4713_v4 = vpack.c.bf16 %v4683_v45, %v4682_v14  ;;  %v4493_v48 = vmax.f32 %v9086_v41, %v9090_v9  ;;  %v2483_v61 = vpack.c.bf16 %v11226_v38, %v11225_v60  ;;  %v11230_v60 = vld [vmem:[#allocation51_spill] sm:$0xff] }
 0x298   : > { %v4712_v40 = vpack.c.bf16 %v4681_v56, %v4680_v26  ;;  %v3953_v0 = vrot.slane %v9137_v17, 1  ;;  %v4081_v52 = vrot.slane %v9137_v17, 7  ;;  %v4209_v57 = vrot.slane %v9137_v17, 2 }
 0x299   : > { %v3954_v58 = vrot.slane %v9140_v1, 1  ;;  %v4210_v15 = vrot.slane %v9140_v1, 2  ;;  %v4337_v5 = vrot.slane %v9137_v17, 6  ;;  %v4556_v34 = vmax.f32 %v4492_v2, %v9082_v54  ;;  %5553 = vmatmul.mubr.msk.bf16.gmra.mxu1 %vm2488_vm15, %v2483_v61  ;;  %v11232_v61 = vld [vmem:[#allocation52_spill] sm:$0xff] }
 0x29a   : > { %5630 = vmatprep.mubr.msk.bf16.mxu0 %vm2488_vm15, %v4712_v40  ;;  %v11227_v39 = vrot.slane %v8801_v7, 1  ;;  %v4126_v45 = vsel %vm1859_vm7, %v4080_v50, %v4081_v52  ;;  %v4557_v59 = vmax.f32 %v4493_v48, %v9078_v46  ;;  %v11229_v31 = vrot.slane %v8801_v7, 2  ;;  %v11231_v48 = vld [vmem:[#allocation84_spill] sm:$0xff] }
 0x29b   : > { %v3997_v16 = vsel %vm1730_vm6, %v3953_v0, %v3954_v58  ;;  %5631 = vmatmul.mubr.msk.bf16.vlgmr.msra.gmra.mxu0 %vm2488_vm15, %v4713_v4  ;;  %v4253_v25 = vsel %vm1988_vm8, %v4209_v57, %v4210_v15  ;;  %v4382_v50 = vsel %vm2117_vm9, %v4336_v12, %v4337_v5  ;;  %v2484_v4 = vpack.c.bf16 %v11232_v61, %v11231_v48 }
 0x29c   : > { %v3998_v14 = vsel %vm1730_vm6, %v11227_v39, %v3953_v0  ;;  %v4017_v26 = vadd.f32 %v3997_v16, %v11228_v20  ;;  %v4254_v2 = vsel %vm1988_vm8, %v11229_v31, %v4209_v57  ;;  %v4273_v38 = vadd.f32 %v4253_v25, %v11230_v60  ;;  %v11233_v20 = vld [vmem:[#allocation107_spill] sm:$0xff]  ;;  %v11234_v31 = vld [vmem:[#allocation45_spill] sm:$0xff] }
 0x29d   : > { %v4048_v56 = vmax.f32 %v8801_v7, %v3998_v14  ;;  %v3469_v40 = vmax.f32 %v11181_v49, %v8500_v11  ;;  %v3470_v39 = vmax.f32 %v11182_v33, %v11220_v44  ;;  %v4082_v14 = vrot.slane %v9140_v1, 7  ;;  %5556 = vmatprep.mubr.msk.bf16.mxu1 %vm2488_vm15, %v2484_v4  ;;  %v11235_v4 = vld [vmem:[#allocation49_spill] sm:$0xff] }
 0x29e   : > { %v4049_v0 = vmax.f32 %v9137_v17, %v4017_v26  ;;  %v4338_v12 = vrot.slane %v9140_v1, 6  ;;  %v3471_v25 = vmax.f32 %v8500_v11, %v11233_v20  ;;  %v3472_v60 = vmax.f32 %v11220_v44, %v11234_v31 }
 0x29f   : > { %v4176_v16 = vmax.f32 %v4048_v56, %v4144_v21  ;;  %v3533_v57 = vmax.f32 %v3469_v40, %v8406_v53  ;;  %v3534_v21 = vmax.f32 %v3470_v39, %v8399_v37  ;;  %v4125_v56 = vsel %vm1859_vm7, %v4081_v52, %v4082_v14  ;;  %v11237_v39 = vld [vmem:[#allocation109_spill] sm:$0xff] }
 0x2a0   : > { %v4177_v48 = vmax.f32 %v4049_v0, %v4126_v45  ;;  %v4146_v35 = vadd.f32 %v4125_v56, %v11235_v4  ;;  %v4381_v40 = vsel %vm2117_vm9, %v4337_v5, %v4338_v12  ;;  %v3535_v62 = vmax.f32 %v3471_v25, %v11181_v49  ;;  %v11238_v56 = vld [vmem:[#allocation80_spill] sm:$0xff]  ;;  %v11239_v4 = vld [vmem:[#allocation74_spill] sm:$0xff] }
 0x2a1   : > { %v4304_v26 = vmax.f32 %v4176_v16, %v4254_v2  ;;  %v3597_v61 = vmax.f32 %v3533_v57, %v11233_v20  ;;  %v3598_v45 = vmax.f32 %v3534_v21, %v11234_v31  ;;  %v11236_v2 = vld [vmem:[#allocation54_spill] sm:$0xff]  ;;  %v3536_v52 = vmax.f32 %v3472_v60, %v11182_v33 }
 0x2a2   : > { %v4305_v18 = vmax.f32 %v4177_v48, %v4273_v38  ;;  %v4402_v0 = vadd.f32 %v4381_v40, %v11236_v2  ;;  %v3599_v57 = vmax.f32 %v3535_v62, %v11237_v39  ;;  %v2485_v36 = vpack.c.bf16 %v11239_v4, %v11238_v56  ;;  %v11241_v4 = vld [vmem:[#allocation17_spill] sm:$0xff] }
 0x2a3   : > { %v9201_v30 = vmax.f32 %v4304_v26, %v4400_v28  ;;  %v9206_v16 = vmax.f32 %v3597_v61, %v8363_v3  ;;  %v9216_v28 = vmax.f32 %v3598_v45, %v8357_v23 }
 0x2a4   : > { %v9212_v5 = vmax.f32 %v4305_v18, %v4382_v50  ;;  %5557 = vmatmul.mubr.msk.bf16.gmra.mxu1 %vm2488_vm15, %v2485_v36 }
 0x2a5   : > { %v4620_v38 = vmax.f32 %v4556_v34, %v9201_v30  ;;  %v4494_v25 = vmax.f32 %v9088_v22, %v9201_v30  ;;  %v3955_v3 = vrot.slane %v9206_v16, 1  ;;  %v4083_v48 = vrot.slane %v9206_v16, 7 }
 0x2a6   : > { %v4211_v60 = vrot.slane %v9206_v16, 2  ;;  %v4339_v62 = vrot.slane %v9206_v16, 6  ;;  %v4621_v18 = vmax.f32 %v4557_v59, %v9212_v5  ;;  %v3956_v23 = vrot.slane %v9216_v28, 1 }
 0x2a7   : > { %v4684_v34 = vmax.f32 %v4620_v38, %v9080_v10  ;;  %v4212_v50 = vrot.slane %v9216_v28, 2  ;;  %v3996_v26 = vsel %vm1730_vm6, %v3954_v58, %v3955_v3  ;;  %v4124_v21 = vsel %vm1859_vm7, %v4082_v14, %v4083_v48  ;;  %v11240_v58 = vld [vmem:[#allocation46_spill] sm:$0xff] }
 0x2a8   : > { %v4252_v61 = vsel %vm1988_vm8, %v4210_v15, %v4211_v60  ;;  %v4380_v36 = vsel %vm2117_vm9, %v4338_v12, %v4339_v62  ;;  %v4685_v59 = vmax.f32 %v4621_v18, %v9076_v55  ;;  %v3995_v40 = vsel %vm1730_vm6, %v3955_v3, %v3956_v23  ;;  %v11242_v18 = vld [vmem:[#allocation35_spill] sm:$0xff] }
 0x2a9   : > { %v4050_v45 = vmax.f32 %v9140_v1, %v3996_v26  ;;  %v4251_v2 = vsel %vm1988_vm8, %v4211_v60, %v4212_v50  ;;  %v4019_v56 = vadd.f32 %v3995_v40, %v11240_v58  ;;  %v4495_v15 = vmax.f32 %v9090_v9, %v9212_v5 }
 0x2aa   : > { %v4275_v14 = vadd.f32 %v4251_v2, %v11241_v4  ;;  %v4558_v38 = vmax.f32 %v4494_v25, %v9084_v13  ;;  %v4714_v12 = vpack.c.bf16 %v4685_v59, %v4684_v34  ;;  %v3600_v55 = vmax.f32 %v3536_v52, %v11242_v18 }
 0x2ab   : > { %v4178_v8 = vmax.f32 %v4050_v45, %v4146_v35  ;;  %v9250_v3 = vmax.f32 %v3599_v57, %v8406_v53  ;;  %v4051_v26 = vmax.f32 %v9206_v16, %v4019_v56  ;;  %v4559_v60 = vmax.f32 %v4495_v15, %v9086_v41 }
 0x2ac   : > { %v4084_v40 = vrot.slane %v9216_v28, 7  ;;  %v4340_v2 = vrot.slane %v9216_v28, 6  ;;  %5634 = vmatprep.mubr.msk.bf16.mxu0 %vm2488_vm15, %v4714_v12  ;;  %v9258_v25 = vmax.f32 %v3600_v55, %v8399_v37 }
 0x2ad   : > { %v4306_v58 = vmax.f32 %v4178_v8, %v4252_v61  ;;  %v3957_v35 = vrot.slane %v9250_v3, 1  ;;  %v4085_v52 = vrot.slane %v9250_v3, 7  ;;  %v4179_v53 = vmax.f32 %v4051_v26, %v4124_v21  ;;  %v11243_v61 = vld [vmem:[#allocation58_spill] sm:$0xff]  ;;  %v11244_v26 = vld [vmem:[#allocation111_spill] sm:$0xff] }
 0x2ae   : > { %v4123_v57 = vsel %vm1859_vm7, %v4083_v48, %v4084_v40  ;;  %v4213_v34 = vrot.slane %v9250_v3, 2  ;;  %v4341_v59 = vrot.slane %v9250_v3, 6  ;;  %v3958_v56 = vrot.slane %v9258_v25, 1 }
 0x2af   : > { %v9266_v45 = vmax.f32 %v4306_v58, %v4402_v0  ;;  %v3994_v37 = vsel %vm1730_vm6, %v3956_v23, %v3957_v35  ;;  %v4122_v55 = vsel %vm1859_vm7, %v4084_v40, %v4085_v52  ;;  %v4307_v8 = vmax.f32 %v4179_v53, %v4275_v14 }
 0x2b0   : > { %v4052_v21 = vmax.f32 %v9216_v28, %v3994_v37  ;;  %v4148_v4 = vadd.f32 %v4123_v57, %v11243_v61  ;;  %v4214_v48 = vrot.slane %v9258_v25, 2  ;;  %v3993_v0 = vsel %vm1730_vm6, %v3957_v35, %v3958_v56  ;;  %v11245_v57 = vld [vmem:[#allocation112_spill] sm:$0xff] }
 0x2b1   : > { %v4622_v15 = vmax.f32 %v4558_v38, %v9266_v45  ;;  %v4250_v23 = vsel %vm1988_vm8, %v4212_v50, %v4213_v34  ;;  %v4378_v12 = vsel %vm2117_vm9, %v4340_v2, %v4341_v59  ;;  %v9285_v14 = vmax.f32 %v4307_v8, %v4380_v36 }
 0x2b2   : > { %v4021_v40 = vadd.f32 %v3993_v0, %v11244_v26  ;;  %v4180_v58 = vmax.f32 %v4052_v21, %v4148_v4  ;;  %v4249_v53 = vsel %vm1988_vm8, %v4213_v34, %v4214_v48  ;;  %v4379_v35 = vsel %vm2117_vm9, %v4339_v62, %v4340_v2  ;;  %v11246_v0 = vld [vmem:[#allocation47_spill] sm:$0xff] }
 0x2b3   : > { %v4686_v38 = vmax.f32 %v4622_v15, %v9082_v54  ;;  %v4277_v37 = vadd.f32 %v4249_v53, %v11245_v57  ;;  %v4496_v50 = vmax.f32 %v9201_v30, %v9266_v45  ;;  %v4623_v61 = vmax.f32 %v4559_v60, %v9285_v14 }
 0x2b4   : > { %v4053_v36 = vmax.f32 %v9250_v3, %v4021_v40  ;;  %v4308_v8 = vmax.f32 %v4180_v58, %v4250_v23  ;;  %v4404_v21 = vadd.f32 %v4379_v35, %v11246_v0  ;;  %v4497_v34 = vmax.f32 %v9212_v5, %v9285_v14 }
 0x2b5   : > { %v4560_v4 = vmax.f32 %v4496_v50, %v9088_v22  ;;  %v3682_v15 = vpack.c.bf16 %v8779_v27, %v8789_v6  ;;  %v3473_v62 = vmax.f32 %v11233_v20, %v11237_v39  ;;  %v4687_v2 = vmax.f32 %v4623_v61, %v9078_v46  ;;  %v11247_v50 = vld [vmem:[#allocation110_spill] sm:$0xff]  ;;  %v11252_v46 = vld [vmem:[#allocation95_spill] sm:$0xff] }
 0x2b6   : > { %v4181_v26 = vmax.f32 %v4053_v36, %v4122_v55  ;;  %v9307_v60 = vmax.f32 %v4308_v8, %v4404_v21  ;;  %v3474_v23 = vmax.f32 %v11234_v31, %v11242_v18  ;;  %v4561_v40 = vmax.f32 %v4497_v34, %v9090_v9 }
 0x2b7   : > { %5596 = vmatprep.mubr.msk.bf16.mxu1 %vm2488_vm15, %v3682_v15  ;;  %v3537_v58 = vmax.f32 %v3473_v62, %v8500_v11  ;;  %v4086_v53 = vrot.slane %v9258_v25, 7  ;;  %v4342_v27 = vrot.slane %v9258_v25, 6  ;;  %v4715_v6 = vpack.c.bf16 %v4687_v2, %v4686_v38 }
 0x2b8   : > { %v4309_v57 = vmax.f32 %v4181_v26, %v4277_v37  ;;  %v4624_v35 = vmax.f32 %v4560_v4, %v9307_v60  ;;  %v3538_v55 = vmax.f32 %v3474_v23, %v11220_v44  ;;  %v4498_v0 = vmax.f32 %v9266_v45, %v9307_v60  ;;  %v11248_v37 = vld [vmem:[#allocation81_spill] sm:$0xff] }
 0x2b9   : > { %v3601_v61 = vmax.f32 %v3537_v58, %v11247_v50  ;;  %v4121_v36 = vsel %vm1859_vm7, %v4085_v52, %v4086_v53  ;;  %v4377_v8 = vsel %vm2117_vm9, %v4341_v59, %v4342_v27  ;;  %5635 = vmatmul.mubr.msk.bf16.gmra.mxu0 %vm2488_vm15, %v4715_v6  ;;  %v11249_v4 = vld [vmem:[#allocation41_spill] sm:$0xff]  ;;  %v3475_v26 = vmax.f32 %v11237_v39, %v11247_v50 }
 0x2ba   : > { %v9326_v21 = vmax.f32 %v4309_v57, %v4378_v12  ;;  %v4688_v38 = vmax.f32 %v4624_v35, %v9084_v13  ;;  %v3602_v34 = vmax.f32 %v3538_v55, %v11248_v37  ;;  %v4150_v15 = vadd.f32 %v4121_v36, %v11249_v4  ;;  %v11250_v52 = vld [vmem:[#allocation101_spill] sm:$0xff] }
 0x2bb   : > { %v9332_v62 = vmax.f32 %v3601_v61, %v11181_v49  ;;  %v4406_v2 = vadd.f32 %v4377_v8, %v11250_v52  ;;  %v4562_v59 = vmax.f32 %v4498_v0, %v9201_v30  ;;  %v3476_v58 = vmax.f32 %v11242_v18, %v11248_v37 }
 0x2bc   : > { %v4625_v23 = vmax.f32 %v4561_v40, %v9326_v21  ;;  %v9340_v12 = vmax.f32 %v3602_v34, %v11182_v33  ;;  %v4499_v13 = vmax.f32 %v9285_v14, %v9326_v21 }
 0x2bd   : > { %v3959_v49 = vrot.slane %v9332_v62, 1  ;;  %v4087_v6 = vrot.slane %v9332_v62, 7  ;;  %v4215_v57 = vrot.slane %v9332_v62, 2  ;;  %v4343_v35 = vrot.slane %v9332_v62, 6 }
 0x2be   : > { %v4689_v55 = vmax.f32 %v4625_v23, %v9086_v41  ;;  %v3960_v40 = vrot.slane %v9340_v12, 1  ;;  %v4216_v33 = vrot.slane %v9340_v12, 2  ;;  %v4563_v61 = vmax.f32 %v4499_v13, %v9212_v5  ;;  %v11251_v13 = vld [vmem:[#allocation93_spill] sm:$0xff] }
 0x2bf   : > { %v3992_v36 = vsel %vm1730_vm6, %v3958_v56, %v3959_v49  ;;  %v4120_v8 = vsel %vm1859_vm7, %v4086_v53, %v4087_v6  ;;  %v4248_v0 = vsel %vm1988_vm8, %v4214_v48, %v4215_v57  ;;  %v4376_v41 = vsel %vm2117_vm9, %v4342_v27, %v4343_v35 }
 0x2c0   : > { %v4716_v34 = vpack.c.bf16 %v4689_v55, %v4688_v38  ;;  %v3991_v4 = vsel %vm1730_vm6, %v3959_v49, %v3960_v40  ;;  %v4054_v52 = vmax.f32 %v9258_v25, %v3992_v36  ;;  %v4247_v23 = vsel %vm1988_vm8, %v4215_v57, %v4216_v33  ;;  %v11253_v36 = vld [vmem:[#allocation105_spill] sm:$0xff] }
 0x2c1   : > { %v4023_v56 = vadd.f32 %v3991_v4, %v11251_v13  ;;  %v4279_v54 = vadd.f32 %v4247_v23, %v11252_v46  ;;  %v3539_v53 = vmax.f32 %v3475_v26, %v11233_v20  ;;  %v3540_v48 = vmax.f32 %v3476_v58, %v11234_v31  ;;  %v11254_v13 = vld [vmem:[#allocation108_spill] sm:$0xff] }
 0x2c2   : > { %5638 = vmatprep.mubr.msk.bf16.mxu0 %vm2488_vm15, %v4716_v34  ;;  %v4182_v27 = vmax.f32 %v4054_v52, %v4150_v15  ;;  %v4088_v38 = vrot.slane %v9340_v12, 7  ;;  %v4344_v49 = vrot.slane %v9340_v12, 6  ;;  %v3683_v55 = vpack.c.bf16 %v8784_v24, %v8782_v47 }
 0x2c3   : > { %v4055_v57 = vmax.f32 %v9332_v62, %v4023_v56  ;;  %v3603_v4 = vmax.f32 %v3539_v53, %v11253_v36  ;;  %v3604_v46 = vmax.f32 %v3540_v48, %v11254_v13  ;;  %v3684_v26 = vpack.c.bf16 %v8792_v63, %v8787_v51  ;;  %v11255_v51 = vld [vmem:[#allocation94_spill] sm:$0xff] }
 0x2c4   : > { %v4310_v58 = vmax.f32 %v4182_v27, %v4248_v0  ;;  %v4119_v15 = vsel %vm1859_vm7, %v4087_v6, %v4088_v38  ;;  %v4375_v34 = vsel %vm2117_vm9, %v4343_v35, %v4344_v49  ;;  %5597 = vmatmul.mubr.msk.bf16.vlgmr.msra.gmra.mxu1 %vm2488_vm15, %v3683_v55  ;;  %v3477_v47 = vmax.f32 %v11247_v50, %v11253_v36  ;;  %v11256_v0 = vld [vmem:[#allocation96_spill] sm:$0xff] }
 0x2c5   : > { %v4183_v24 = vmax.f32 %v4055_v57, %v4120_v8  ;;  %v9391_v52 = vmax.f32 %v3603_v4, %v8500_v11  ;;  %v9394_v23 = vmax.f32 %v3604_v46, %v11220_v44  ;;  %v4152_v63 = vadd.f32 %v4119_v15, %v11255_v51  ;;  %5600 = vmatprep.mubr.msk.bf16.mxu1 %vm2488_vm15, %v3684_v26  ;;  %v11258_v51 = vld [vmem:[#allocation8_spill] sm:$0xff] }
 0x2c6   : > { %v9398_v6 = vmax.f32 %v4310_v58, %v4406_v2  ;;  %v4408_v35 = vadd.f32 %v4375_v34, %v11256_v0  ;;  %v3478_v56 = vmax.f32 %v11248_v37, %v11254_v13  ;;  %v3541_v53 = vmax.f32 %v3477_v47, %v11237_v39 }
 0x2c7   : > { %v4311_v8 = vmax.f32 %v4183_v24, %v4279_v54  ;;  %v3961_v11 = vrot.slane %v9391_v52, 1  ;;  %v3962_v48 = vrot.slane %v9394_v23, 1  ;;  %v4089_v44 = vrot.slane %v9391_v52, 7 }
 0x2c8   : > { %v4626_v27 = vmax.f32 %v4562_v59, %v9398_v6  ;;  %v4217_v55 = vrot.slane %v9391_v52, 2  ;;  %v4218_v2 = vrot.slane %v9394_v23, 2  ;;  %v4345_v57 = vrot.slane %v9391_v52, 6  ;;  %v11257_v59 = vld [vmem:[#allocation6_spill] sm:$0xff] }
 0x2c9   : > { %v9411_v4 = vmax.f32 %v4311_v8, %v4376_v41  ;;  %v3989_v46 = vsel %vm1730_vm6, %v3961_v11, %v3962_v48  ;;  %v3990_v54 = vsel %vm1730_vm6, %v3960_v40, %v3961_v11  ;;  %v4118_v26 = vsel %vm1859_vm7, %v4088_v38, %v4089_v44 }
 0x2ca   : > { %v4690_v58 = vmax.f32 %v4626_v27, %v9088_v22  ;;  %v4025_v15 = vadd.f32 %v3989_v46, %v11257_v59  ;;  %v4056_v34 = vmax.f32 %v9340_v12, %v3990_v54  ;;  %v4245_v47 = vsel %vm1988_vm8, %v4217_v55, %v4218_v2  ;;  %v11259_v46 = vld [vmem:[#allocation75_spill] sm:$0xff] }
 0x2cb   : > { %v4627_v41 = vmax.f32 %v4563_v61, %v9411_v4  ;;  %v4246_v24 = vsel %vm1988_vm8, %v4216_v33, %v4217_v55  ;;  %v4281_v0 = vadd.f32 %v4245_v47, %v11258_v51  ;;  %v4374_v40 = vsel %vm2117_vm9, %v4344_v49, %v4345_v57 }
 0x2cc   : > { %v4057_v38 = vmax.f32 %v9391_v52, %v4025_v15  ;;  %v4184_v22 = vmax.f32 %v4056_v34, %v4152_v63  ;;  %v4500_v8 = vmax.f32 %v9307_v60, %v9398_v6  ;;  %v4501_v11 = vmax.f32 %v9326_v21, %v9411_v4  ;;  %v11260_v34 = vld [vmem:[#allocation102_spill] sm:$0xff] }
 0x2cd   : > { %v4691_v27 = vmax.f32 %v4627_v41, %v9090_v9  ;;  %v3542_v61 = vmax.f32 %v3478_v56, %v11242_v18  ;;  %v3605_v33 = vmax.f32 %v3541_v53, %v11259_v46  ;;  %v4090_v55 = vrot.slane %v9394_v23, 7  ;;  %v11261_v53 = vld [vmem:[#allocation7_spill] sm:$0xff] }
 0x2ce   : > { %v4185_v54 = vmax.f32 %v4057_v38, %v4118_v26  ;;  %v4312_v59 = vmax.f32 %v4184_v22, %v4246_v24  ;;  %v4564_v49 = vmax.f32 %v4500_v8, %v9266_v45  ;;  %v4565_v63 = vmax.f32 %v4501_v11, %v9285_v14 }
 0x2cf   : > { %v4717_v15 = vpack.c.bf16 %v4691_v27, %v4690_v58  ;;  %v3606_v47 = vmax.f32 %v3542_v61, %v11260_v34  ;;  %v9443_v51 = vmax.f32 %v3605_v33, %v11233_v20  ;;  %v4117_v9 = vsel %vm1859_vm7, %v4089_v44, %v4090_v55 }
 0x2d0   : > { %v4313_v56 = vmax.f32 %v4185_v54, %v4281_v0  ;;  %v9447_v41 = vmax.f32 %v4312_v59, %v4408_v35  ;;  %v4154_v10 = vadd.f32 %v4117_v9, %v11261_v53  ;;  %v4346_v26 = vrot.slane %v9394_v23, 6  ;;  %v11262_v59 = vld [vmem:[#allocation9_spill] sm:$0xff]  ;;  %v11264_v9 = vld [vmem:[#allocation16_spill] sm:$0xff] }
 0x2d1   : > { %5639 = vmatmul.mubr.msk.bf16.gmra.mxu0 %vm2488_vm15, %v4717_v15  ;;  %v9453_v24 = vmax.f32 %v3606_v47, %v11234_v31  ;;  %v3963_v58 = vrot.slane %v9443_v51, 1  ;;  %v4091_v20 = vrot.slane %v9443_v51, 7  ;;  %v4219_v38 = vrot.slane %v9443_v51, 2  ;;  %v11263_v15 = vld [vmem:[#allocation14_spill] sm:$0xff] }
 0x2d2   : > { %v9458_v22 = vmax.f32 %v4313_v56, %v4374_v40  ;;  %v4628_v35 = vmax.f32 %v4564_v49, %v9447_v41  ;;  %v4347_v44 = vrot.slane %v9443_v51, 6  ;;  %v4373_v0 = vsel %vm2117_vm9, %v4345_v57, %v4346_v26 }
 0x2d3   : > { %v3964_v8 = vrot.slane %v9453_v24, 1  ;;  %v3988_v31 = vsel %vm1730_vm6, %v3962_v48, %v3963_v58  ;;  %v4116_v11 = vsel %vm1859_vm7, %v4090_v55, %v4091_v20  ;;  %v4220_v27 = vrot.slane %v9453_v24, 2 }
 0x2d4   : > { %v4629_v40 = vmax.f32 %v4565_v63, %v9458_v22  ;;  %v4692_v61 = vmax.f32 %v4628_v35, %v9201_v30  ;;  %v4058_v33 = vmax.f32 %v9394_v23, %v3988_v31  ;;  %v4244_v54 = vsel %vm1988_vm8, %v4218_v2, %v4219_v38 }
 0x2d5   : > { %v3987_v57 = vsel %vm1730_vm6, %v3963_v58, %v3964_v8  ;;  %v4243_v48 = vsel %vm1988_vm8, %v4219_v38, %v4220_v27  ;;  %v4372_v55 = vsel %vm2117_vm9, %v4346_v26, %v4347_v44  ;;  %v4410_v49 = vadd.f32 %v4373_v0, %v11262_v59  ;;  %v11265_v59 = vld [vmem:[#allocation87_spill] sm:$0xff] }
 0x2d6   : > { %v4693_v63 = vmax.f32 %v4629_v40, %v9212_v5  ;;  %v4027_v30 = vadd.f32 %v3987_v57, %v11263_v15  ;;  %v4186_v47 = vmax.f32 %v4058_v33, %v4154_v10  ;;  %v4283_v56 = vadd.f32 %v4243_v48, %v11264_v9  ;;  %v11266_v15 = vld [vmem:[#allocation104_spill] sm:$0xff] }
 0x2d7   : > { %v4502_v2 = vmax.f32 %v9398_v6, %v9447_v41  ;;  %v4503_v53 = vmax.f32 %v9411_v4, %v9458_v22  ;;  %v3479_v58 = vmax.f32 %v11253_v36, %v11259_v46  ;;  %v3480_v26 = vmax.f32 %v11254_v13, %v11260_v34 }
 0x2d8   : > { %v4718_v38 = vpack.c.bf16 %v4693_v63, %v4692_v61  ;;  %v4059_v5 = vmax.f32 %v9443_v51, %v4027_v30  ;;  %v4314_v35 = vmax.f32 %v4186_v47, %v4244_v54  ;;  %v4092_v10 = vrot.slane %v9453_v24, 7  ;;  %v11267_v47 = vld [vmem:[#allocation15_spill] sm:$0xff] }
 0x2d9   : > { %v4566_v0 = vmax.f32 %v4502_v2, %v9307_v60  ;;  %v4567_v31 = vmax.f32 %v4503_v53, %v9326_v21  ;;  %v3543_v40 = vmax.f32 %v3479_v58, %v11247_v50  ;;  %v3544_v33 = vmax.f32 %v3480_v26, %v11248_v37 }
 0x2da   : > { %5642 = vmatprep.mubr.msk.bf16.mxu0 %vm2488_vm15, %v4718_v38  ;;  %v4187_v57 = vmax.f32 %v4059_v5, %v4116_v11  ;;  %v9500_v48 = vmax.f32 %v4314_v35, %v4410_v49  ;;  %v4115_v61 = vsel %vm1859_vm7, %v4091_v20, %v4092_v10  ;;  %v4348_v54 = vrot.slane %v9453_v24, 6  ;;  %v11268_v38 = vld [vmem:[#allocation18_spill] sm:$0xff] }
 0x2db   : > { %v3607_v63 = vmax.f32 %v3543_v40, %v11265_v59  ;;  %v3608_v30 = vmax.f32 %v3544_v33, %v11266_v15  ;;  %v4156_v9 = vadd.f32 %v4115_v61, %v11267_v47  ;;  %v3685_v2 = vpack.c.bf16 %v8798_v29, %v8795_v42 }
 0x2dc   : > { %v4315_v53 = vmax.f32 %v4187_v57, %v4283_v56  ;;  %v4630_v58 = vmax.f32 %v4566_v0, %v9500_v48  ;;  %v4371_v11 = vsel %vm2117_vm9, %v4347_v44, %v4348_v54  ;;  %v4504_v20 = vmax.f32 %v9447_v41, %v9500_v48 }
 0x2dd   : > { %v9516_v49 = vmax.f32 %v3607_v63, %v11237_v39  ;;  %v9519_v26 = vmax.f32 %v3608_v30, %v11242_v18  ;;  %v4412_v5 = vadd.f32 %v4371_v11, %v11268_v38  ;;  %5601 = vmatmul.mubr.msk.bf16.gmra.mxu1 %vm2488_vm15, %v3685_v2  ;;  %v3686_v42 = vpack.c.bf16 %v9137_v17, %v8801_v7  ;;  %v11269_v30 = vld [vmem:[#allocation23_spill] sm:$0xff] }
 0x2de   : > { %v9525_v29 = vmax.f32 %v4315_v53, %v4372_v55  ;;  %v4694_v44 = vmax.f32 %v4630_v58, %v9266_v45  ;;  %v4568_v56 = vmax.f32 %v4504_v20, %v9398_v6  ;;  %v3481_v39 = vmax.f32 %v11259_v46, %v11265_v59  ;;  %v11270_v58 = vld [vmem:[#allocation25_spill] sm:$0xff] }
 0x2df   : > { %v3965_v35 = vrot.slane %v9516_v49, 1  ;;  %v3966_v18 = vrot.slane %v9519_v26, 1  ;;  %v4093_v0 = vrot.slane %v9516_v49, 7  ;;  %v4221_v40 = vrot.slane %v9516_v49, 2  ;;  %5604 = vmatprep.mubr.msk.bf16.mxu1 %vm2488_vm15, %v3686_v42 }
 0x2e0   : > { %v4631_v7 = vmax.f32 %v4567_v31, %v9525_v29  ;;  %v4222_v17 = vrot.slane %v9519_v26, 2  ;;  %v4349_v45 = vrot.slane %v9516_v49, 6  ;;  %v4505_v55 = vmax.f32 %v9458_v22, %v9525_v29 }
 0x2e1   : > { %v3985_v33 = vsel %vm1730_vm6, %v3965_v35, %v3966_v18  ;;  %v3986_v57 = vsel %vm1730_vm6, %v3964_v8, %v3965_v35  ;;  %v4114_v61 = vsel %vm1859_vm7, %v4092_v10, %v4093_v0  ;;  %v4242_v63 = vsel %vm1988_vm8, %v4220_v27, %v4221_v40 }
 0x2e2   : > { %v4695_v31 = vmax.f32 %v4631_v7, %v9285_v14  ;;  %v4029_v47 = vadd.f32 %v3985_v33, %v11269_v30  ;;  %v4060_v2 = vmax.f32 %v9453_v24, %v3986_v57  ;;  %v4241_v53 = vsel %vm1988_vm8, %v4221_v40, %v4222_v17  ;;  %v11271_v33 = vld [vmem:[#allocation50_spill] sm:$0xff] }
 0x2e3   : > { %v4285_v11 = vadd.f32 %v4241_v53, %v11270_v58  ;;  %v4370_v8 = vsel %vm2117_vm9, %v4348_v54, %v4349_v45  ;;  %v4569_v20 = vmax.f32 %v4505_v55, %v9411_v4  ;;  %v3482_v10 = vmax.f32 %v11260_v34, %v11266_v15 }
 0x2e4   : > { %v4719_v27 = vpack.c.bf16 %v4695_v31, %v4694_v44  ;;  %v4061_v14 = vmax.f32 %v9516_v49, %v4029_v47  ;;  %v4188_v38 = vmax.f32 %v4060_v2, %v4156_v9  ;;  %v3545_v42 = vmax.f32 %v3481_v39, %v11253_v36  ;;  %v11272_v31 = vld [vmem:[#allocation71_spill] sm:$0xff] }
 0x2e5   : > { %v3546_v35 = vmax.f32 %v3482_v10, %v11254_v13  ;;  %v4094_v40 = vrot.slane %v9519_v26, 7  ;;  %v4350_v7 = vrot.slane %v9519_v26, 6  ;;  %v3483_v54 = vmax.f32 %v11265_v59, %v11271_v33  ;;  %v11274_v10 = vld [vmem:[#allocation26_spill] sm:$0xff] }
 0x2e6   : > { %5643 = vmatmul.mubr.msk.bf16.gmra.mxu0 %vm2488_vm15, %v4719_v27  ;;  %v4189_v55 = vmax.f32 %v4061_v14, %v4114_v61  ;;  %v4316_v57 = vmax.f32 %v4188_v38, %v4242_v63  ;;  %v3609_v44 = vmax.f32 %v3545_v42, %v11271_v33  ;;  %v3484_v9 = vmax.f32 %v11266_v15, %v11272_v31  ;;  %v11273_v63 = vld [vmem:[#allocation24_spill] sm:$0xff] }
 0x2e7   : > { %v3610_v39 = vmax.f32 %v3546_v35, %v11272_v31  ;;  %v4113_v30 = vsel %vm1859_vm7, %v4093_v0, %v4094_v40  ;;  %v4369_v47 = vsel %vm2117_vm9, %v4349_v45, %v4350_v7  ;;  %v3547_v2 = vmax.f32 %v3483_v54, %v11259_v46  ;;  %v11275_v14 = vld [vmem:[#allocation72_spill] sm:$0xff] }
 0x2e8   : > { %v4317_v59 = vmax.f32 %v4189_v55, %v4285_v11  ;;  %v9577_v53 = vmax.f32 %v4316_v57, %v4412_v5  ;;  %v9580_v61 = vmax.f32 %v3609_v44, %v11247_v50  ;;  %v4158_v58 = vadd.f32 %v4113_v30, %v11273_v63 }
 0x2e9   : > { %v9584_v15 = vmax.f32 %v3610_v39, %v11248_v37  ;;  %v4414_v27 = vadd.f32 %v4369_v47, %v11274_v10  ;;  %v3548_v0 = vmax.f32 %v3484_v9, %v11260_v34  ;;  %v3611_v38 = vmax.f32 %v3547_v2, %v11275_v14  ;;  %v11277_v9 = vld [vmem:[#allocation37_spill] sm:$0xff]  ;;  %v11278_v2 = vld [vmem:[#allocation90_spill] sm:$0xff]  ;;  %v9626_v14 = vpop.f32.mrf.mxu0 }
 0x2ea   : > { %v9589_v45 = vmax.f32 %v4317_v59, %v4370_v8  ;;  %v4632_v46 = vmax.f32 %v4568_v56, %v9577_v53  ;;  %v3967_v5 = vrot.slane %v9580_v61, 1  ;;  %v4095_v50 = vrot.slane %v9580_v61, 7 }
 0x2eb   : > { %v3968_v11 = vrot.slane %v9584_v15, 1  ;;  %v4223_v42 = vrot.slane %v9580_v61, 2  ;;  %v4224_v37 = vrot.slane %v9584_v15, 2  ;;  %v4351_v35 = vrot.slane %v9580_v61, 6 }
 0x2ec   : > { %v4633_v34 = vmax.f32 %v4569_v20, %v9589_v45  ;;  %v4696_v33 = vmax.f32 %v4632_v46, %v9307_v60  ;;  %v3984_v8 = vsel %vm1730_vm6, %v3966_v18, %v3967_v5  ;;  %v4112_v56 = vsel %vm1859_vm7, %v4094_v40, %v4095_v50  ;;  %v11276_v60 = vld [vmem:[#allocation31_spill] sm:$0xff] }
 0x2ed   : > { %v3983_v54 = vsel %vm1730_vm6, %v3967_v5, %v3968_v11  ;;  %v4062_v55 = vmax.f32 %v9519_v26, %v3984_v8  ;;  %v4239_v57 = vsel %vm1988_vm8, %v4223_v42, %v4224_v37  ;;  %v4240_v44 = vsel %vm1988_vm8, %v4222_v17, %v4223_v42  ;;  %v11279_v8 = vld [vmem:[#allocation36_spill] sm:$0xff] }
 0x2ee   : > { %v4697_v20 = vmax.f32 %v4633_v34, %v9326_v21  ;;  %v4031_v31 = vadd.f32 %v3983_v54, %v11276_v60  ;;  %v4287_v18 = vadd.f32 %v4239_v57, %v11277_v9  ;;  %v4368_v40 = vsel %vm2117_vm9, %v4350_v7, %v4351_v35 }
 0x2ef   : > { %v4190_v39 = vmax.f32 %v4062_v55, %v4158_v58  ;;  %v4506_v30 = vmax.f32 %v9500_v48, %v9577_v53  ;;  %v4507_v47 = vmax.f32 %v9525_v29, %v9589_v45  ;;  %v3612_v59 = vmax.f32 %v3548_v0, %v11278_v2 }
 0x2f0   : > { %v4720_v63 = vpack.c.bf16 %v4697_v20, %v4696_v33  ;;  %v4063_v17 = vmax.f32 %v9580_v61, %v4031_v31  ;;  %v9623_v21 = vmax.f32 %v3611_v38, %v11253_v36  ;;  %v4096_v10 = vrot.slane %v9584_v15, 7  ;;  %v9648_v20 = vpop.f32.mrf.mxu0 }
 0x2f1   : > { %v4318_v7 = vmax.f32 %v4190_v39, %v4240_v44  ;;  %v4570_v58 = vmax.f32 %v4506_v30, %v9447_v41  ;;  %v4571_v46 = vmax.f32 %v4507_v47, %v9458_v22  ;;  %v9631_v5 = vmax.f32 %v3612_v59, %v11254_v13  ;;  %v11281_v59 = vld [vmem:[#allocation44_spill] sm:$0xff] }
 0x2f2   : > { %5646 = vmatprep.mubr.msk.bf16.mxu0 %vm2488_vm15, %v4720_v63  ;;  %v4191_v0 = vmax.f32 %v4063_v17, %v4112_v56  ;;  %v3969_v42 = vrot.slane %v9623_v21, 1  ;;  %v4097_v36 = vrot.slane %v9623_v21, 7  ;;  %v4111_v38 = vsel %vm1859_vm7, %v4095_v50, %v4096_v10 }
 0x2f3   : > { %v9638_v34 = vmax.f32 %v4318_v7, %v4414_v27  ;;  %v3970_v33 = vrot.slane %v9631_v5, 1  ;;  %v4160_v54 = vadd.f32 %v4111_v38, %v11279_v8  ;;  %v4225_v55 = vrot.slane %v9623_v21, 2 }
 0x2f4   : > { %v4319_v13 = vmax.f32 %v4191_v0, %v4287_v18  ;;  %v3982_v57 = vsel %vm1730_vm6, %v3968_v11, %v3969_v42  ;;  %v4110_v56 = vsel %vm1859_vm7, %v4096_v10, %v4097_v36  ;;  %v4226_v44 = vrot.slane %v9631_v5, 2  ;;  %v11280_v11 = vld [vmem:[#allocation42_spill] sm:$0xff] }
 0x2f5   : > { %v4634_v27 = vmax.f32 %v4570_v58, %v9638_v34  ;;  %v3981_v50 = vsel %vm1730_vm6, %v3969_v42, %v3970_v33  ;;  %v4064_v60 = vmax.f32 %v9584_v15, %v3982_v57  ;;  %v4238_v31 = vsel %vm1988_vm8, %v4224_v37, %v4225_v55  ;;  %v9671_v58 = vpop.f32.mrf.mxu0  ;;  %v11282_v42 = vld [vmem:[#allocation38_spill] sm:$0xff] }
 0x2f6   : > { %v9656_v9 = vmax.f32 %v4319_v13, %v4368_v40  ;;  %v4033_v18 = vadd.f32 %v3981_v50, %v11280_v11  ;;  %v4237_v39 = vsel %vm1988_vm8, %v4225_v55, %v4226_v44  ;;  %v4352_v30 = vrot.slane %v9584_v15, 6 }
 0x2f7   : > { %v4698_v47 = vmax.f32 %v4634_v27, %v9398_v6  ;;  %v4192_v2 = vmax.f32 %v4064_v60, %v4160_v54  ;;  %v4289_v63 = vadd.f32 %v4237_v39, %v11281_v59  ;;  %v4353_v17 = vrot.slane %v9623_v21, 6  ;;  %v9688_v60 = vpop.f32.mrf.mxu1 }
 0x2f8   : > { %v4635_v10 = vmax.f32 %v4571_v46, %v9656_v9  ;;  %v4065_v37 = vmax.f32 %v9623_v21, %v4033_v18  ;;  %v4367_v40 = vsel %vm2117_vm9, %v4351_v35, %v4352_v30  ;;  %v4508_v7 = vmax.f32 %v9577_v53, %v9638_v34 }
 0x2f9   : > { %v4320_v0 = vmax.f32 %v4192_v2, %v4238_v31  ;;  %v4366_v6 = vsel %vm2117_vm9, %v4352_v30, %v4353_v17  ;;  %v4416_v38 = vadd.f32 %v4367_v40, %v11282_v42  ;;  %v4509_v8 = vmax.f32 %v9589_v45, %v9656_v9 }
 0x2fa   : > { %v4699_v46 = vmax.f32 %v4635_v10, %v9411_v4  ;;  %v4193_v54 = vmax.f32 %v4065_v37, %v4110_v56  ;;  %v4572_v55 = vmax.f32 %v4508_v7, %v9500_v48  ;;  %v3687_v35 = vpack.c.bf16 %v9206_v16, %v9140_v1  ;;  %v9693_v1 = vpop.f32.mrf.mxu0 }
 0x2fb   : > { %v9682_v13 = vmax.f32 %v4320_v0, %v4416_v38  ;;  %v4573_v57 = vmax.f32 %v4509_v8, %v9525_v29  ;;  %v3688_v27 = vpack.c.bf16 %v9250_v3, %v9216_v28  ;;  %v3971_v50 = vrot.slane %v8804_v32, 1  ;;  %v11287_v8 = vld [vmem:[#allocation43_spill] sm:$0xff] }
 0x2fc   : > { %v4721_v31 = vpack.c.bf16 %v4699_v46, %v4698_v47  ;;  %v4321_v11 = vmax.f32 %v4193_v54, %v4289_v63  ;;  %5605 = vmatmul.mubr.msk.bf16.gmra.mxu1 %vm2488_vm15, %v3687_v35  ;;  %v4098_v4 = vrot.slane %v9631_v5, 7  ;;  %v4227_v56 = vrot.slane %v8804_v32, 2  ;;  %v11284_v47 = vld [vmem:[#allocation89_spill] sm:$0xff] }
 0x2fd   : > { %v4636_v16 = vmax.f32 %v4572_v55, %v9682_v13  ;;  %5608 = vmatprep.mubr.msk.bf16.mxu1 %vm2488_vm15, %v3688_v27  ;;  %v11283_v28 = vrot.slane %v8807_v43, 1  ;;  %v3980_v18 = vsel %vm1730_vm6, %v3970_v33, %v3971_v50  ;;  %v4354_v39 = vrot.slane %v9631_v5, 6  ;;  %v9728_v55 = vpop.f32.mrf.mxu0 }
 0x2fe   : > { %5647 = vmatmul.mubr.msk.bf16.gmra.mxu0 %vm2488_vm15, %v4721_v31  ;;  %v9705_v30 = vmax.f32 %v4321_v11, %v4366_v6  ;;  %v4066_v59 = vmax.f32 %v9631_v5, %v3980_v18  ;;  %v11285_v63 = vrot.slane %v8804_v32, 7  ;;  %v4109_v33 = vsel %vm1859_vm7, %v4097_v36, %v4098_v4  ;;  %v9722_v6 = vpop.f32.mrf.mxu1 }
 0x2ff   : > { %v3979_v3 = vsel %vm1730_vm6, %v3971_v50, %v11283_v28  ;;  %v4700_v37 = vmax.f32 %v4636_v16, %v9447_v41  ;;  %v11286_v40 = vrot.slane %v8807_v43, 2  ;;  %v4236_v0 = vsel %vm1988_vm8, %v4226_v44, %v4227_v56  ;;  %v11288_v41 = vld [vmem:[#allocation33_spill] sm:$0xff] }
 0x300   : > { %v4035_v2 = vadd.f32 %v3979_v3, %v11284_v47  ;;  %v4108_v10 = vsel %vm1859_vm7, %v4098_v4, %v11285_v63  ;;  %v4637_v42 = vmax.f32 %v4573_v57, %v9705_v30  ;;  %v4162_v46 = vadd.f32 %v4109_v33, %v11287_v8  ;;  %v11290_v4 = vld [vmem:[#allocation57_spill] sm:$0xff]  ;;  %v9748_v3 = vpop.f32.mrf.mxu1  ;;  %v11292_v63 = vld [vmem:[#allocation79_spill] sm:$0xff]  ;;  %v11293_v33 = vld [vmem:[#allocation78_spill] sm:$0xff] }
 0x301   : > { %v4235_v7 = vsel %vm1988_vm8, %v4227_v56, %v11286_v40  ;;  %v11289_v36 = vrot.slane %v8804_v32, 6  ;;  %v4365_v44 = vsel %vm2117_vm9, %v4353_v17, %v4354_v39  ;;  %v4510_v27 = vmax.f32 %v9638_v34, %v9682_v13  ;;  %v11294_v40 = vld [vmem:[#allocation67_spill] sm:$0xff] }
 0x302   : > { %v4067_v38 = vmax.f32 %v8804_v32, %v4035_v2  ;;  %v4291_v54 = vadd.f32 %v4235_v7, %v11288_v41  ;;  %v4511_v57 = vmax.f32 %v9656_v9, %v9705_v30  ;;  %v4701_v50 = vmax.f32 %v4637_v42, %v9458_v22  ;;  %v11291_v22 = vld [vmem:[#allocation64_spill] sm:$0xff] }
 0x303   : > { %v4364_v35 = vsel %vm2117_vm9, %v4354_v39, %v11289_v36  ;;  %v4194_v31 = vmax.f32 %v4066_v59, %v4162_v46  ;;  %v4418_v56 = vadd.f32 %v4365_v44, %v11290_v4  ;;  %v4574_v16 = vmax.f32 %v4510_v27, %v9577_v53  ;;  %v9751_v59 = vpop.f32.mrf.mxu0  ;;  %v11297_v46 = vld [vmem:[#allocation39_spill] sm:$0xff]  ;;  %v9770_v36 = vpop.f32.mrf.mxu1 }
 0x304   : > { %v4195_v11 = vmax.f32 %v4067_v38, %v4108_v10  ;;  %v4575_v28 = vmax.f32 %v4511_v57, %v9589_v45  ;;  %v3689_v19 = vpack.c.bf16 %v9332_v62, %v9258_v25  ;;  %v3690_v17 = vpack.c.bf16 %v9391_v52, %v9340_v12  ;;  %v11295_v25 = vld [vmem:[#allocation77_spill] sm:$0xff]  ;;  %v11296_v62 = vld [vmem:[#allocation56_spill] sm:$0xff] }
 0x305   : > { %v4722_v18 = vpack.c.bf16 %v4701_v50, %v4700_v37  ;;  %v4322_v39 = vmax.f32 %v4194_v31, %v4236_v0  ;;  %v4486_v2 = vadd.f32 -inf, %v11291_v22  ;;  %v4487_v10 = vadd.f32 -inf, %v11292_v63  ;;  %v9774_v27 = vpop.f32.mrf.mxu0 }
 0x306   : > { %v4323_v47 = vmax.f32 %v4195_v11, %v4291_v54  ;;  %5609 = vmatmul.mubr.msk.bf16.gmra.mxu1 %vm2488_vm15, %v3689_v19  ;;  %v4516_v7 = vmax.f32 %v11294_v40, %v11293_v33  ;;  %v4517_v42 = vmax.f32 %v11296_v62, %v11295_v25  ;;  %v3691_v12 = vpack.c.bf16 %v9443_v51, %v9394_v23  ;;  %v9784_v19 = vpop.f32.mrf.mxu1 }
 0x307   : > { %5650 = vmatprep.mubr.msk.bf16.mxu0 %vm2488_vm15, %v4722_v18  ;;  %v4450_v52 = vmax.f32 %v4322_v39, %v4418_v56  ;;  %5612 = vmatprep.mubr.msk.bf16.mxu1 %vm2488_vm15, %v3690_v17  ;;  %v3692_v0 = vpack.c.bf16 %v9516_v49, %v9453_v24  ;;  %v4518_v38 = vmax.f32 %v11293_v33, %v4486_v2  ;;  %v4614_v41 = vadd.f32 -inf, %v11297_v46 }
 0x308   : > { %v4451_v37 = vmax.f32 %v4323_v47, %v4364_v35  ;;  %v4519_v8 = vmax.f32 %v11295_v25, %v4487_v10  ;;  %v3693_v54 = vpack.c.bf16 %v9580_v61, %v9519_v26  ;;  %v9804_v46 = vpop.f32.mrf.mxu1  ;;  %vm5205_vm6 = vcmask 64512  }
 0x309   : > { %v4638_v23 = vmax.f32 %v4574_v16, %v4450_v52  ;;  %v4512_v35 = vmax.f32 %v9682_v13, %v4450_v52  ;;  %v4514_v24 = vmax.f32 %v4450_v52, %v11294_v40  ;;  %v4580_v57 = vmax.f32 %v4516_v7, %v4450_v52 }
 0x30a   : > { %v4639_v51 = vmax.f32 %v4575_v28, %v4451_v37  ;;  %v4513_v44 = vmax.f32 %v9705_v30, %v4451_v37  ;;  %v4515_v49 = vmax.f32 %v4451_v37, %v11296_v62  ;;  %v4581_v50 = vmax.f32 %v4517_v42, %v4451_v37  ;;  %v11298_v42 = vld [vmem:[#allocation65_spill] sm:$0xff] }
 0x30b   : > { %v4702_v31 = vmax.f32 %v4638_v23, %v9500_v48  ;;  %v4576_v61 = vmax.f32 %v4512_v35, %v9638_v34  ;;  %v4578_v4 = vmax.f32 %v4514_v24, %v9682_v13  ;;  %v4644_v16 = vmax.f32 %v4580_v57, %v4486_v2  ;;  %v11301_v57 = vld [vmem:[#allocation32_spill] sm:$0xff] }
 0x30c   : > { %v4703_v26 = vmax.f32 %v4639_v51, %v9525_v29  ;;  %v4577_v11 = vmax.f32 %v4513_v44, %v9656_v9  ;;  %v4579_v56 = vmax.f32 %v4515_v49, %v9705_v30  ;;  %v4645_v28 = vmax.f32 %v4581_v50, %v4487_v10  ;;  %v9789_v29 = vpop.f32.mrf.mxu0  ;;  %v11300_v49 = vld [vmem:[#allocation40_spill] sm:$0xff] }
 0x30d   : > { %v4640_v18 = vmax.f32 %v4576_v61, %v11294_v40  ;;  %v4582_v48 = vmax.f32 %v4518_v38, %v11294_v40  ;;  %v4642_v47 = vmax.f32 %v4578_v4, %v11293_v33  ;;  %v4708_v63 = vmax.f32 %v4644_v16, %v9682_v13 }
 0x30e   : > { %v4723_v17 = vpack.c.bf16 %v4703_v26, %v4702_v31  ;;  %v4641_v39 = vmax.f32 %v4577_v11, %v11296_v62  ;;  %v4643_v22 = vmax.f32 %v4579_v56, %v11295_v25  ;;  %v4709_v2 = vmax.f32 %v4645_v28, %v9705_v30  ;;  %5613 = vmatmul.mubr.msk.bf16.gmra.mxu1 %vm2488_vm15, %v3691_v12 }
 0x30f   : > { %v4704_v10 = vmax.f32 %v4640_v18, %v9577_v53  ;;  %5616 = vmatprep.mubr.msk.bf16.mxu1 %vm2488_vm15, %v3692_v0  ;;  %v4583_v40 = vmax.f32 %v4519_v8, %v11296_v62  ;;  %v4615_v33 = vadd.f32 -inf, %v11298_v42  ;;  %v4706_v25 = vmax.f32 %v4642_v47, %v9638_v34  ;;  %v9811_v8 = vpop.f32.mrf.mxu1 }
 0x310   : > { %5651 = vmatmul.mubr.msk.bf16.gmra.mxu0 %vm2488_vm15, %v4723_v17  ;;  %v4705_v7 = vmax.f32 %v4641_v39, %v9589_v45  ;;  %v4707_v13 = vmax.f32 %v4643_v22, %v9656_v9  ;;  %v4726_v38 = vpack.c.bf16 %v4709_v2, %v4708_v63  ;;  %v4646_v30 = vmax.f32 %v4582_v48, %v4614_v41  ;;  %v9808_v45 = vpop.f32.mrf.mxu0  ;;  %v11299_v41 = vld [vmem:[#allocation61_spill] sm:$0xff] }
 0x311   : > { %v4647_v23 = vmax.f32 %v4583_v40, %v4615_v33  ;;  %v3694_v53 = vpack.c.bf16 %v9623_v21, %v9584_v15  ;;  %v9819_v15 = vpop.f32.mrf.mxu1  ;;  %v3696_v35 = vpack.c.bf16 %v11299_v41, %v8807_v43 }
 0x312   : > { %v4724_v12 = vpack.c.bf16 %v4705_v7, %v4704_v10  ;;  %v4725_v0 = vpack.c.bf16 %v4707_v13, %v4706_v25  ;;  %v4710_v51 = vmax.f32 %v4646_v30, %v4450_v52  ;;  %v9813_v9 = vpop.f32.mrf.mxu0  ;;  %v3695_v52 = vpack.c.bf16 %v8804_v32, %v9631_v5 }
 0x313   : > { %v4711_v62 = vmax.f32 %v4647_v23, %v4451_v37  ;;  %v9825_v37 = vpop.f32.mrf.mxu1  ;;  %v3697_v32 = vpack.c.bf16 %v11301_v57, %v11300_v49 }
 0x314   : > { %5654 = vmatprep.mubr.msk.bf16.mxu0 %vm2488_vm15, %v4724_v12  ;;  %v9821_v21 = vpop.f32.mrf.mxu0 }
 0x315   : > { %v4727_v34 = vpack.c.bf16 %v4711_v62, %v4710_v51 }
 0x316   : > { %5617 = vmatmul.mubr.msk.bf16.gmra.mxu1 %vm2488_vm15, %v3693_v54  ;;  %v9829_v44 = vpop.f32.mrf.mxu0  ;;  %v9834_v54 = vpop.f32.mrf.mxu1 }
 0x317   : > { %5620 = vmatprep.mubr.msk.bf16.mxu1 %vm2488_vm15, %v3694_v53 }
 0x318   : > { %5655 = vmatmul.mubr.msk.bf16.gmra.mxu0 %vm2488_vm15, %v4725_v0  ;;  %v9836_v24 = vpop.f32.mrf.mxu0  ;;  %v9840_v5 = vpop.f32.mrf.mxu1 }
 0x319   : > { %5658 = vmatprep.mubr.msk.bf16.mxu0 %vm2488_vm15, %v4726_v38 }
 0x31a   : > { %v9842_v50 = vpop.f32.mrf.mxu0  ;;  %v9845_v43 = vpop.f32.mrf.mxu1 }
 0x31c   : > { %v9847_v31 = vpop.f32.mrf.mxu0  ;;  %v9849_v26 = vpop.f32.mrf.mxu1 }
 0x31e   : > { %5621 = vmatmul.mubr.msk.bf16.gmra.mxu1 %vm2488_vm15, %v3695_v52  ;;  %v9851_v61 = vpop.f32.mrf.mxu0  ;;  %v9853_v11 = vpop.f32.mrf.mxu1 }
 0x31f   : > { %5624 = vmatprep.mubr.msk.bf16.mxu1 %vm2488_vm15, %v3696_v35 }
 0x320   : > { %5659 = vmatmul.mubr.msk.bf16.gmra.mxu0 %vm2488_vm15, %v4727_v34  ;;  %v9855_v4 = vpop.f32.mrf.mxu0  ;;  %v9857_v56 = vpop.f32.mrf.mxu1 }
 0x322   : > { %v9859_v16 = vpop.f32.mrf.mxu0  ;;  %v9861_v28 = vpop.f32.mrf.mxu1 }
 0x324   : > { %v9863_v17 = vpop.f32.mrf.mxu0  ;;  %v9865_v18 = vpop.f32.mrf.mxu1 }
 0x326   : > { %5625 = vmatmul.mubr.msk.bf16.gmra.mxu1 %vm2488_vm15, %v3697_v32  ;;  %v9867_v39 = vpop.f32.mrf.mxu0  ;;  %v9869_v48 = vpop.f32.mrf.mxu1 }
 0x328   : > { %v9871_v47 = vpop.f32.mrf.mxu0  ;;  %v9873_v22 = vpop.f32.mrf.mxu1 }
 0x32a   : > { %v9875_v63 = vpop.f32.mrf.mxu0  ;;  %v9877_v2 = vpop.f32.mrf.mxu1 }
 0x32c   : > { %v9879_v10 = vpop.f32.mrf.mxu0  ;;  %v9881_v7 = vpop.f32.mrf.mxu1 }
 0x32e   : > { %v9883_v40 = vpop.f32.mrf.mxu0  ;;  %v9885_v42 = vpop.f32.mrf.mxu1 }
 0x330   : > { %v9887_v33 = vpop.f32.mrf.mxu0  ;;  %v9889_v25 = vpop.f32.mrf.mxu1 }
 0x331   : > { %11302 = vst [vmem:[#allocation83_spill] sm:$0xff] %v9887_v33 }
 0x332   : > { %v9891_v13 = vpop.f32.mrf.mxu0  ;;  %v9893_v38 = vpop.f32.mrf.mxu1 }
 0x333   : > { %11303 = vst [vmem:[#allocation86_spill] sm:$0xff] %v9891_v13 }
 0x334   : > { %v9895_v30 = vpop.f32.mrf.mxu0 }
 0x335   : > { %11304 = vst [vmem:[#allocation88_spill] sm:$0xff] %v9895_v30 }
 0x336   : > { %v9899_v23 = vpop.f32.mrf.mxu0 }
 0x337   : > { %11306 = vst [vmem:[#allocation82_spill] sm:$0xff] %v9899_v23 }
 0x338   : > { %v9905_v51 = vpop.f32.mrf.mxu0 }
 0x339   : > { %11309 = vst [vmem:[#allocation60_spill] sm:$0xff] %v9905_v51  ;;  %v2796_v51 = vadd.f32 %v9626_v14, %v9688_v60  ;;  %v2791_v14 = vadd.f32 %v9693_v1, %v9770_v36 }
 0x33a   : > { %v9909_v34 = vpop.f32.mrf.mxu0 }
 0x33b   : > { %11311 = vst [vmem:[#allocation70_spill] sm:$0xff] %v9909_v34  ;;  %v2788_v34 = vadd.f32 %v9648_v20, %v9722_v6 }
 0x33c   : > { %v9913_v41 = vpop.f32.mrf.mxu0 }
 0x33d   : > { %11313 = vst [vmem:[#allocation10_spill] sm:$0xff] %v9913_v41  ;;  %v9928_v41 = vld [vmem:[%s10286_s4] ss:$0 sm:$0xff] }
 0x33e   : > { %v2902_v57 = vpop.f32.mrf.mxu0 }
 0x359   : > { %v9897_v12 = vpop.f32.mrf.mxu1 }
 0x35a   : > { %11305 = vst [vmem:[#allocation106_spill] sm:$0xff] %v9897_v12 }
 0x35b   : > { %v9901_v53 = vpop.f32.mrf.mxu1  ;;  %v5632_v30 = vpop.f32.mrf.mxu0 }
 0x35c   : > { %11307 = vst [vmem:[#allocation55_spill] sm:$0xff] %v9901_v53 }
 0x35d   : > { %v9903_v0 = vpop.f32.mrf.mxu1 }
 0x35e   : > { %11308 = vst [vmem:[#allocation62_spill] sm:$0xff] %v9903_v0  ;;  %v4815_v0 = vpop.f32.mrf.mxu0 }
 0x35f   : > { %v9907_v62 = vpop.f32.mrf.mxu1 }
 0x360   : > { %11310 = vst [vmem:[#allocation76_spill] sm:$0xff] %v9907_v62  ;;  %v5633_v13 = vpop.f32.mrf.mxu0 }
 0x364   : > { %v9911_v52 = vpop.f32.mrf.mxu1 }
 0x365   : > { %11312 = vst [vmem:[#allocation97_spill] sm:$0xff] %v9911_v52 }
 0x366   : > { %v9915_v35 = vpop.f32.mrf.mxu1 }
 0x367   : > { %11314 = vst [vmem:[#allocation2_spill] sm:$0xff] %v9915_v35 }
 0x368   : > { %v9917_v49 = vpop.f32.mrf.mxu1 }
 0x369   : > { %11315 = vst [vmem:[#allocation19_spill] sm:$0xff] %v9917_v49 }
 0x36a   : > { %v2690_v32 = vpop.f32.mrf.mxu1 }
 0x36b   : > { %v9919_v23 = vadd.f32 %v2902_v57, %v2690_v32  ;;  %v2799_v57 = vadd.f32 %v9671_v58, %v9748_v3 }
 0x36d   : > { %11316 = vst [vmem:[#allocation27_spill] sm:$0xff] %v9919_v23 }
 0x384   : > { %v5598_v62 = vpop.f32.mrf.mxu1 }
 0x385   : > { %v3914_v52 = vadd.f32 %v5598_v62, %v2796_v51  ;;  %v4818_v51 = vpop.f32.mrf.mxu0 }
 0x386   : > { %v3785_v49 = vpop.f32.mrf.mxu1 }
 0x387   : > { %v4944_v32 = vadd.f32 %v5632_v30, %v3914_v52  ;;  %v3912_v23 = vadd.f32 %v3785_v49, %v2788_v34  ;;  %v5636_v36 = vpop.f32.mrf.mxu0 }
 0x388   : > { %v5599_v35 = vpop.f32.mrf.mxu1 }
 0x389   : > { %v9935_v60 = vadd.f32 %v9928_v41, %v4944_v32  ;;  %v4942_v20 = vadd.f32 %v4815_v0, %v3912_v23  ;;  %v3915_v6 = vadd.f32 %v5599_v35, %v2799_v57  ;;  %v4831_v49 = vpop.f32.mrf.mxu0 }
 0x38a   : > { %v3788_v62 = vpop.f32.mrf.mxu1 }
 0x38b   : > { %v5015_v53 = vsub.f32 0.0, %v9935_v60  ;;  %v9939_v33 = vadd.f32 %v9928_v41, %v4942_v20  ;;  %v4945_v12 = vadd.f32 %v5633_v13, %v3915_v6  ;;  %v3913_v58 = vadd.f32 %v3788_v62, %v2791_v14  ;;  %v5637_v57 = vpop.f32.mrf.mxu0 }
 0x38c   : > { %v2812_v14 = vadd.f32 %v9728_v55, %v9784_v19  ;;  %v2804_v62 = vadd.f32 %v9751_v59, %v9804_v46 }
 0x38d   : > { %v5049_v3 = vmul.f32 1.442695, %v5015_v53  ;;  %v5013_v30 = vsub.f32 0.0, %v9939_v33  ;;  %v9943_v34 = vadd.f32 %v9928_v41, %v4945_v12  ;;  %v4943_v1 = vadd.f32 %v4818_v51, %v3913_v58  ;;  %v4834_v12 = vpop.f32.mrf.mxu0 }
 0x38f   : > { %5823 = vpow2.f32 %v5049_v3  ;;  %v5045_v23 = vmul.f32 1.442695, %v5013_v30  ;;  %v5016_v0 = vsub.f32 0.0, %v9943_v34  ;;  %v9947_v52 = vadd.f32 %v9928_v41, %v4943_v1 }
 0x391   : > { %5825 = vpow2.f32 %v5045_v23  ;;  %v5051_v35 = vmul.f32 1.442695, %v5016_v0  ;;  %v5014_v13 = vsub.f32 0.0, %v9947_v52  ;;  %v9954_v58 = vpop.f32.mrf.mxu0  ;;  %v2815_v0 = vadd.f32 %v9774_v27, %v9811_v8 }
 0x393   : > { %5827 = vpow2.f32 %v5051_v35  ;;  %v5047_v53 = vmul.f32 1.442695, %v5014_v13  ;;  %v9960_v59 = vpop.f32.mrf.mxu0 }
 0x395   : > { %5829 = vpow2.f32 %v5047_v53 }
 0x39c   : > { %v5824_v32 = vpop.eup %5823 }
 0x39d   : > { %v5111_v20 = vadd.f32 1.0, %v5824_v32  ;;  %v5602_v6 = vpop.f32.mrf.mxu1  ;;  %v2807_v32 = vadd.f32 %v9789_v29, %v9819_v15  ;;  %v9969_v29 = vpop.f32.mrf.mxu0 }
 0x39e   : > { %v5826_v51 = vpop.eup %5825  ;;  %v3918_v3 = vadd.f32 %v5602_v6, %v2812_v14 }
 0x39f   : > { %5831 = vrcp.f32 %v5111_v20  ;;  %v5109_v30 = vadd.f32 1.0, %v5826_v51  ;;  %v3801_v1 = vpop.f32.mrf.mxu1 }
 0x3a0   : > { %v5828_v23 = vpop.eup %5827  ;;  %v4948_v35 = vadd.f32 %v5636_v36, %v3918_v3  ;;  %v3916_v13 = vadd.f32 %v3801_v1, %v2804_v62 }
 0x3a1   : > { %5833 = vrcp.f32 %v5109_v30  ;;  %v5112_v55 = vadd.f32 1.0, %v5828_v23  ;;  %v5603_v19 = vpop.f32.mrf.mxu1 }
 0x3a2   : > { %v5830_v53 = vpop.eup %5829  ;;  %v9963_v46 = vadd.f32 %v9928_v41, %v4948_v35  ;;  %v4946_v14 = vadd.f32 %v4831_v49, %v3916_v13  ;;  %v3919_v20 = vadd.f32 %v5603_v19, %v2815_v0 }
 0x3a3   : > { %5835 = vrcp.f32 %v5112_v55  ;;  %v5110_v6 = vadd.f32 1.0, %v5830_v53  ;;  %v3804_v27 = vpop.f32.mrf.mxu1 }
 0x3a4   : > { %v5019_v8 = vsub.f32 0.0, %v9963_v46  ;;  %v9967_v36 = vadd.f32 %v9928_v41, %v4946_v14  ;;  %v4949_v51 = vadd.f32 %v5637_v57, %v3919_v20  ;;  %v3917_v62 = vadd.f32 %v3804_v27, %v2807_v32  ;;  %v4850_v57 = vpop.f32.mrf.mxu0 }
 0x3a5   : > { %5837 = vrcp.f32 %v5110_v6 }
 0x3a6   : > { %v5057_v15 = vmul.f32 1.442695, %v5019_v8  ;;  %v5017_v3 = vsub.f32 0.0, %v9967_v36  ;;  %v9973_v49 = vadd.f32 %v9928_v41, %v4949_v51  ;;  %v4947_v30 = vadd.f32 %v4834_v12, %v3917_v62  ;;  %v9987_v32 = vpop.f32.mrf.mxu0 }
 0x3a8   : > { %5839 = vpow2.f32 %v5057_v15  ;;  %v5053_v1 = vmul.f32 1.442695, %v5017_v3  ;;  %v5020_v23 = vsub.f32 0.0, %v9973_v49  ;;  %v9977_v0 = vadd.f32 %v9928_v41, %v4947_v30  ;;  %v9995_v8 = vpop.f32.mrf.mxu0 }
 0x3aa   : > { %5841 = vpow2.f32 %v5053_v1  ;;  %v5059_v35 = vmul.f32 1.442695, %v5020_v23  ;;  %v5018_v13 = vsub.f32 0.0, %v9977_v0  ;;  %v10002_v15 = vpop.f32.mrf.mxu0 }
 0x3ac   : > { %v5832_v55 = vpop.eup %5831  ;;  %5843 = vpow2.f32 %v5059_v35  ;;  %v5055_v12 = vmul.f32 1.442695, %v5018_v13  ;;  %v10004_v1 = vpop.f32.mrf.mxu0  ;;  %v2828_v35 = vadd.f32 %v9808_v45, %v9825_v37  ;;  %v2823_v45 = vadd.f32 %v9829_v44, %v9845_v43 }
 0x3ad   : > { %v5175_v19 = vmul.f32 %v5832_v55, %v9935_v60  ;;  %v2820_v55 = vadd.f32 %v9813_v9, %v9834_v54  ;;  %v2844_v44 = vadd.f32 %v9836_v24, %v9849_v26 }
 0x3ae   : > { %v5834_v53 = vpop.eup %5833  ;;  %5845 = vpow2.f32 %v5055_v12 }
 0x3af   : > { %5208 = vst.msk [vmem:[%s9984_s20 + $0x10] sm:$0xff] %vm5205_vm6, %v5175_v19  ;;  %v5173_v14 = vmul.f32 %v5834_v53, %v9939_v33 }
 0x3b0   : > { %v5836_v20 = vpop.eup %5835 }
 0x3b1   : > { %5206 = vst.msk [vmem:[%s9984_s20] sm:$0xff] %vm5205_vm6, %v5173_v14  ;;  %v5176_v6 = vmul.f32 %v5836_v20, %v9943_v34  ;;  %v2831_v14 = vadd.f32 %v9821_v21, %v9840_v5 }
 0x3b2   : > { %v5838_v27 = vpop.eup %5837 }
 0x3b3   : > { %5209 = vst.msk [vmem:[%s9984_s20 + $0x18] sm:$0xff] %vm5205_vm6, %v5176_v6  ;;  %v5174_v60 = vmul.f32 %v5838_v27, %v9947_v52 }
 0x3b5   : > { %v5840_v51 = vpop.eup %5839  ;;  %5207 = vst.msk [vmem:[%s9984_s20 + $0x8] sm:$0xff] %vm5205_vm6, %v5174_v60 }
 0x3b6   : > { %v5115_v62 = vadd.f32 1.0, %v5840_v51 }
 0x3b7   : > { %v5842_v3 = vpop.eup %5841 }
 0x3b8   : > { %5847 = vrcp.f32 %v5115_v62  ;;  %v5113_v33 = vadd.f32 1.0, %v5842_v3 }
 0x3b9   : > { %v5844_v30 = vpop.eup %5843 }
 0x3ba   : > { %5849 = vrcp.f32 %v5113_v33  ;;  %v5116_v34 = vadd.f32 1.0, %v5844_v30 }
 0x3bb   : > { %v5846_v23 = vpop.eup %5845 }
 0x3bc   : > { %5851 = vrcp.f32 %v5116_v34  ;;  %v5114_v52 = vadd.f32 1.0, %v5846_v23  ;;  %v5606_v13 = vpop.f32.mrf.mxu1  ;;  %v2836_v23 = vadd.f32 %v9842_v50, %v9853_v11  ;;  %v2839_v50 = vadd.f32 %v9851_v61, %v9861_v28 }
 0x3bd   : > { %v3922_v12 = vadd.f32 %v5606_v13, %v2828_v35 }
 0x3be   : > { %v10010_v19 = vpop.f32.mrf.mxu0  ;;  %5853 = vrcp.f32 %v5114_v52  ;;  %v3817_v53 = vpop.f32.mrf.mxu1 }
 0x3bf   : > { %v4952_v20 = vadd.f32 %v9954_v58, %v3922_v12  ;;  %v3920_v6 = vadd.f32 %v3817_v53, %v2820_v55  ;;  %v2860_v53 = vadd.f32 %v9855_v4, %v9865_v18  ;;  %v2852_v4 = vadd.f32 %v9859_v16, %v9869_v48 }
 0x3c0   : > { %v5607_v27 = vpop.f32.mrf.mxu1  ;;  %v10021_v60 = vpop.f32.mrf.mxu0  ;;  %v2863_v18 = vadd.f32 %v9863_v17, %v9873_v22  ;;  %v2855_v16 = vadd.f32 %v9867_v39, %v9877_v2  ;;  %v2876_v17 = vadd.f32 %v9871_v47, %v9881_v7  ;;  %v10089_v39 = vadd.f32 %v9879_v10, %v9889_v25  ;;  %v11319_v10 = vld [vmem:[#allocation55_spill] sm:$0xff]  ;;  %v11320_v25 = vld [vmem:[#allocation86_spill] sm:$0xff] }
 0x3c1   : > { %v10018_v37 = vadd.f32 %v9928_v41, %v4952_v20  ;;  %v4950_v9 = vadd.f32 %v9960_v59, %v3920_v6  ;;  %v3923_v54 = vadd.f32 %v5607_v27, %v2831_v14  ;;  %v10093_v47 = vadd.f32 %v9883_v40, %v9893_v38 }
 0x3c2   : > { %v3820_v51 = vpop.f32.mrf.mxu1  ;;  %v10039_v52 = vpop.f32.mrf.mxu0 }
 0x3c3   : > { %v5023_v62 = vsub.f32 0.0, %v10018_v37  ;;  %v10025_v21 = vadd.f32 %v9928_v41, %v4950_v9  ;;  %v4953_v5 = vadd.f32 %v9969_v29, %v3923_v54  ;;  %v3921_v58 = vadd.f32 %v3820_v51, %v2823_v45 }
 0x3c4   : > { %v2847_v29 = vadd.f32 %v9847_v31, %v9857_v56  ;;  %v10057_v28 = vpop.f32.mrf.mxu0 }
 0x3c5   : > { %v5848_v43 = vpop.eup %5847  ;;  %v5065_v3 = vmul.f32 1.442695, %v5023_v62  ;;  %v5021_v33 = vsub.f32 0.0, %v10025_v21  ;;  %v10032_v59 = vadd.f32 %v9928_v41, %v4953_v5  ;;  %v4951_v30 = vadd.f32 %v4850_v57, %v3921_v58 }
 0x3c6   : > { %v5610_v34 = vpop.f32.mrf.mxu1  ;;  %v5179_v35 = vmul.f32 %v5848_v43, %v9963_v46 }
 0x3c7   : > { %v3926_v24 = vadd.f32 %v5610_v34, %v2844_v44  ;;  %v5850_v26 = vpop.eup %5849  ;;  %5855 = vpow2.f32 %v5065_v3  ;;  %v5061_v13 = vmul.f32 1.442695, %v5021_v33  ;;  %v5024_v55 = vsub.f32 0.0, %v10032_v59 }
 0x3c8   : > { %v10043_v57 = vadd.f32 %v9928_v41, %v4951_v30  ;;  %v3833_v12 = vpop.f32.mrf.mxu1  ;;  %5212 = vst.msk [vmem:[%s9984_s20 + $0x30] sm:$0xff] %vm5205_vm6, %v5179_v35  ;;  %v5177_v31 = vmul.f32 %v5850_v26, %v9967_v36 }
 0x3c9   : > { %v4956_v11 = vadd.f32 %v9987_v32, %v3926_v24  ;;  %v3924_v56 = vadd.f32 %v3833_v12, %v2836_v23  ;;  %v5852_v46 = vpop.eup %5851  ;;  %5857 = vpow2.f32 %v5061_v13  ;;  %v5067_v14 = vmul.f32 1.442695, %v5024_v55  ;;  %v11317_v23 = vld [vmem:[#allocation106_spill] sm:$0xff]  ;;  %v11322_v55 = vld [vmem:[#allocation88_spill] sm:$0xff] }
 0x3ca   : > { %v5022_v20 = vsub.f32 0.0, %v10043_v57  ;;  %v5611_v6 = vpop.f32.mrf.mxu1  ;;  %5210 = vst.msk [vmem:[%s9984_s20 + $0x20] sm:$0xff] %vm5205_vm6, %v5177_v31  ;;  %v5180_v61 = vmul.f32 %v5852_v46, %v9973_v49  ;;  %v11321_v13 = vld [vmem:[#allocation62_spill] sm:$0xff] }
 0x3cb   : > { %v10060_v36 = vadd.f32 %v9928_v41, %v4956_v11  ;;  %v4954_v32 = vadd.f32 %v9995_v8, %v3924_v56  ;;  %v3927_v27 = vadd.f32 %v5611_v6, %v2847_v29  ;;  %v5854_v45 = vpop.eup %5853  ;;  %5859 = vpow2.f32 %v5067_v14  ;;  %v11324_v31 = vld [vmem:[#allocation82_spill] sm:$0xff] }
 0x3cc   : > { %v5063_v9 = vmul.f32 1.442695, %v5022_v20  ;;  %v3836_v54 = vpop.f32.mrf.mxu1  ;;  %5213 = vst.msk [vmem:[%s9984_s20 + $0x38] sm:$0xff] %vm5205_vm6, %v5180_v61  ;;  %v5178_v49 = vmul.f32 %v5854_v45, %v9977_v0  ;;  %v10104_v29 = vadd.f32 %v11320_v25, %v11319_v10  ;;  %v10114_v12 = vadd.f32 %v11322_v55, %v11321_v13  ;;  %v11326_v45 = vld [vmem:[#allocation60_spill] sm:$0xff] }
 0x3cd   : > { %v5027_v51 = vsub.f32 0.0, %v10060_v36  ;;  %v10072_v8 = vadd.f32 %v9928_v41, %v4954_v32  ;;  %v4957_v62 = vadd.f32 %v10002_v15, %v3927_v27  ;;  %v3925_v48 = vadd.f32 %v3836_v54, %v2839_v50  ;;  %v11323_v50 = vld [vmem:[#allocation76_spill] sm:$0xff]  ;;  %v11325_v27 = vld [vmem:[#allocation97_spill] sm:$0xff] }
 0x3ce   : > { %5861 = vpow2.f32 %v5063_v9  ;;  %v5614_v22 = vpop.f32.mrf.mxu1  ;;  %5211 = vst.msk [vmem:[%s9984_s20 + $0x28] sm:$0xff] %vm5205_vm6, %v5178_v49  ;;  %v2868_v15 = vadd.f32 %v9875_v63, %v9885_v42  ;;  %v11318_v63 = vld [vmem:[#allocation83_spill] sm:$0xff]  ;;  %v10118_v11 = vadd.f32 %v11324_v31, %v11323_v50 }
 0x3cf   : > { %v5073_v0 = vmul.f32 1.442695, %v5027_v51  ;;  %v5025_v58 = vsub.f32 0.0, %v10072_v8  ;;  %v10083_v44 = vadd.f32 %v9928_v41, %v4957_v62  ;;  %v3930_v43 = vadd.f32 %v5614_v22, %v2860_v53 }
 0x3d0   : > { %v5652_v5 = vpop.f32.mrf.mxu0  ;;  %v4955_v2 = vadd.f32 %v10004_v1, %v3925_v48  ;;  %v3849_v7 = vpop.f32.mrf.mxu1  ;;  %v10100_v42 = vadd.f32 %v11318_v63, %v11317_v23 }
 0x3d1   : > { %5863 = vpow2.f32 %v5073_v0  ;;  %v5069_v33 = vmul.f32 1.442695, %v5025_v58  ;;  %v5028_v30 = vsub.f32 0.0, %v10083_v44  ;;  %v4960_v34 = vadd.f32 %v10010_v19, %v3930_v43  ;;  %v11328_v0 = vld [vmem:[#allocation70_spill] sm:$0xff] }
 0x3d2   : > { %v4895_v3 = vpop.f32.mrf.mxu0  ;;  %v10107_v40 = vadd.f32 %v9928_v41, %v4955_v2  ;;  %v3928_v38 = vadd.f32 %v3849_v7, %v2852_v4  ;;  %v5615_v1 = vpop.f32.mrf.mxu1  ;;  %v10126_v4 = vadd.f32 %v11326_v45, %v11325_v27 }
 0x3d3   : > { %5865 = vpow2.f32 %v5069_v33  ;;  %v5075_v24 = vmul.f32 1.442695, %v5028_v30  ;;  %v10110_v26 = vadd.f32 %v9928_v41, %v4960_v34  ;;  %v3931_v19 = vadd.f32 %v5615_v1, %v2863_v18 }
 0x3d4   : > { %v5653_v35 = vpop.f32.mrf.mxu0  ;;  %v5026_v56 = vsub.f32 0.0, %v10107_v40  ;;  %v4958_v46 = vadd.f32 %v10021_v60, %v3928_v38  ;;  %v3852_v53 = vpop.f32.mrf.mxu1 }
 0x3d5   : > { %v5856_v14 = vpop.eup %5855  ;;  %5867 = vpow2.f32 %v5075_v24  ;;  %v5031_v6 = vsub.f32 0.0, %v10110_v26  ;;  %v4961_v61 = vadd.f32 %v10039_v52, %v3931_v19  ;;  %v3929_v32 = vadd.f32 %v3852_v53, %v2855_v16  ;;  %v11327_v16 = vld [vmem:[#allocation2_spill] sm:$0xff] }
 0x3d6   : > { %v4898_v20 = vpop.f32.mrf.mxu0  ;;  %v5119_v18 = vadd.f32 1.0, %v5856_v14  ;;  %v5071_v9 = vmul.f32 1.442695, %v5026_v56  ;;  %v10129_v54 = vadd.f32 %v9928_v41, %v4958_v46  ;;  %v5618_v49 = vpop.f32.mrf.mxu1  ;;  %v10137_v58 = vadd.f32 %v11328_v0, %v11327_v16  ;;  %v11329_v14 = vld [vmem:[#allocation19_spill] sm:$0xff] }
 0x3d7   : > { %v5858_v60 = vpop.eup %5857  ;;  %v5081_v62 = vmul.f32 1.442695, %v5031_v6  ;;  %v10132_v48 = vadd.f32 %v9928_v41, %v4961_v61  ;;  %v4959_v22 = vadd.f32 %v10057_v28, %v3929_v32  ;;  %v3934_v52 = vadd.f32 %v5618_v49, %v2876_v17  ;;  %v11330_v6 = vld [vmem:[#allocation10_spill] sm:$0xff] }
 0x3d8   : > { %v5656_v51 = vpop.f32.mrf.mxu0  ;;  %5869 = vrcp.f32 %v5119_v18  ;;  %v5117_v43 = vadd.f32 1.0, %v5858_v60  ;;  %v5029_v2 = vsub.f32 0.0, %v10129_v54  ;;  %v3865_v7 = vpop.f32.mrf.mxu1  ;;  %v10153_v61 = vadd.f32 %v11330_v6, %v11329_v14 }
 0x3d9   : > { %v5860_v33 = vpop.eup %5859  ;;  %5871 = vpow2.f32 %v5071_v9  ;;  %v5032_v34 = vsub.f32 0.0, %v10132_v48  ;;  %v10142_v23 = vadd.f32 %v9928_v41, %v4959_v22  ;;  %v4964_v63 = vadd.f32 %v5652_v5, %v3934_v52 }
 0x3da   : > { %v4911_v30 = vpop.f32.mrf.mxu0  ;;  %5873 = vrcp.f32 %v5117_v43  ;;  %v5120_v28 = vadd.f32 1.0, %v5860_v33  ;;  %v5077_v17 = vmul.f32 1.442695, %v5029_v2  ;;  %v3932_v10 = vadd.f32 %v3865_v7, %v2868_v15  ;;  %v5619_v25 = vpop.f32.mrf.mxu1 }
 0x3db   : > { %v5862_v38 = vpop.eup %5861  ;;  %5875 = vpow2.f32 %v5081_v62  ;;  %v5083_v1 = vmul.f32 1.442695, %v5032_v34  ;;  %v5030_v24 = vsub.f32 0.0, %v10142_v23  ;;  %v10146_v19 = vadd.f32 %v9928_v41, %v4964_v63 }
 0x3dc   : > { %5877 = vrcp.f32 %v5120_v28  ;;  %v5118_v13 = vadd.f32 1.0, %v5862_v38  ;;  %v5657_v55 = vpop.f32.mrf.mxu0  ;;  %v4962_v50 = vadd.f32 %v4895_v3, %v3932_v10  ;;  %v3935_v31 = vadd.f32 %v5619_v25, %v10089_v39  ;;  %v3868_v5 = vpop.f32.mrf.mxu1 }
 0x3dd   : > { %5879 = vpow2.f32 %v5077_v17  ;;  %v5079_v56 = vmul.f32 1.442695, %v5030_v24  ;;  %v5035_v15 = vsub.f32 0.0, %v10146_v19  ;;  %v3933_v46 = vadd.f32 %v3868_v5, %v10093_v47 }
 0x3de   : > { %v5864_v53 = vpop.eup %5863  ;;  %5881 = vrcp.f32 %v5118_v13  ;;  %v10156_v32 = vadd.f32 %v9928_v41, %v4962_v50  ;;  %v4965_v27 = vadd.f32 %v5653_v35, %v3935_v31  ;;  %v5622_v3 = vpop.f32.mrf.mxu1 }
 0x3df   : > { %v5123_v45 = vadd.f32 1.0, %v5864_v53  ;;  %5883 = vpow2.f32 %v5083_v1  ;;  %v5089_v39 = vmul.f32 1.442695, %v5035_v15  ;;  %v4963_v18 = vadd.f32 %v4898_v20, %v3933_v46  ;;  %v4914_v49 = vpop.f32.mrf.mxu0 }
 0x3e0   : > { %v5866_v9 = vpop.eup %5865  ;;  %5885 = vpow2.f32 %v5079_v56  ;;  %v5033_v47 = vsub.f32 0.0, %v10156_v32  ;;  %v10160_v60 = vadd.f32 %v9928_v41, %v4965_v27  ;;  %v3938_v62 = vadd.f32 %v5622_v3, %v10100_v42  ;;  %v3881_v22 = vpop.f32.mrf.mxu1 }
 0x3e1   : > { %5887 = vrcp.f32 %v5123_v45  ;;  %v5121_v52 = vadd.f32 1.0, %v5866_v9  ;;  %v10164_v35 = vadd.f32 %v9928_v41, %v4963_v18  ;;  %v3936_v16 = vadd.f32 %v3881_v22, %v10104_v29  ;;  %v5660_v63 = vpop.f32.mrf.mxu0 }
 0x3e2   : > { %v5868_v0 = vpop.eup %5867  ;;  %5889 = vpow2.f32 %v5089_v39  ;;  %v5085_v20 = vmul.f32 1.442695, %v5033_v47  ;;  %v5036_v43 = vsub.f32 0.0, %v10160_v60  ;;  %v4968_v2 = vadd.f32 %v5656_v51, %v3938_v62  ;;  %v5623_v7 = vpop.f32.mrf.mxu1 }
 0x3e3   : > { %5891 = vrcp.f32 %v5121_v52  ;;  %v5124_v33 = vadd.f32 1.0, %v5868_v0  ;;  %v5034_v34 = vsub.f32 0.0, %v10164_v35  ;;  %v4966_v42 = vadd.f32 %v4911_v30, %v3936_v16  ;;  %v4927_v53 = vpop.f32.mrf.mxu0 }
 0x3e4   : > { %5893 = vpow2.f32 %v5085_v20  ;;  %v5091_v28 = vmul.f32 1.442695, %v5036_v43  ;;  %v10170_v17 = vadd.f32 %v9928_v41, %v4968_v2  ;;  %v3939_v29 = vadd.f32 %v5623_v7, %v10114_v12  ;;  %v3884_v10 = vpop.f32.mrf.mxu1 }
 0x3e5   : > { %v5870_v25 = vpop.eup %5869  ;;  %5895 = vrcp.f32 %v5124_v33  ;;  %v5087_v38 = vmul.f32 1.442695, %v5034_v34  ;;  %v10174_v51 = vadd.f32 %v9928_v41, %v4966_v42  ;;  %v3937_v1 = vadd.f32 %v3884_v10, %v10118_v11  ;;  %v5661_v20 = vpop.f32.mrf.mxu0 }
 0x3e6   : > { %v5872_v24 = vpop.eup %5871  ;;  %v5183_v30 = vmul.f32 %v5870_v25, %v10018_v37  ;;  %5897 = vpow2.f32 %v5091_v28  ;;  %v5039_v13 = vsub.f32 0.0, %v10170_v17  ;;  %v4969_v50 = vadd.f32 %v5657_v55, %v3939_v29  ;;  %v5626_v31 = vpop.f32.mrf.mxu1 }
 0x3e7   : > { %v5874_v5 = vpop.eup %5873  ;;  %v5122_v12 = vadd.f32 1.0, %v5872_v24  ;;  %5899 = vpow2.f32 %v5087_v38  ;;  %v5037_v56 = vsub.f32 0.0, %v10174_v51  ;;  %v4967_v15 = vadd.f32 %v4914_v49, %v3937_v1  ;;  %v11331_v38 = vld [vmem:[#allocation27_spill] sm:$0xff] }
 0x3e8   : > { %v5876_v46 = vpop.eup %5875  ;;  %5216 = vst.msk [vmem:[%s9984_s20 + $0x50] sm:$0xff] %vm5205_vm6, %v5183_v30  ;;  %v5181_v11 = vmul.f32 %v5874_v5, %v10025_v21  ;;  %v5097_v14 = vmul.f32 1.442695, %v5039_v13  ;;  %v10184_v37 = vadd.f32 %v9928_v41, %v4969_v50  ;;  %v3942_v55 = vadd.f32 %v5626_v31, %v10126_v4  ;;  %v3897_v6 = vpop.f32.mrf.mxu1 }
 0x3e9   : > { %v5878_v27 = vpop.eup %5877  ;;  %5901 = vrcp.f32 %v5122_v12  ;;  %v5127_v3 = vadd.f32 1.0, %v5876_v46  ;;  %v5093_v45 = vmul.f32 1.442695, %v5037_v56  ;;  %v10188_v39 = vadd.f32 %v9928_v41, %v4967_v15  ;;  %v4930_v13 = vpop.f32.mrf.mxu0 }
 0x3ea   : > { %v5880_v18 = vpop.eup %5879  ;;  %5214 = vst.msk [vmem:[%s9984_s20 + $0x40] sm:$0xff] %vm5205_vm6, %v5181_v11  ;;  %v5184_v21 = vmul.f32 %v5878_v27, %v10032_v59  ;;  %5903 = vpow2.f32 %v5097_v14  ;;  %v5040_v9 = vsub.f32 0.0, %v10184_v37  ;;  %v4972_v49 = vadd.f32 %v5660_v63, %v3942_v55  ;;  %v5627_v47 = vpop.f32.mrf.mxu1 }
 0x3eb   : > { %v5882_v4 = vpop.eup %5881  ;;  %5905 = vrcp.f32 %v5127_v3  ;;  %v5125_v62 = vadd.f32 1.0, %v5880_v18  ;;  %v5038_v22 = vsub.f32 0.0, %v10188_v39  ;;  %v3940_v52 = vadd.f32 %v3897_v6, %v10137_v58 }
 0x3ec   : > { %v5884_v16 = vpop.eup %5883  ;;  %5217 = vst.msk [vmem:[%s9984_s20 + $0x58] sm:$0xff] %vm5205_vm6, %v5184_v21  ;;  %v5182_v0 = vmul.f32 %v5882_v4, %v10043_v57  ;;  %5907 = vpow2.f32 %v5093_v45  ;;  %v5099_v59 = vmul.f32 1.442695, %v5040_v9  ;;  %v10200_v43 = vadd.f32 %v9928_v41, %v4972_v49  ;;  %v3900_v2 = vpop.f32.mrf.mxu1 }
 0x3ed   : > { %v5886_v7 = vpop.eup %5885  ;;  %5909 = vrcp.f32 %v5125_v62  ;;  %v5128_v33 = vadd.f32 1.0, %v5884_v16  ;;  %v5095_v34 = vmul.f32 1.442695, %v5038_v22  ;;  %v4970_v42 = vadd.f32 %v4927_v53, %v3940_v52 }
 0x3ee   : > { %v5888_v63 = vpop.eup %5887  ;;  %5215 = vst.msk [vmem:[%s9984_s20 + $0x48] sm:$0xff] %vm5205_vm6, %v5182_v0  ;;  %v5126_v58 = vadd.f32 1.0, %v5886_v7  ;;  %5911 = vpow2.f32 %v5099_v59  ;;  %v5043_v57 = vsub.f32 0.0, %v10200_v43  ;;  %v3943_v28 = vadd.f32 %v5627_v47, %v10153_v61 }
 0x3ef   : > { %v5890_v29 = vpop.eup %5889  ;;  %v5187_v10 = vmul.f32 %v5888_v63, %v10060_v36  ;;  %5913 = vrcp.f32 %v5128_v33  ;;  %v10208_v25 = vadd.f32 %v9928_v41, %v4970_v42  ;;  %v3941_v1 = vadd.f32 %v3900_v2, %v11331_v38 }
 0x3f0   : > { %v5892_v24 = vpop.eup %5891  ;;  %5915 = vrcp.f32 %v5126_v58  ;;  %v5131_v30 = vadd.f32 1.0, %v5890_v29  ;;  %v5105_v50 = vmul.f32 1.442695, %v5043_v57  ;;  %v4973_v31 = vadd.f32 %v5661_v20, %v3943_v28 }
 0x3f1   : > { %v5894_v5 = vpop.eup %5893  ;;  %5220 = vst.msk [vmem:[%s9984_s20 + $0x70] sm:$0xff] %vm5205_vm6, %v5187_v10  ;;  %v5185_v61 = vmul.f32 %v5892_v24, %v10072_v8  ;;  %5917 = vpow2.f32 %v5095_v34  ;;  %v5041_v36 = vsub.f32 0.0, %v10208_v25  ;;  %v4971_v12 = vadd.f32 %v4930_v13, %v3941_v1 }
 0x3f2   : > { %v5896_v56 = vpop.eup %5895  ;;  %5919 = vrcp.f32 %v5131_v30  ;;  %v5129_v15 = vadd.f32 1.0, %v5894_v5  ;;  %v10216_v46 = vadd.f32 %v9928_v41, %v4973_v31 }
 0x3f3   : > { %v5898_v11 = vpop.eup %5897  ;;  %5218 = vst.msk [vmem:[%s9984_s20 + $0x60] sm:$0xff] %vm5205_vm6, %v5185_v61  ;;  %v5188_v53 = vmul.f32 %v5896_v56, %v10083_v44  ;;  %5921 = vpow2.f32 %v5105_v50  ;;  %v5101_v14 = vmul.f32 1.442695, %v5041_v36  ;;  %v10222_v8 = vadd.f32 %v9928_v41, %v4971_v12 }
 0x3f4   : > { %v5900_v55 = vpop.eup %5899  ;;  %5923 = vrcp.f32 %v5129_v15  ;;  %v5132_v6 = vadd.f32 1.0, %v5898_v11  ;;  %v5044_v27 = vsub.f32 0.0, %v10216_v46 }
 0x3f5   : > { %5221 = vst.msk [vmem:[%s9984_s20 + $0x78] sm:$0xff] %vm5205_vm6, %v5188_v53  ;;  %v5130_v3 = vadd.f32 1.0, %v5900_v55  ;;  %5925 = vpow2.f32 %v5101_v14  ;;  %v5042_v45 = vsub.f32 0.0, %v10222_v8 }
 0x3f6   : > { %v5902_v18 = vpop.eup %5901  ;;  %5927 = vrcp.f32 %v5132_v6  ;;  %v5107_v44 = vmul.f32 1.442695, %v5044_v27 }
 0x3f7   : > { %v5904_v21 = vpop.eup %5903  ;;  %v5186_v41 = vmul.f32 %v5902_v18, %v10107_v40  ;;  %5929 = vrcp.f32 %v5130_v3  ;;  %v5103_v9 = vmul.f32 1.442695, %v5042_v45 }
 0x3f8   : > { %v5906_v49 = vpop.eup %5905  ;;  %v5135_v47 = vadd.f32 1.0, %v5904_v21  ;;  %5931 = vpow2.f32 %v5107_v44 }
 0x3f9   : > { %v5908_v4 = vpop.eup %5907  ;;  %5219 = vst.msk [vmem:[%s9984_s20 + $0x68] sm:$0xff] %vm5205_vm6, %v5186_v41  ;;  %v5191_v62 = vmul.f32 %v5906_v49, %v10110_v26  ;;  %5933 = vpow2.f32 %v5103_v9 }
 0x3fa   : > { %v5910_v22 = vpop.eup %5909  ;;  %5935 = vrcp.f32 %v5135_v47  ;;  %v5133_v52 = vadd.f32 1.0, %v5908_v4 }
 0x3fb   : > { %v5912_v16 = vpop.eup %5911  ;;  %5224 = vst.msk [vmem:[%s9984_s20 + $0x90] sm:$0xff] %vm5205_vm6, %v5191_v62  ;;  %v5189_v40 = vmul.f32 %v5910_v22, %v10129_v54 }
 0x3fc   : > { %v5914_v0 = vpop.eup %5913  ;;  %5937 = vrcp.f32 %v5133_v52  ;;  %v5136_v20 = vadd.f32 1.0, %v5912_v16 }
 0x3fd   : > { %v5916_v59 = vpop.eup %5915  ;;  %5222 = vst.msk [vmem:[%s9984_s20 + $0x80] sm:$0xff] %vm5205_vm6, %v5189_v40  ;;  %v5192_v26 = vmul.f32 %v5914_v0, %v10132_v48 }
 0x3fe   : > { %v5918_v2 = vpop.eup %5917  ;;  %v5190_v7 = vmul.f32 %v5916_v59, %v10142_v23  ;;  %5939 = vrcp.f32 %v5136_v20 }
 0x3ff   : > { %v5920_v33 = vpop.eup %5919  ;;  %5225 = vst.msk [vmem:[%s9984_s20 + $0x98] sm:$0xff] %vm5205_vm6, %v5192_v26  ;;  %v5134_v34 = vadd.f32 1.0, %v5918_v2 }
 0x400   : > { %v5922_v42 = vpop.eup %5921  ;;  %5223 = vst.msk [vmem:[%s9984_s20 + $0x88] sm:$0xff] %vm5205_vm6, %v5190_v7  ;;  %v5195_v54 = vmul.f32 %v5920_v33, %v10146_v19 }
 0x401   : > { %v5924_v63 = vpop.eup %5923  ;;  %5941 = vrcp.f32 %v5134_v34  ;;  %v5139_v58 = vadd.f32 1.0, %v5922_v42 }
 0x402   : > { %v5926_v57 = vpop.eup %5925  ;;  %5228 = vst.msk [vmem:[%s9984_s20 + $0xb0] sm:$0xff] %vm5205_vm6, %v5195_v54  ;;  %v5193_v48 = vmul.f32 %v5924_v63, %v10156_v32 }
 0x403   : > { %v5928_v23 = vpop.eup %5927  ;;  %5943 = vrcp.f32 %v5139_v58  ;;  %v5137_v28 = vadd.f32 1.0, %v5926_v57 }
 0x404   : > { %v5930_v29 = vpop.eup %5929  ;;  %5226 = vst.msk [vmem:[%s9984_s20 + $0xa0] sm:$0xff] %vm5205_vm6, %v5193_v48  ;;  %v5196_v10 = vmul.f32 %v5928_v23, %v10160_v60 }
 0x405   : > { %v5932_v19 = vpop.eup %5931  ;;  %v5194_v38 = vmul.f32 %v5930_v29, %v10164_v35  ;;  %5945 = vrcp.f32 %v5137_v28 }
 0x406   : > { %v5934_v1 = vpop.eup %5933  ;;  %5229 = vst.msk [vmem:[%s9984_s20 + $0xb8] sm:$0xff] %vm5205_vm6, %v5196_v10  ;;  %v5140_v24 = vadd.f32 1.0, %v5932_v19 }
 0x407   : > { %v5936_v32 = vpop.eup %5935  ;;  %5227 = vst.msk [vmem:[%s9984_s20 + $0xa8] sm:$0xff] %vm5205_vm6, %v5194_v38  ;;  %v5138_v30 = vadd.f32 1.0, %v5934_v1 }
 0x408   : > { %v5199_v13 = vmul.f32 %v5936_v32, %v10170_v17  ;;  %5947 = vrcp.f32 %v5140_v24 }
 0x409   : > { %v5938_v60 = vpop.eup %5937  ;;  %5949 = vrcp.f32 %v5138_v30 }
 0x40a   : > { %5232 = vst.msk [vmem:[%s9984_s20 + $0xd0] sm:$0xff] %vm5205_vm6, %v5199_v13  ;;  %v5197_v35 = vmul.f32 %v5938_v60, %v10174_v51 }
 0x40b   : > { %v5940_v50 = vpop.eup %5939 }
 0x40c   : > { %5230 = vst.msk [vmem:[%s9984_s20 + $0xc0] sm:$0xff] %vm5205_vm6, %v5197_v35  ;;  %v5200_v31 = vmul.f32 %v5940_v50, %v10184_v37 }
 0x40e   : > { %v5942_v5 = vpop.eup %5941  ;;  %5233 = vst.msk [vmem:[%s9984_s20 + $0xd8] sm:$0xff] %vm5205_vm6, %v5200_v31 }
 0x40f   : > { %v5198_v17 = vmul.f32 %v5942_v5, %v10188_v39 }
 0x410   : > { %v5944_v61 = vpop.eup %5943 }
 0x411   : > { %5231 = vst.msk [vmem:[%s9984_s20 + $0xc8] sm:$0xff] %vm5205_vm6, %v5198_v17  ;;  %v5203_v36 = vmul.f32 %v5944_v61, %v10200_v43 }
 0x412   : > { %v5946_v12 = vpop.eup %5945 }
 0x413   : > { %5236 = vst.msk [vmem:[%s9984_s20 + $0xf0] sm:$0xff] %vm5205_vm6, %v5203_v36  ;;  %v5201_v51 = vmul.f32 %v5946_v12, %v10208_v25 }
 0x415   : > { %v5948_v56 = vpop.eup %5947  ;;  %5234 = vst.msk [vmem:[%s9984_s20 + $0xe0] sm:$0xff] %vm5205_vm6, %v5201_v51 }
 0x416   : > { %v5950_v37 = vpop.eup %5949  ;;  %v5204_v15 = vmul.f32 %v5948_v56, %v10216_v46 }
 0x417   : > { %v5202_v11 = vmul.f32 %v5950_v37, %v10222_v8 }
 0x418   : > { %5237 = vst.msk [vmem:[%s9984_s20 + $0xf8] sm:$0xff] %vm5205_vm6, %v5204_v15 }
 0x419   : > { %5235 = vst.msk [vmem:[%s9984_s20 + $0xe8] sm:$0xff] %vm5205_vm6, %v5202_v11 }
 0x41a PF: > { %s15_s18 = sadd.s32 1, %s5958_s18  }
 0x41b   : > { %p12_p4 = scmp.ge.s32.totalorder %s15_s18, 4  }
 0x41d   :  { %14 = sbr.rel (!%p12_p4) target bundleno = 1 (0x1), region = 73 }

</bundles_post_ra>
